<compile_context>
chip_gen: v7x
topology: tpu7x:2x2x1
jax: 0.10.0
libtpu: 0.0.40
codegen_flags: <defaults>
</compile_context>

<pallas_src>
import functools

import jax
import jax.numpy as jnp
from jax import lax
from jax.experimental import pallas as pl
from jax.experimental.pallas import tpu as pltpu


def _round_up(x, m):
    return (x + m - 1) // m * m


def _pick_tq(s_pad):
    for tq in (512, 256, 128):
        if s_pad % tq == 0:
            return tq
    return s_pad


def _egp_kernel(h_ref, w1q_ref, b1q_ref, w1k_ref, b1k_ref,
                w2e_ref, b2e_ref, w2o_ref, b2o_ref,
                cos_ref, sa_ref, sb_ref, tokr_ref, tokc_ref,
                out_ref,
                base_sc, be_sc, bo_sc,
                *, inner_dim, ent_type_size, seq_len, tq, epsilon):
    qt = pl.program_id(1)
    e = pl.program_id(2)

    # ---- per-(batch, q-tile) work, done once (entity axis is innermost) ----
    @pl.when(e == 0)
    def _():
        q0 = pl.multiple_of(qt * tq, tq)
        h = h_ref[...]                                   # (S, H) bf16
        h_s = h_ref[pl.ds(q0, tq), :]                    # (TQ, H) bf16

        def rope(x, cos, sa, sb):
            # rope(x)[j] = x[j]*cos[j] - x[j+1]*sin[j] (j even)
            #                          + x[j-1]*sin[j] (j odd)
            # wrap-around lanes are zeroed by the 0 entries of sa/sb.
            return (x * cos
                    + pltpu.roll(x, shift=inner_dim - 1, axis=1) * sa
                    + pltpu.roll(x, shift=1, axis=1) * sb)

        # keys: full sequence
        kw = jnp.dot(h, w1k_ref[...],
                     preferred_element_type=jnp.float32) + b1k_ref[...]
        kw = rope(kw, cos_ref[...], sa_ref[...], sb_ref[...]).astype(jnp.bfloat16)

        # queries: this tile only; fold 1/sqrt(inner) into qw
        scale = 1.0 / (float(inner_dim) ** 0.5)
        qw = jnp.dot(h_s, w1q_ref[...],
                     preferred_element_type=jnp.float32) + b1q_ref[...]
        qw = (rope(qw,
                   cos_ref[pl.ds(q0, tq), :],
                   sa_ref[pl.ds(q0, tq), :],
                   sb_ref[pl.ds(q0, tq), :]) * scale).astype(jnp.bfloat16)

        # qk[m, n] = qw[m, :] . kw[n, :]  (contract dim 1 of both; no kw.T)
        qk = lax.dot_general(qw, kw, (((1,), (1,)), ((), ())),
                             preferred_element_type=jnp.float32)   # (TQ, S)

        rm = tokc_ref[...]                               # (TQ, 1) query mask
        cm = tokr_ref[...]                               # (1, S)  key mask
        m = rm * cm                                      # (TQ, S)

        # strictly-lower-triangular -eps term, generated in-kernel (no HBM read)
        row = lax.broadcasted_iota(jnp.int32, (tq, seq_len), 0) + q0
        col = lax.broadcasted_iota(jnp.int32, (tq, seq_len), 1)
        tril_add = jnp.where(row > col, -epsilon, 0.0)

        base_sc[...] = qk * m - epsilon * (1.0 - m) + tril_add

        # dense_2 bias halves, pre-masked so the epilogue needs no (TQ,S) mask:
        #   be'[e, n] = key-side bias * key-mask[n]
        #   bo'[m, e] = query-side bias * query-mask[m]
        be_sc[...] = ((lax.dot_general(w2e_ref[...], h, (((1,), (1,)), ((), ())),
                                       preferred_element_type=jnp.float32)
                       + b2e_ref[...]) * 0.5) * cm       # (ent, S)
        bo_sc[...] = ((jnp.dot(h_s, w2o_ref[...],
                               preferred_element_type=jnp.float32)
                       + b2o_ref[...]) * 0.5) * rm       # (TQ, ent)

    # ---- per-entity epilogue: one base load, two rank-1 FMAs, one store ----
    be = be_sc[pl.ds(e, 1), :]                           # (1, S)
    onehot = (lax.broadcasted_iota(jnp.int32, (1, ent_type_size), 1)
              == e).astype(jnp.float32)                  # (1, ent)
    bo = jnp.sum(bo_sc[...] * onehot, axis=1, keepdims=True)   # (TQ, 1)
    rm = tokc_ref[...]                                   # (TQ, 1)
    cm = tokr_ref[...]                                   # (1, S)
    out_ref[...] = base_sc[...] + rm * be + cm * bo


def effi_global_pointer(last_hidden_state, token_lengh, w1, b1, w2, b2,
                        ent_type_size, inner_dim, epsilon=1e12):
    """EffiGlobalPointer head (post-encoder, eval mode).

    last_hidden_state: (B, S, H) encoder output
    token_lengh:       (B, S) 0/1 pad mask
    w1: (2*inner, H), b1: (2*inner,)   -- dense_1, torch (out, in) layout
    w2: (2*ent,  H), b2: (2*ent,)      -- dense_2
    returns logits (B, ent_type_size, S, S) float32
    """
    B, S, H = last_hidden_state.shape
    eps = float(epsilon)
    two_inner = 2 * inner_dim

    # Pad S and H to multiples of 128 so hot-loop stores/loads are lane-dense;
    # padded key/query positions carry mask 0 and the output is sliced back.
    s_pad = _round_up(S, 128)
    h_pad = _round_up(H, 128)

    hidden = last_hidden_state
    if h_pad != H or s_pad != S:
        hidden = jnp.pad(hidden, ((0, 0), (0, s_pad - S), (0, h_pad - H)))
    hidden = hidden.astype(jnp.bfloat16)

    mask = token_lengh.astype(jnp.float32)
    if s_pad != S:
        mask = jnp.pad(mask, ((0, 0), (0, s_pad - S)))

    # dense_1: split torch interleaved outputs into q / k halves
    # (torch: qw = outputs[..., 0::2], kw = outputs[..., 1::2]).
    w1_t = jnp.transpose(w1)                             # (H, 2*inner)
    w1q = w1_t[:, 0::2]
    w1k = w1_t[:, 1::2]
    if h_pad != H:
        w1q = jnp.pad(w1q, ((0, h_pad - H), (0, 0)))
        w1k = jnp.pad(w1k, ((0, h_pad - H), (0, 0)))
    w1q = w1q.astype(jnp.bfloat16)
    w1k = w1k.astype(jnp.bfloat16)
    b1q = b1[0::2][None, :].astype(jnp.float32)          # (1, inner)
    b1k = b1[1::2][None, :].astype(jnp.float32)          # (1, inner)

    # dense_2: even channels -> key-side bias, odd channels -> query-side bias.
    w2_t = jnp.transpose(w2)                             # (H, 2*ent)
    w2e_t = jnp.transpose(w2_t[:, 0::2])                 # (ent, H)
    w2o = w2_t[:, 1::2]                                  # (H, ent)
    if h_pad != H:
        w2e_t = jnp.pad(w2e_t, ((0, 0), (0, h_pad - H)))
        w2o = jnp.pad(w2o, ((0, h_pad - H), (0, 0)))
    w2e_t = w2e_t.astype(jnp.bfloat16)
    w2o = w2o.astype(jnp.bfloat16)
    b2_even = b2[0::2][:, None].astype(jnp.float32)      # (ent, 1)
    b2_odd = b2[1::2][None, :].astype(jnp.float32)       # (1, ent)

    # RoPE tables with the sign pattern folded into two sin tables.
    pos = jnp.arange(s_pad, dtype=jnp.float32)[:, None]
    idx = jnp.arange(inner_dim // 2, dtype=jnp.float32)
    ang = pos * jnp.power(10000.0, -2.0 * idx / inner_dim)      # (S, inner/2)
    cos_tab = jnp.repeat(jnp.cos(ang), 2, axis=-1).astype(jnp.float32)
    sin_tab = jnp.repeat(jnp.sin(ang), 2, axis=-1)
    parity = jnp.arange(inner_dim) % 2
    sa_tab = jnp.where(parity == 0, -sin_tab, 0.0).astype(jnp.float32)
    sb_tab = jnp.where(parity == 1, sin_tab, 0.0).astype(jnp.float32)

    tok_row = mask[:, None, :]                           # (B, 1, S)  key mask
    tok_col = mask[:, :, None]                           # (B, S, 1)  query mask

    tq = _pick_tq(s_pad)
    n_qt = s_pad // tq

    kernel = functools.partial(_egp_kernel, inner_dim=inner_dim,
                               ent_type_size=ent_type_size, seq_len=s_pad,
                               tq=tq, epsilon=eps)

    # Explicit VMEM budget: double-buffered blocks + scratch, ~40% headroom.
    est = (2 * tq * s_pad * 4                            # out blocks
           + tq * s_pad * 4                              # base scratch
           + 2 * s_pad * h_pad * 2                       # hidden (bf16)
           + ent_type_size * s_pad * 4 + tq * ent_type_size * 4
           + 2 * (2 * h_pad * inner_dim * 2              # w1q + w1k
                  + 2 * ent_type_size * h_pad * 2        # w2e + w2o
                  + 3 * s_pad * inner_dim * 4            # cos / sa / sb
                  + s_pad * 4 + tq * 4                   # mask vectors
                  + two_inner * 4 + 2 * ent_type_size * 4))
    vmem_limit = min(110 * 1024 * 1024, max(int(est * 1.4), 16 * 1024 * 1024))

    # NOTE: grid-invariant inputs (weights / RoPE tables) could additionally be
    # single-buffered via BlockSpec(pipeline_mode=pl.Buffered(1)) to shave a
    # further ~1-2 MiB; kept default-buffered here for toolchain portability.
    out = pl.pallas_call(
        kernel,
        out_shape=jax.ShapeDtypeStruct((B, ent_type_size, s_pad, s_pad),
                                       jnp.float32),
        grid_spec=pltpu.PrefetchScalarGridSpec(
            num_scalar_prefetch=0,
            grid=(B, n_qt, ent_type_size),
            in_specs=[
                pl.BlockSpec((None, s_pad, h_pad), lambda b, q, e: (b, 0, 0)),
                pl.BlockSpec((h_pad, inner_dim), lambda b, q, e: (0, 0)),
                pl.BlockSpec((1, inner_dim), lambda b, q, e: (0, 0)),
                pl.BlockSpec((h_pad, inner_dim), lambda b, q, e: (0, 0)),
                pl.BlockSpec((1, inner_dim), lambda b, q, e: (0, 0)),
                pl.BlockSpec((ent_type_size, h_pad), lambda b, q, e: (0, 0)),
                pl.BlockSpec((ent_type_size, 1), lambda b, q, e: (0, 0)),
                pl.BlockSpec((h_pad, ent_type_size), lambda b, q, e: (0, 0)),
                pl.BlockSpec((1, ent_type_size), lambda b, q, e: (0, 0)),
                pl.BlockSpec((s_pad, inner_dim), lambda b, q, e: (0, 0)),
                pl.BlockSpec((s_pad, inner_dim), lambda b, q, e: (0, 0)),
                pl.BlockSpec((s_pad, inner_dim), lambda b, q, e: (0, 0)),
                pl.BlockSpec((None, 1, s_pad), lambda b, q, e: (b, 0, 0)),
                pl.BlockSpec((None, tq, 1), lambda b, q, e: (b, q, 0)),
            ],
            out_specs=pl.BlockSpec((None, None, tq, s_pad),
                                   lambda b, q, e: (b, e, q, 0)),
            scratch_shapes=[
                pltpu.VMEM((tq, s_pad), jnp.float32),              # base strip
                pltpu.VMEM((ent_type_size, s_pad), jnp.float32),   # key-side bias
                pltpu.VMEM((tq, ent_type_size), jnp.float32),      # query-side bias
            ]),
        compiler_params=pltpu.CompilerParams(
            dimension_semantics=("parallel", "parallel", "arbitrary"),
            vmem_limit_bytes=vmem_limit),
    )(hidden, w1q, b1q, w1k, b1k, w2e_t, b2_even, w2o, b2_odd,
      cos_tab, sa_tab, sb_tab, tok_row, tok_col)

    if s_pad != S:
        out = out[:, :, :S, :S]
    return out


def _reference(last_hidden_state, token_lengh, w1, b1, w2, b2, ent, inner,
               eps=1e12):
    """Pure-JAX port of EffiGlobalPointer.forward (eval mode, post-encoder)."""
    B, S, H = last_hidden_state.shape
    outputs = last_hidden_state @ w1.T + b1                       # (B, S, 2*inner)
    qw, kw = outputs[..., 0::2], outputs[..., 1::2]

    pos = jnp.arange(S, dtype=jnp.float32)[:, None]
    idx = jnp.arange(inner // 2, dtype=jnp.float32)
    ang = pos * jnp.power(10000.0, -2.0 * idx / inner)
    cos_pos = jnp.repeat(jnp.cos(ang), 2, -1)[None]               # (1, S, inner)
    sin_pos = jnp.repeat(jnp.sin(ang), 2, -1)[None]

    def rope(x):
        x2 = jnp.stack([-x[..., 1::2], x[..., 0::2]], -1).reshape(x.shape)
        return x * cos_pos + x2 * sin_pos

    qw, kw = rope(qw), rope(kw)
    logits = jnp.einsum('bmd,bnd->bmn', qw, kw) / (inner ** 0.5)  # (B, S, S)
    bias = jnp.einsum('bnh->bhn', last_hidden_state @ w2.T + b2) / 2  # (B, 2*ent, S)
    logits = logits[:, None] + bias[:, 0::2, None] + bias[:, 1::2, :, None]

    mask = token_lengh.astype(jnp.float32)
    rm = mask[:, None, :, None]
    cm = mask[:, None, None, :]
    logits = logits * rm + (-eps) * (1.0 - rm)
    logits = logits * cm + (-eps) * (1.0 - cm)
    tril = jnp.tril(jnp.ones((S, S), jnp.float32), -1)
    logits = logits - tril * eps
    return logits


if __name__ == "__main__":
    B, S, H = 2, 8, 32
    ent_type_size, inner_dim = 4, 64

    key = jax.random.PRNGKey(0)
    k1, k2, k3, k4, k5 = jax.random.split(key, 5)

    last_hidden_state = jax.random.normal(k1, (B, S, H), dtype=jnp.float32)

    # nn.Linear params, torch layout: weight (out, in), bias (out,)
    w1 = jax.random.normal(k2, (inner_dim * 2, H), dtype=jnp.float32) * 0.02
    b1 = jax.random.normal(k3, (inner_dim * 2,), dtype=jnp.float32) * 0.02
    w2 = jax.random.normal(k4, (ent_type_size * 2, H), dtype=jnp.float32) * 0.02
    b2 = jax.random.normal(k5, (ent_type_size * 2,), dtype=jnp.float32) * 0.02

    # token_lengh: 0/1 pad mask per (batch, seq) position
    lengths = jnp.array([6, 5])
    token_lengh = (jnp.arange(S)[None, :] < lengths[:, None]).astype(jnp.float32)

    out = effi_global_pointer(last_hidden_state, token_lengh, w1, b1, w2, b2,
                              ent_type_size, inner_dim)
    jax.block_until_ready(out)

    ref = _reference(last_hidden_state, token_lengh, w1, b1, w2, b2,
                     ent_type_size, inner_dim)
    assert out.shape == (B, ent_type_size, S, S)
    # bf16 MXU inputs with f32 accumulation -> modestly relaxed tolerance.
    err = float(jnp.max(jnp.abs(out - ref)))
    assert jnp.allclose(out, ref, atol=5e-3, rtol=5e-3), f"max abs err {err}"

    print("KERNEL_OK")
</pallas_src>

<mosaic_0001>
module attributes {stable_mosaic.version = 11 : i64} {
  func.func @_egp_kernel(%arg0: i32, %arg1: i32, %arg2: i32, %arg3: memref<1x128x128xbf16, #tpu.memory_space<vmem>>, %arg4: memref<128x64xbf16, #tpu.memory_space<vmem>>, %arg5: memref<1x64xf32, #tpu.memory_space<vmem>>, %arg6: memref<128x64xbf16, #tpu.memory_space<vmem>>, %arg7: memref<1x64xf32, #tpu.memory_space<vmem>>, %arg8: memref<4x128xbf16, #tpu.memory_space<vmem>>, %arg9: memref<4x1xf32, #tpu.memory_space<vmem>>, %arg10: memref<128x4xbf16, #tpu.memory_space<vmem>>, %arg11: memref<1x4xf32, #tpu.memory_space<vmem>>, %arg12: memref<128x64xf32, #tpu.memory_space<vmem>>, %arg13: memref<128x64xf32, #tpu.memory_space<vmem>>, %arg14: memref<128x64xf32, #tpu.memory_space<vmem>>, %arg15: memref<1x1x128xf32, #tpu.memory_space<vmem>>, %arg16: memref<1x128x1xf32, #tpu.memory_space<vmem>>, %arg17: memref<1x1x128x128xf32, #tpu.memory_space<vmem>>, %arg18: memref<128x128xf32, #tpu.memory_space<vmem>>, %arg19: memref<4x128xf32, #tpu.memory_space<vmem>>, %arg20: memref<128x4xf32, #tpu.memory_space<vmem>>) attributes {dimension_semantics = [#tpu.dimension_semantics<parallel>, #tpu.dimension_semantics<parallel>, #tpu.dimension_semantics<arbitrary>], iteration_bounds = array<i64: 2, 1, 4>, scalar_prefetch = 0 : i64, scratch_operands = 3 : i64, tpu.core_type = #tpu.core_type<tc>, window_params = [{transform_indices = @transform_0, window_bounds = array<i64: 1, 128, 128>}, {pipeline_mode = #tpu.pipeline_mode<synchronous>, transform_indices = @transform_1, window_bounds = array<i64: 128, 64>}, {pipeline_mode = #tpu.pipeline_mode<synchronous>, transform_indices = @transform_2, window_bounds = array<i64: 1, 64>}, {pipeline_mode = #tpu.pipeline_mode<synchronous>, transform_indices = @transform_3, window_bounds = array<i64: 128, 64>}, {pipeline_mode = #tpu.pipeline_mode<synchronous>, transform_indices = @transform_4, window_bounds = array<i64: 1, 64>}, {pipeline_mode = #tpu.pipeline_mode<synchronous>, transform_indices = @transform_5, window_bounds = array<i64: 4, 128>}, {pipeline_mode = #tpu.pipeline_mode<synchronous>, transform_indices = @transform_6, window_bounds = array<i64: 4, 1>}, {pipeline_mode = #tpu.pipeline_mode<synchronous>, transform_indices = @transform_7, window_bounds = array<i64: 128, 4>}, {pipeline_mode = #tpu.pipeline_mode<synchronous>, transform_indices = @transform_8, window_bounds = array<i64: 1, 4>}, {pipeline_mode = #tpu.pipeline_mode<synchronous>, transform_indices = @transform_9, window_bounds = array<i64: 128, 64>}, {pipeline_mode = #tpu.pipeline_mode<synchronous>, transform_indices = @transform_10, window_bounds = array<i64: 128, 64>}, {pipeline_mode = #tpu.pipeline_mode<synchronous>, transform_indices = @transform_11, window_bounds = array<i64: 128, 64>}, {transform_indices = @transform_12, window_bounds = array<i64: 1, 1, 128>}, {transform_indices = @transform_13, window_bounds = array<i64: 1, 128, 1>}, {transform_indices = @transform_14, window_bounds = array<i64: 1, 1, 128, 128>}]} {
    %c0_i32 = arith.constant 0 : i32
    %0 = arith.cmpi eq, %arg2, %c0_i32 : i32
    %1 = arith.extui %0 : i1 to i32
    %c0_i32_0 = arith.constant 0 : i32
    %2 = arith.cmpi ne, %1, %c0_i32_0 : i32
    scf.if %2 {
      %c128_i32 = arith.constant 128 : i32
      %31 = arith.muli %arg1, %c128_i32 : i32
      %32 = tpu.assume_multiple %31, 128 : i32
      %c0_15 = arith.constant 0 : index
      %c0_16 = arith.constant 0 : index
      %c0_17 = arith.constant 0 : index
      %33 = vector.load %arg3[%c0_15, %c0_16, %c0_17] : memref<1x128x128xbf16, #tpu.memory_space<vmem>>, vector<1x128x128xbf16>
      %34 = vector.shape_cast %33 : vector<1x128x128xbf16> to vector<128x128xbf16>
      %c0_18 = arith.constant 0 : index
      %35 = arith.index_cast %32 : i32 to index
      %c0_19 = arith.constant 0 : index
      %36 = vector.load %arg3[%c0_18, %35, %c0_19] : memref<1x128x128xbf16, #tpu.memory_space<vmem>>, vector<1x128x128xbf16>
      %37 = vector.shape_cast %36 : vector<1x128x128xbf16> to vector<128x128xbf16>
      %c0_20 = arith.constant 0 : index
      %c0_21 = arith.constant 0 : index
      %38 = vector.load %arg6[%c0_20, %c0_21] : memref<128x64xbf16, #tpu.memory_space<vmem>>, vector<128x64xbf16>
      %cst_22 = arith.constant dense<0.000000e+00> : vector<128x64xf32>
      %39 = tpu.matmul %34, %38, %cst_22 {dimension_numbers = #tpu.dot_dimension_numbers<[1], [0], [0], [1], [0, 0, 1, 1], [], []>} : vector<128x128xbf16>, vector<128x64xbf16>, vector<128x64xf32> -> vector<128x64xf32>
      %c0_23 = arith.constant 0 : index
      %c0_24 = arith.constant 0 : index
      %40 = vector.load %arg7[%c0_23, %c0_24] : memref<1x64xf32, #tpu.memory_space<vmem>>, vector<1x64xf32>
      %41 = vector.broadcast %40 : vector<1x64xf32> to vector<128x64xf32>
      %42 = arith.addf %39, %41 : vector<128x64xf32>
      %c0_25 = arith.constant 0 : index
      %c0_26 = arith.constant 0 : index
      %43 = vector.load %arg12[%c0_25, %c0_26] : memref<128x64xf32, #tpu.memory_space<vmem>>, vector<128x64xf32>
      %c0_27 = arith.constant 0 : index
      %c0_28 = arith.constant 0 : index
      %44 = vector.load %arg13[%c0_27, %c0_28] : memref<128x64xf32, #tpu.memory_space<vmem>>, vector<128x64xf32>
      %c0_29 = arith.constant 0 : index
      %c0_30 = arith.constant 0 : index
      %45 = vector.load %arg14[%c0_29, %c0_30] : memref<128x64xf32, #tpu.memory_space<vmem>>, vector<128x64xf32>
      %46 = arith.mulf %42, %43 : vector<128x64xf32>
      %c63_i32 = arith.constant 63 : i32
      %47 = tpu.dynamic_rotate %42 by %c63_i32 dim 1 : vector<128x64xf32>, i32 -> vector<128x64xf32>
      %48 = arith.mulf %47, %44 : vector<128x64xf32>
      %49 = arith.addf %46, %48 : vector<128x64xf32>
      %c1_i32 = arith.constant 1 : i32
      %50 = tpu.dynamic_rotate %42 by %c1_i32 dim 1 : vector<128x64xf32>, i32 -> vector<128x64xf32>
      %51 = arith.mulf %50, %45 : vector<128x64xf32>
      %52 = arith.addf %49, %51 : vector<128x64xf32>
      %53 = arith.truncf %52 : vector<128x64xf32> to vector<128x64xbf16>
      %c0_31 = arith.constant 0 : index
      %c0_32 = arith.constant 0 : index
      %54 = vector.load %arg4[%c0_31, %c0_32] : memref<128x64xbf16, #tpu.memory_space<vmem>>, vector<128x64xbf16>
      %cst_33 = arith.constant dense<0.000000e+00> : vector<128x64xf32>
      %55 = tpu.matmul %37, %54, %cst_33 {dimension_numbers = #tpu.dot_dimension_numbers<[1], [0], [0], [1], [0, 0, 1, 1], [], []>} : vector<128x128xbf16>, vector<128x64xbf16>, vector<128x64xf32> -> vector<128x64xf32>
      %c0_34 = arith.constant 0 : index
      %c0_35 = arith.constant 0 : index
      %56 = vector.load %arg5[%c0_34, %c0_35] : memref<1x64xf32, #tpu.memory_space<vmem>>, vector<1x64xf32>
      %57 = vector.broadcast %56 : vector<1x64xf32> to vector<128x64xf32>
      %58 = arith.addf %55, %57 : vector<128x64xf32>
      %59 = arith.index_cast %32 : i32 to index
      %c0_36 = arith.constant 0 : index
      %60 = vector.load %arg12[%59, %c0_36] : memref<128x64xf32, #tpu.memory_space<vmem>>, vector<128x64xf32>
      %61 = arith.index_cast %32 : i32 to index
      %c0_37 = arith.constant 0 : index
      %62 = vector.load %arg13[%61, %c0_37] : memref<128x64xf32, #tpu.memory_space<vmem>>, vector<128x64xf32>
      %63 = arith.index_cast %32 : i32 to index
      %c0_38 = arith.constant 0 : index
      %64 = vector.load %arg14[%63, %c0_38] : memref<128x64xf32, #tpu.memory_space<vmem>>, vector<128x64xf32>
      %65 = arith.mulf %58, %60 : vector<128x64xf32>
      %c63_i32_39 = arith.constant 63 : i32
      %66 = tpu.dynamic_rotate %58 by %c63_i32_39 dim 1 : vector<128x64xf32>, i32 -> vector<128x64xf32>
      %67 = arith.mulf %66, %62 : vector<128x64xf32>
      %68 = arith.addf %65, %67 : vector<128x64xf32>
      %c1_i32_40 = arith.constant 1 : i32
      %69 = tpu.dynamic_rotate %58 by %c1_i32_40 dim 1 : vector<128x64xf32>, i32 -> vector<128x64xf32>
      %70 = arith.mulf %69, %64 : vector<128x64xf32>
      %71 = arith.addf %68, %70 : vector<128x64xf32>
      %cst_41 = arith.constant 1.250000e-01 : f32
      %72 = vector.broadcast %cst_41 : f32 to vector<128x64xf32>
      %73 = arith.mulf %71, %72 : vector<128x64xf32>
      %74 = arith.truncf %73 : vector<128x64xf32> to vector<128x64xbf16>
      %cst_42 = arith.constant dense<0.000000e+00> : vector<128x128xf32>
      %75 = tpu.matmul %74, %53, %cst_42 {dimension_numbers = #tpu.dot_dimension_numbers<[1], [1], [0], [0], [0, 0, 1, 0], [], []>} : vector<128x64xbf16>, vector<128x64xbf16>, vector<128x128xf32> -> vector<128x128xf32>
      %c0_43 = arith.constant 0 : index
      %c0_44 = arith.constant 0 : index
      %c0_45 = arith.constant 0 : index
      %76 = vector.load %arg16[%c0_43, %c0_44, %c0_45] : memref<1x128x1xf32, #tpu.memory_space<vmem>>, vector<1x128x1xf32>
      %77 = vector.shape_cast %76 : vector<1x128x1xf32> to vector<128x1xf32>
      %c0_46 = arith.constant 0 : index
      %c0_47 = arith.constant 0 : index
      %c0_48 = arith.constant 0 : index
      %78 = vector.load %arg15[%c0_46, %c0_47, %c0_48] : memref<1x1x128xf32, #tpu.memory_space<vmem>>, vector<1x1x128xf32>
      %79 = vector.shape_cast %78 : vector<1x1x128xf32> to vector<1x128xf32>
      %80 = vector.broadcast %77 : vector<128x1xf32> to vector<128x128xf32>
      %81 = vector.broadcast %79 : vector<1x128xf32> to vector<128x128xf32>
      %82 = arith.mulf %80, %81 : vector<128x128xf32>
      %83 = tpu.iota {dimensions = array<i32: 0>} : vector<128x128xi32>
      %84 = vector.broadcast %32 : i32 to vector<128x128xi32>
      %85 = arith.addi %83, %84 : vector<128x128xi32>
      %86 = tpu.iota {dimensions = array<i32: 1>} : vector<128x128xi32>
      %87 = arith.cmpi sgt, %85, %86 : vector<128x128xi32>
      %cst_49 = arith.constant -9.99999995E+11 : f32
      %cst_50 = arith.constant 0.000000e+00 : f32
      %88 = vector.broadcast %cst_49 : f32 to vector<128x128xf32>
      %89 = vector.broadcast %cst_50 : f32 to vector<128x128xf32>
      %90 = arith.select %87, %88, %89 : vector<128x128xi1>, vector<128x128xf32>
      %91 = arith.mulf %75, %82 : vector<128x128xf32>
      %cst_51 = arith.constant 1.000000e+00 : f32
      %92 = vector.broadcast %cst_51 : f32 to vector<128x128xf32>
      %93 = arith.subf %92, %82 : vector<128x128xf32>
      %cst_52 = arith.constant 9.99999995E+11 : f32
      %94 = vector.broadcast %cst_52 : f32 to vector<128x128xf32>
      %95 = arith.mulf %94, %93 : vector<128x128xf32>
      %96 = arith.subf %91, %95 : vector<128x128xf32>
      %97 = arith.addf %96, %90 : vector<128x128xf32>
      %c0_53 = arith.constant 0 : index
      %c0_54 = arith.constant 0 : index
      %98 = vector.load %arg18[%c0_53, %c0_54] : memref<128x128xf32, #tpu.memory_space<vmem>>, vector<128x128xf32>
      tpu.vector_store %arg18[%c0_53, %c0_54], %97 {strides = array<i32>} : memref<128x128xf32, #tpu.memory_space<vmem>>, vector<128x128xf32>,
      %c0_55 = arith.constant 0 : index
      %c0_56 = arith.constant 0 : index
      %99 = vector.load %arg8[%c0_55, %c0_56] : memref<4x128xbf16, #tpu.memory_space<vmem>>, vector<4x128xbf16>
      %cst_57 = arith.constant dense<0.000000e+00> : vector<4x128xf32>
      %100 = tpu.matmul %99, %34, %cst_57 {dimension_numbers = #tpu.dot_dimension_numbers<[1], [1], [0], [0], [0, 0, 1, 0], [], []>} : vector<4x128xbf16>, vector<128x128xbf16>, vector<4x128xf32> -> vector<4x128xf32>
      %c0_58 = arith.constant 0 : index
      %c0_59 = arith.constant 0 : index
      %101 = vector.load %arg9[%c0_58, %c0_59] : memref<4x1xf32, #tpu.memory_space<vmem>>, vector<4x1xf32>
      %102 = vector.broadcast %101 : vector<4x1xf32> to vector<4x128xf32>
      %103 = arith.addf %100, %102 : vector<4x128xf32>
      %cst_60 = arith.constant 5.000000e-01 : f32
      %104 = vector.broadcast %cst_60 : f32 to vector<4x128xf32>
      %105 = arith.mulf %103, %104 : vector<4x128xf32>
      %106 = vector.broadcast %79 : vector<1x128xf32> to vector<4x128xf32>
      %107 = arith.mulf %105, %106 : vector<4x128xf32>
      %c0_61 = arith.constant 0 : index
      %c0_62 = arith.constant 0 : index
      %108 = vector.load %arg19[%c0_61, %c0_62] : memref<4x128xf32, #tpu.memory_space<vmem>>, vector<4x128xf32>
      tpu.vector_store %arg19[%c0_61, %c0_62], %107 {strides = array<i32>} : memref<4x128xf32, #tpu.memory_space<vmem>>, vector<4x128xf32>,
      %c0_63 = arith.constant 0 : index
      %c0_64 = arith.constant 0 : index
      %109 = vector.load %arg10[%c0_63, %c0_64] : memref<128x4xbf16, #tpu.memory_space<vmem>>, vector<128x4xbf16>
      %cst_65 = arith.constant dense<0.000000e+00> : vector<128x4xf32>
      %110 = tpu.matmul %37, %109, %cst_65 {dimension_numbers = #tpu.dot_dimension_numbers<[1], [0], [0], [1], [0, 0, 1, 1], [], []>} : vector<128x128xbf16>, vector<128x4xbf16>, vector<128x4xf32> -> vector<128x4xf32>
      %c0_66 = arith.constant 0 : index
      %c0_67 = arith.constant 0 : index
      %111 = vector.load %arg11[%c0_66, %c0_67] : memref<1x4xf32, #tpu.memory_space<vmem>>, vector<1x4xf32>
      %112 = vector.broadcast %111 : vector<1x4xf32> to vector<128x4xf32>
      %113 = arith.addf %110, %112 : vector<128x4xf32>
      %cst_68 = arith.constant 5.000000e-01 : f32
      %114 = vector.broadcast %cst_68 : f32 to vector<128x4xf32>
      %115 = arith.mulf %113, %114 : vector<128x4xf32>
      %116 = vector.broadcast %77 : vector<128x1xf32> to vector<128x4xf32>
      %117 = arith.mulf %115, %116 : vector<128x4xf32>
      %c0_69 = arith.constant 0 : index
      %c0_70 = arith.constant 0 : index
      %118 = vector.load %arg20[%c0_69, %c0_70] : memref<128x4xf32, #tpu.memory_space<vmem>>, vector<128x4xf32>
      tpu.vector_store %arg20[%c0_69, %c0_70], %117 {strides = array<i32>} : memref<128x4xf32, #tpu.memory_space<vmem>>, vector<128x4xf32>,
    } else {
    }
    %3 = arith.index_cast %arg2 : i32 to index
    %c0 = arith.constant 0 : index
    %4 = vector.load %arg19[%3, %c0] : memref<4x128xf32, #tpu.memory_space<vmem>>, vector<1x128xf32>
    %5 = tpu.iota {dimensions = array<i32: 1>} : vector<1x4xi32>
    %6 = vector.broadcast %arg2 : i32 to vector<1x4xi32>
    %7 = arith.cmpi eq, %5, %6 : vector<1x4xi32>
    %8 = arith.extui %7 : vector<1x4xi1> to vector<1x4xi32>
    %9 = arith.sitofp %8 : vector<1x4xi32> to vector<1x4xf32>
    %c0_1 = arith.constant 0 : index
    %c0_2 = arith.constant 0 : index
    %10 = vector.load %arg20[%c0_1, %c0_2] : memref<128x4xf32, #tpu.memory_space<vmem>>, vector<128x4xf32>
    %11 = vector.broadcast %9 : vector<1x4xf32> to vector<128x4xf32>
    %12 = arith.mulf %10, %11 : vector<128x4xf32>
    %cst = arith.constant dense<0.000000e+00> : vector<128xf32>
    %13 = vector.multi_reduction <add>, %12, %cst [1] : vector<128x4xf32> to vector<128xf32>
    %14 = vector.shape_cast %13 : vector<128xf32> to vector<128x1xf32>
    %c0_3 = arith.constant 0 : index
    %c0_4 = arith.constant 0 : index
    %c0_5 = arith.constant 0 : index
    %15 = vector.load %arg16[%c0_3, %c0_4, %c0_5] : memref<1x128x1xf32, #tpu.memory_space<vmem>>, vector<1x128x1xf32>
    %16 = vector.shape_cast %15 : vector<1x128x1xf32> to vector<128x1xf32>
    %c0_6 = arith.constant 0 : index
    %c0_7 = arith.constant 0 : index
    %c0_8 = arith.constant 0 : index
    %17 = vector.load %arg15[%c0_6, %c0_7, %c0_8] : memref<1x1x128xf32, #tpu.memory_space<vmem>>, vector<1x1x128xf32>
    %18 = vector.shape_cast %17 : vector<1x1x128xf32> to vector<1x128xf32>
    %c0_9 = arith.constant 0 : index
    %c0_10 = arith.constant 0 : index
    %19 = vector.load %arg18[%c0_9, %c0_10] : memref<128x128xf32, #tpu.memory_space<vmem>>, vector<128x128xf32>
    %20 = vector.broadcast %16 : vector<128x1xf32> to vector<128x128xf32>
    %21 = vector.broadcast %4 : vector<1x128xf32> to vector<128x128xf32>
    %22 = arith.mulf %20, %21 : vector<128x128xf32>
    %23 = arith.addf %19, %22 : vector<128x128xf32>
    %24 = vector.broadcast %18 : vector<1x128xf32> to vector<128x128xf32>
    %25 = vector.broadcast %14 : vector<128x1xf32> to vector<128x128xf32>
    %26 = arith.mulf %24, %25 : vector<128x128xf32>
    %27 = arith.addf %23, %26 : vector<128x128xf32>
    %c0_11 = arith.constant 0 : index
    %c0_12 = arith.constant 0 : index
    %c0_13 = arith.constant 0 : index
    %c0_14 = arith.constant 0 : index
    %28 = vector.load %arg17[%c0_11, %c0_12, %c0_13, %c0_14] : memref<1x1x128x128xf32, #tpu.memory_space<vmem>>, vector<1x1x128x128xf32>
    %29 = vector.shape_cast %28 : vector<1x1x128x128xf32> to vector<128x128xf32>
    %30 = vector.shape_cast %27 : vector<128x128xf32> to vector<1x1x128x128xf32>
    tpu.vector_store %arg17[%c0_11, %c0_12, %c0_13, %c0_14], %30 {strides = array<i32>} : memref<1x1x128x128xf32, #tpu.memory_space<vmem>>, vector<1x1x128x128xf32>,
    return
  }
  func.func @transform_0(%arg0: i32, %arg1: i32, %arg2: i32) -> (i32, i32, i32) {
    %c0_i32 = arith.constant 0 : i32
    %c0_i32_0 = arith.constant 0 : i32
    %c0_i32_1 = arith.constant 0 : i32
    return %arg0, %c0_i32, %c0_i32_0 : i32, i32, i32
  }
  func.func @transform_1(%arg0: i32, %arg1: i32, %arg2: i32) -> (i32, i32) {
    %c0_i32 = arith.constant 0 : i32
    %c0_i32_0 = arith.constant 0 : i32
    %c0_i32_1 = arith.constant 0 : i32
    return %c0_i32, %c0_i32_0 : i32, i32
  }
  func.func @transform_2(%arg0: i32, %arg1: i32, %arg2: i32) -> (i32, i32) {
    %c0_i32 = arith.constant 0 : i32
    %c0_i32_0 = arith.constant 0 : i32
    %c0_i32_1 = arith.constant 0 : i32
    return %c0_i32, %c0_i32_0 : i32, i32
  }
  func.func @transform_3(%arg0: i32, %arg1: i32, %arg2: i32) -> (i32, i32) {
    %c0_i32 = arith.constant 0 : i32
    %c0_i32_0 = arith.constant 0 : i32
    %c0_i32_1 = arith.constant 0 : i32
    return %c0_i32, %c0_i32_0 : i32, i32
  }
  func.func @transform_4(%arg0: i32, %arg1: i32, %arg2: i32) -> (i32, i32) {
    %c0_i32 = arith.constant 0 : i32
    %c0_i32_0 = arith.constant 0 : i32
    %c0_i32_1 = arith.constant 0 : i32
    return %c0_i32, %c0_i32_0 : i32, i32
  }
  func.func @transform_5(%arg0: i32, %arg1: i32, %arg2: i32) -> (i32, i32) {
    %c0_i32 = arith.constant 0 : i32
    %c0_i32_0 = arith.constant 0 : i32
    %c0_i32_1 = arith.constant 0 : i32
    return %c0_i32, %c0_i32_0 : i32, i32
  }
  func.func @transform_6(%arg0: i32, %arg1: i32, %arg2: i32) -> (i32, i32) {
    %c0_i32 = arith.constant 0 : i32
    %c0_i32_0 = arith.constant 0 : i32
    %c0_i32_1 = arith.constant 0 : i32
    return %c0_i32, %c0_i32_0 : i32, i32
  }
  func.func @transform_7(%arg0: i32, %arg1: i32, %arg2: i32) -> (i32, i32) {
    %c0_i32 = arith.constant 0 : i32
    %c0_i32_0 = arith.constant 0 : i32
    %c0_i32_1 = arith.constant 0 : i32
    return %c0_i32, %c0_i32_0 : i32, i32
  }
  func.func @transform_8(%arg0: i32, %arg1: i32, %arg2: i32) -> (i32, i32) {
    %c0_i32 = arith.constant 0 : i32
    %c0_i32_0 = arith.constant 0 : i32
    %c0_i32_1 = arith.constant 0 : i32
    return %c0_i32, %c0_i32_0 : i32, i32
  }
  func.func @transform_9(%arg0: i32, %arg1: i32, %arg2: i32) -> (i32, i32) {
    %c0_i32 = arith.constant 0 : i32
    %c0_i32_0 = arith.constant 0 : i32
    %c0_i32_1 = arith.constant 0 : i32
    return %c0_i32, %c0_i32_0 : i32, i32
  }
  func.func @transform_10(%arg0: i32, %arg1: i32, %arg2: i32) -> (i32, i32) {
    %c0_i32 = arith.constant 0 : i32
    %c0_i32_0 = arith.constant 0 : i32
    %c0_i32_1 = arith.constant 0 : i32
    return %c0_i32, %c0_i32_0 : i32, i32
  }
  func.func @transform_11(%arg0: i32, %arg1: i32, %arg2: i32) -> (i32, i32) {
    %c0_i32 = arith.constant 0 : i32
    %c0_i32_0 = arith.constant 0 : i32
    %c0_i32_1 = arith.constant 0 : i32
    return %c0_i32, %c0_i32_0 : i32, i32
  }
  func.func @transform_12(%arg0: i32, %arg1: i32, %arg2: i32) -> (i32, i32, i32) {
    %c0_i32 = arith.constant 0 : i32
    %c0_i32_0 = arith.constant 0 : i32
    %c0_i32_1 = arith.constant 0 : i32
    return %arg0, %c0_i32, %c0_i32_0 : i32, i32, i32
  }
  func.func @transform_13(%arg0: i32, %arg1: i32, %arg2: i32) -> (i32, i32, i32) {
    %c0_i32 = arith.constant 0 : i32
    %c0_i32_0 = arith.constant 0 : i32
    return %arg0, %arg1, %c0_i32 : i32, i32, i32
  }
  func.func @transform_14(%arg0: i32, %arg1: i32, %arg2: i32) -> (i32, i32, i32, i32) {
    %c0_i32 = arith.constant 0 : i32
    %c0_i32_0 = arith.constant 0 : i32
    return %arg0, %arg2, %arg1, %c0_i32 : i32, i32, i32, i32
  }
}

</mosaic_0001>

<bundles_post_ra>
// kernel: tpu_custom_call.1
= control target key start
LH: loop header
LB: loop body
LE: loop exit
PB: predicated region body
PF: predicated region fallthrough
CT: control target
= control target key end

     0   :  { %s5282_s0 = inlined_call_operand.vmem [shape: bf16[2,128,128], index: 0, kind: input, shape index: {}]   ;;  %s5283_s1 = inlined_call_operand.vmem [shape: bf16[128,64], index: 1, kind: input, shape index: {}]   ;;  %s5284_s2 = inlined_call_operand.vmem [shape: f32[1,64], index: 2, kind: input, shape index: {}]   ;;  %s5285_s3 = inlined_call_operand.vmem [shape: bf16[128,64], index: 3, kind: input, shape index: {}]   ;;  %s5286_s4 = inlined_call_operand.vmem [shape: f32[1,64], index: 4, kind: input, shape index: {}]   ;;  %s5287_s5 = inlined_call_operand.vmem [shape: bf16[4,128], index: 5, kind: input, shape index: {}]   ;;  %s5288_s6 = inlined_call_operand.vmem [shape: f32[4,1], index: 6, kind: input, shape index: {}]   ;;  %s5289_s7 = inlined_call_operand.vmem [shape: bf16[128,4], index: 7, kind: input, shape index: {}]   ;;  %s5290_s8 = inlined_call_operand.vmem [shape: f32[1,4], index: 8, kind: input, shape index: {}]   ;;  %s5291_s9 = inlined_call_operand.vmem [shape: f32[128,64], index: 9, kind: input, shape index: {}]   ;;  %s5292_s10 = inlined_call_operand.vmem [shape: f32[128,64], index: 10, kind: input, shape index: {}]   ;;  %s5293_s11 = inlined_call_operand.vmem [shape: f32[128,64], index: 11, kind: input, shape index: {}]   ;;  %s5294_s12 = inlined_call_operand.vmem [shape: f32[2,1,128], index: 12, kind: input, shape index: {}]   ;;  %s5295_s13 = inlined_call_operand.vmem [shape: f32[2,128,1], index: 13, kind: input, shape index: {}]   ;;  %s5296_s14 = inlined_call_operand.hbm [shape: f32[2,4,128,128], index: 14, kind: output, shape index: {}]  }
   0x1   :  { %5312 = sst [smem:[#allocation61_spill]] %s5296_s14 }
   0x2   :  { %19 = vsyncpa [#allocation6], 0 }
   0x3   :  { %21 = vsyncpa [#allocation6 + $0x1], 0  ;;  %s3763_s29 = smov 0   ;;  %s3765_s30 = smov 0  }
   0x4   :  { %s3767_s15 = smov 0   ;;  %s3769_s16 = smov 0  }
   0x5   :  { %s3771_s17 = smov 0   ;;  %s3773_s18 = smov 0  }
   0x6   :  { %s3775_s19 = smov 0   ;;  %s3777_s20 = smov 0  }
   0x7 LB: > { %5313 = sst [smem:[#allocation8_spill]] %s3645_s29  ;;  %s3133_s21 = sadd.s32 4294967295, %s3673_s20   ;;  %s3673_s20 = sphi %s3777_s20, %s27_s20   ;;  %s3669_s19 = sphi %s3775_s19, %s5423_s19   ;;  %s3665_s18 = sphi %s3773_s18, %s5422_s18   ;;  %s3661_s17 = sphi %s3771_s17, %s5421_s17   ;;  %s3657_s16 = sphi %s3769_s16, %s5420_s16   ;;  %s3653_s15 = sphi %s3767_s15, %s5419_s15   ;;  %s3649_s30 = sphi %s3765_s30, %s5418_s30   ;;  %s3645_s29 = sphi %s3763_s29, %s5417_s29  }
   0x8   : > { %5314 = sst [smem:[#allocation9_spill]] %s3649_s30  ;;  %s3134_s22 = sadd.s32 4294967294, %s3673_s20  }
   0x9   : > { %5315 = sst [smem:[#allocation10_spill]] %s3653_s15  ;;  %s39_s23 = sadd.s32 1, %s3665_s18 }
   0xa   : > { %5316 = sst [smem:[#allocation11_spill]] %s3665_s18  ;;  %p40_p0 = scmp.ge.s32.totalorder %s39_s23, 4 }
   0xb   : > { %5317 = sst [smem:[#allocation12_spill]] %s3669_s19  ;;  %s46_s24 = sadd.s32 1, %s3669_s19 }
   0xc   : > { %5318 = sst [smem:[#allocation13_spill]] %s3673_s20  ;;  %p378_p1 = scmp.ne.s32.totalorder %s3653_s15, %s3649_s30 }
   0xd   : > { %p379_p2 = scmp.eq.s32.totalorder %s3133_s21, 7  ;;  %s5425_s23 = smov (%p40_p0, %s39_s23), 0 }
   0xe   : > { %5319 = sst [smem:[#allocation14_spill]] %s5425_s23  ;;  %s5427_s24 = smov (!%p40_p0, %s46_s24), %s3669_s19 }
   0xf   : > { %s362_s25 = ssub.s32 %s3665_s18, %s5425_s23  ;;  %p3814_p3 = por %p379_p2, %p378_p1 }
  0x10   : > { %p48_p4 = scmp.ge.s32.totalorder %s5427_s24, 2  ;;  %p384_p5 = scmp.ne.s32.totalorder %s3649_s30, %s3645_s29 }
  0x11   : > { %s5320_s26 = scalar_select %p3814_p3, 1, 0 }
  0x12   : > { %p385_p6 = scmp.eq.s32.totalorder %s3134_s22, 7  ;;  %p3137_p7 = scmp.ge.s32.totalorder %s3673_s20, 1 }
  0x13   : > { %5321 = sst [smem:[#allocation15_spill]] %s5320_s26  ;;  %s5429_s24 = smov (%p48_p4, %s5427_s24), 0 }
  0x14   : > { %5322 = sst [smem:[#allocation16_spill]] %s5429_s24  ;;  %p3823_p8 = por %p385_p6, %p384_p5 }
  0x15   : > { %p463_p9 = scmp.lt.s32.totalorder %s3673_s20, 9  ;;  %s361_s28 = ssub.s32 %s3669_s19, %s5429_s24 }
  0x16   : > { %s5323_s27 = scalar_select %p3823_p8, 1, 0 }
  0x17   : > { %s368_s21 = sadd.s32 1, %s3653_s15  ;;  %s363_s14 = sor.u32 %s362_s25, %s361_s28 }
  0x18   : > { %5324 = sst [smem:[#allocation17_spill]] %s5323_s27  ;;  %p464_p10 = pnand %p3137_p7, %p463_p9 }
  0x19   : > { %p366_p11 = scmp.eq.s32.totalorder %s363_s14, 0  ;;  %s5310_s22 = sand.u32 (!%p464_p10), 1, %s3649_s30  }
  0x1a   : > { %467 = sbr.rel (%p464_p10) target bundleno = 1269 (0x4f5), region = 76  ;;  %p521_p12 = scmp.lt.s32.totalorder (!%p464_p10), %s3661_s17, 1 }
  0x1b   : > { %s3832_s23 = scalar_select %p366_p11, %s3653_s15, %s368_s21  }
  0x1c   : > { %s3138_s18 = sshll.u32 (!%p464_p10), %s5310_s22, 7  ;;  %p3143_p13 = scmp.ne.s32.totalorder (!%p464_p10), %s3657_s16, 0 }
  0x1d   : > { %5325 = sst [smem:[#allocation18_spill]] %s3832_s23  ;;  %s3854_s30 = scalar_lea.vmem (!%p464_p10), [#allocation5], %s3138_s18 }
  0x21   : > { %s522_s29 = scalar_select %p521_p12, %s3661_s17, 1 }
  0x22   : > { %544 = sbr.rel (%p3143_p13) target bundleno = 1025 (0x401), region = 80 }
  0x23   : > { %s3205_s26 = sshll.u32 %s522_s29, 6  ;;  %s3842_s24 = scalar_lea.vmem %s5294_s12, %s522_s29 }
  0x24   : > { %s3847_s28 = scalar_lea.vmem %s5282_s0, %s3205_s26  ;;  %s3206_s21 = sshll.u32 %s522_s29, 7 }
  0x25   : > { %s3852_s15 = scalar_lea.vmem %s5295_s13, %s3206_s21 }
  0x29   : > { %v3521_v0 = vld [vmem:[%s5285_s3] sm:$0xff]   ;;  %v3522_v1 = vld [vmem:[%s5285_s3 + $0x8] sm:$0xff]   ;;  %v3523_v2 = vld [vmem:[%s5285_s3 + $0x10] sm:$0xff]   ;;  %s3675_s27 = smov 1   ;;  %s3676_s22 = smov 63   ;;  %vm862_vm0 = vcmask 1048064  }
  0x2a   : > { %3280 = vmatprep.subr.bf16.mxu1 %v3521_v0  ;;  %v3524_v3 = vld [vmem:[%s5285_s3 + $0x18] sm:$0xff]   ;;  %v3529_v4 = vld [vmem:[%s3847_s28] sm:$0xff]   ;;  %v3526_v6 = vld [vmem:[%s5285_s3 + $0x28] sm:$0xff]   ;;  %s3677_s25 = smov 64   ;;  %s3678_s18 = smov 127   ;;  %vm3681_vm1 = vmmov 0  }
  0x2b   : > { %3281 = vmatpush3.bf16.msra.mxu1 %v3521_v0  ;;  %3296 = vmatprep.mubr.bf16.mxu1 %v3529_v4  ;;  %v3525_v5 = vld [vmem:[%s5285_s3 + $0x20] sm:$0xff]   ;;  %v3527_v7 = vld [vmem:[%s5285_s3 + $0x30] sm:$0xff]   ;;  %v3528_v8 = vld [vmem:[%s5285_s3 + $0x38] sm:$0xff]   ;;  %s3679_s23 = smov 65   ;;  %vm2010_vm2 = vcmask 523264  }
  0x2c   : > { %3282 = vmatprep.subr.bf16.mxu1 %v3522_v1  ;;  %v3531_v9 = vld [vmem:[%s5283_s1] sm:$0xff]   ;;  %v3530_v10 = vld [vmem:[%s3847_s28 + $0x8] sm:$0xff]   ;;  %v3533_v11 = vld [vmem:[%s3847_s28 + $0x10] sm:$0xff]  }
  0x2d   : > { %v3532_v12 = vld [vmem:[%s5283_s1 + $0x8] sm:$0xff]   ;;  %v3898_v14 = vld [vmem:[%s5292_s10] sm:$0xff]  ;;  %v3535_v17 = vld [vmem:[%s5283_s1 + $0x10] sm:$0xff]  }
  0x2e   : > { %v3893_v13 = vld [vmem:[%s5292_s10 + $0x8] sm:$0xff]  ;;  %975 = vrot.lane.b32.xlu0 %v3898_v14, %s3675_s27  ;;  %v3912_v16 = vld [vmem:[%s5293_s11] sm:$0xff]  ;;  %v3534_v18 = vld [vmem:[%s3847_s28 + $0x18] sm:$0xff]  }
  0x2f   : > { %3283 = vmatpush3.bf16.msra.mxu1 %v3522_v1  ;;  %977 = vrot.lane.b32.xlu1 %v3893_v13, %s3675_s27  ;;  %v3907_v15 = vld [vmem:[%s5293_s11 + $0x8] sm:$0xff]  ;;  %v3925_v19 = vld [vmem:[%s5292_s10 + $0x18] sm:$0xff]  ;;  %v3930_v20 = vld [vmem:[%s5292_s10 + $0x10] sm:$0xff] }
  0x30   : > { %3284 = vmatprep.subr.bf16.mxu1 %v3523_v2  ;;  %v3537_v21 = vld [vmem:[%s3847_s28 + $0x20] sm:$0xff]   ;;  %v3536_v22 = vld [vmem:[%s5283_s1 + $0x18] sm:$0xff]   ;;  %v3948_v24 = vld [vmem:[%s5293_s11 + $0x10] sm:$0xff] }
  0x31   : > { %v3943_v23 = vld [vmem:[%s5293_s11 + $0x18] sm:$0xff]  ;;  %v3539_v25 = vld [vmem:[%s5283_s1 + $0x20] sm:$0xff]   ;;  %v3538_v26 = vld [vmem:[%s3847_s28 + $0x28] sm:$0xff]  }
  0x32   : > { %1135 = vrot.lane.b32.xlu0 %v3912_v16, %s3676_s22  ;;  %v3957_v27 = vld [vmem:[%s5292_s10 + $0x28] sm:$0xff]  ;;  %v3962_v28 = vld [vmem:[%s5292_s10 + $0x20] sm:$0xff]  ;;  %v3541_v29 = vld [vmem:[%s3847_s28 + $0x30] sm:$0xff]  }
  0x33   : > { %3285 = vmatpush3.bf16.msra.mxu1 %v3523_v2  ;;  %1137 = vrot.lane.b32.xlu1 %v3907_v15, %s3676_s22  ;;  %v3540_v30 = vld [vmem:[%s5283_s1 + $0x28] sm:$0xff]   ;;  %v3984_v32 = vld [vmem:[%s5293_s11 + $0x20] sm:$0xff]  ;;  %v3543_v33 = vld [vmem:[%s5283_s1 + $0x30] sm:$0xff]  }
  0x34   : > { %3286 = vmatprep.subr.bf16.mxu1 %v3524_v3  ;;  %v3979_v31 = vld [vmem:[%s5293_s11 + $0x28] sm:$0xff]  ;;  %v3542_v34 = vld [vmem:[%s3847_s28 + $0x38] sm:$0xff]   ;;  %v4002_v36 = vld [vmem:[%s5292_s10 + $0x30] sm:$0xff] }
  0x35   : > { %v3997_v35 = vld [vmem:[%s5292_s10 + $0x38] sm:$0xff]  ;;  %v3545_v37 = vld [vmem:[%s3847_s28] sm:$0xff]   ;;  %v4020_v40 = vld [vmem:[%s5293_s11 + $0x30] sm:$0xff] }
  0x36   : > { %979 = vrot.lane.b32.xlu0 %v3930_v20, %s3675_s27  ;;  %v3544_v38 = vld [vmem:[%s5283_s1 + $0x38] sm:$0xff]   ;;  %v3546_v41 = vld [vmem:[%s3847_s28 + $0x8] sm:$0xff]   ;;  %v822_v43 = vld [vmem:[%s5292_s10 + $0x40] sm:$0xff] }
  0x37   : > { %3287 = vmatpush3.bf16.msra.mxu1 %v3524_v3  ;;  %981 = vrot.lane.b32.xlu1 %v3925_v19, %s3675_s27  ;;  %v4015_v39 = vld [vmem:[%s5293_s11 + $0x38] sm:$0xff]  ;;  %v823_v42 = vld [vmem:[%s5292_s10 + $0x48] sm:$0xff]  ;;  %v3547_v44 = vld [vmem:[%s3847_s28 + $0x10] sm:$0xff]  }
  0x38   : > { %3288 = vmatprep.subr.bf16.mxu1 %v3525_v5  ;;  %v839_v45 = vld [vmem:[%s5293_s11 + $0x48] sm:$0xff]  ;;  %v838_v46 = vld [vmem:[%s5293_s11 + $0x40] sm:$0xff]  ;;  %v3548_v47 = vld [vmem:[%s3847_s28 + $0x18] sm:$0xff]  }
  0x39   : > { %v825_v48 = vld [vmem:[%s5292_s10 + $0x58] sm:$0xff]  ;;  %v824_v49 = vld [vmem:[%s5292_s10 + $0x50] sm:$0xff]  ;;  %v3549_v50 = vld [vmem:[%s3847_s28 + $0x20] sm:$0xff]  }
  0x3a   : > { %1139 = vrot.lane.b32.xlu0 %v3948_v24, %s3676_s22  ;;  %v841_v51 = vld [vmem:[%s5293_s11 + $0x58] sm:$0xff]  ;;  %v840_v52 = vld [vmem:[%s5293_s11 + $0x50] sm:$0xff]  ;;  %v3550_v53 = vld [vmem:[%s3847_s28 + $0x28] sm:$0xff]  }
  0x3b   : > { %3289 = vmatpush3.bf16.msra.mxu1 %v3525_v5  ;;  %1141 = vrot.lane.b32.xlu1 %v3943_v23, %s3676_s22  ;;  %v827_v54 = vld [vmem:[%s5292_s10 + $0x68] sm:$0xff]  ;;  %v826_v55 = vld [vmem:[%s5292_s10 + $0x60] sm:$0xff]  ;;  %v3551_v56 = vld [vmem:[%s3847_s28 + $0x30] sm:$0xff]  }
  0x3c   : > { %3290 = vmatprep.subr.bf16.mxu1 %v3526_v6  ;;  %v843_v57 = vld [vmem:[%s5293_s11 + $0x68] sm:$0xff]  ;;  %v842_v58 = vld [vmem:[%s5293_s11 + $0x60] sm:$0xff]  ;;  %v3552_v59 = vld [vmem:[%s3847_s28 + $0x38] sm:$0xff]  }
  0x3d   : > { %v829_v60 = vld [vmem:[%s5292_s10 + $0x78] sm:$0xff]  ;;  %v828_v61 = vld [vmem:[%s5292_s10 + $0x70] sm:$0xff] }
  0x3e   : > { %983 = vrot.lane.b32.xlu0 %v3962_v28, %s3675_s27  ;;  %v845_v62 = vld [vmem:[%s5293_s11 + $0x78] sm:$0xff]  ;;  %v844_v63 = vld [vmem:[%s5293_s11 + $0x70] sm:$0xff] }
  0x3f   : > { %3291 = vmatpush3.bf16.msra.mxu1 %v3526_v6  ;;  %985 = vrot.lane.b32.xlu1 %v3957_v27, %s3675_s27 }
  0x40   : > { %3292 = vmatprep.subr.bf16.mxu1 %v3527_v7 }
  0x42   : > { %1143 = vrot.lane.b32.xlu0 %v3984_v32, %s3676_s22 }
  0x43   : > { %3293 = vmatpush3.bf16.msra.mxu1 %v3527_v7  ;;  %1145 = vrot.lane.b32.xlu1 %v3979_v31, %s3676_s22 }
  0x44   : > { %3294 = vmatprep.subr.bf16.mxu1 %v3528_v8 }
  0x46   : > { %987 = vrot.lane.b32.xlu0 %v4002_v36, %s3675_s27 }
  0x47   : > { %3295 = vmatpush3.bf16.msra.mxu1 %v3528_v8  ;;  %989 = vrot.lane.b32.xlu1 %v3997_v35, %s3675_s27 }
  0x48   : > { %3312 = vmatprep.subr.bf16.mxu1 %v3531_v9 }
  0x4a   : > { %3297 = vmatmul.mubr.bf16.vlgmr.msra.gmra.mrb[0].mxu1 %v3530_v10  ;;  %1147 = vrot.lane.b32.xlu0 %v4020_v40, %s3676_s22 }
  0x4b   : > { %3313 = vmatpush3.bf16.msra.mxu1 %v3531_v9  ;;  %3300 = vmatprep.mubr.bf16.mxu1 %v3533_v11 }
  0x4c   : > { %3314 = vmatprep.subr.bf16.mxu1 %v3532_v12  ;;  %1149 = vrot.lane.b32.xlu1 %v4015_v39, %s3676_s22 }
  0x4e   : > { %991 = vrot.lane.b32.xlu0 %v822_v43, %s3675_s27 }
  0x4f   : > { %3315 = vmatpush3.bf16.msra.mxu1 %v3532_v12 }
  0x50   : > { %3316 = vmatprep.subr.bf16.mxu1 %v3535_v17  ;;  %993 = vrot.lane.b32.xlu1 %v823_v42, %s3675_s27 }
  0x52   : > { %3301 = vmatmul.mubr.bf16.gmra.mrb[4].mxu1 %v3534_v18  ;;  %1151 = vrot.lane.b32.xlu0 %v838_v46, %s3676_s22 }
  0x53   : > { %3317 = vmatpush3.bf16.msra.mxu1 %v3535_v17  ;;  %3304 = vmatprep.mubr.bf16.mxu1 %v3537_v21 }
  0x54   : > { %3318 = vmatprep.subr.bf16.mxu1 %v3536_v22  ;;  %1153 = vrot.lane.b32.xlu1 %v839_v45, %s3676_s22 }
  0x56   : > { %995 = vrot.lane.b32.xlu0 %v824_v49, %s3675_s27 }
  0x57   : > { %3319 = vmatpush3.bf16.msra.mxu1 %v3536_v22 }
  0x58   : > { %3320 = vmatprep.subr.bf16.mxu1 %v3539_v25  ;;  %997 = vrot.lane.b32.xlu1 %v825_v48, %s3675_s27 }
  0x5a   : > { %3305 = vmatmul.mubr.bf16.gmra.mrb[8].mxu1 %v3538_v26  ;;  %1155 = vrot.lane.b32.xlu0 %v840_v52, %s3676_s22 }
  0x5b   : > { %3321 = vmatpush3.bf16.msra.mxu1 %v3539_v25  ;;  %3308 = vmatprep.mubr.bf16.mxu1 %v3541_v29  ;;  %v3144_v25 = vld [vmem:[%s5286_s4] ss:$0 sm:$0xff] }
  0x5c   : > { %3322 = vmatprep.subr.bf16.mxu1 %v3540_v30  ;;  %1157 = vrot.lane.b32.xlu1 %v841_v51, %s3676_s22 }
  0x5e   : > { %999 = vrot.lane.b32.xlu0 %v826_v55, %s3675_s27 }
  0x5f   : > { %3323 = vmatpush3.bf16.msra.mxu1 %v3540_v30 }
  0x60   : > { %3324 = vmatprep.subr.bf16.mxu1 %v3543_v33  ;;  %1001 = vrot.lane.b32.xlu1 %v827_v54, %s3675_s27 }
  0x62   : > { %3309 = vmatmul.mubr.bf16.gmra.mrb[12].mxu1 %v3542_v34  ;;  %1159 = vrot.lane.b32.xlu0 %v842_v58, %s3676_s22 }
  0x63   : > { %3325 = vmatpush3.bf16.msra.mxu1 %v3543_v33  ;;  %3328 = vmatprep.mubr.bf16.mxu1 %v3545_v37 }
  0x64   : > { %3326 = vmatprep.subr.bf16.mxu1 %v3544_v38  ;;  %1161 = vrot.lane.b32.xlu1 %v843_v57, %s3676_s22 }
  0x66   : > { %1003 = vrot.lane.b32.xlu0 %v828_v61, %s3675_s27 }
  0x67   : > { %3327 = vmatpush3.bf16.msra.mxu1 %v3544_v38 }
  0x68   : > { %1005 = vrot.lane.b32.xlu1 %v829_v60, %s3675_s27 }
  0x6a   : > { %3329 = vmatmul.mubr.bf16.vlgmr.msra.gmra.mrb[16].mxu1 %v3546_v41  ;;  %1163 = vrot.lane.b32.xlu0 %v844_v63, %s3676_s22 }
  0x6b   : > { %3332 = vmatprep.mubr.bf16.mxu1 %v3547_v44 }
  0x6c   : > { %1165 = vrot.lane.b32.xlu1 %v845_v62, %s3676_s22 }
  0x6e   : > { %1682 = vrot.lane.b32.xlu0 %v3898_v14, %s3675_s27 }
  0x70   : > { %1684 = vrot.lane.b32.xlu1 %v3893_v13, %s3675_s27 }
  0x72   : > { %3333 = vmatmul.mubr.bf16.gmra.mrb[20].mxu1 %v3548_v47  ;;  %1686 = vrot.lane.b32.xlu0 %v3930_v20, %s3675_s27 }
  0x73   : > { %3336 = vmatprep.mubr.bf16.mxu1 %v3549_v50 }
  0x74   : > { %1688 = vrot.lane.b32.xlu1 %v3925_v19, %s3675_s27 }
  0x76   : > { %1842 = vrot.lane.b32.xlu0 %v3912_v16, %s3676_s22 }
  0x78   : > { %1844 = vrot.lane.b32.xlu1 %v3907_v15, %s3676_s22 }
  0x7a   : > { %3337 = vmatmul.mubr.bf16.gmra.mrb[24].mxu1 %v3550_v53  ;;  %1846 = vrot.lane.b32.xlu0 %v3948_v24, %s3676_s22 }
  0x7b   : > { %3340 = vmatprep.mubr.bf16.mxu1 %v3551_v56 }
  0x7c   : > { %1848 = vrot.lane.b32.xlu1 %v3943_v23, %s3676_s22 }
  0x7e   : > { %1690 = vrot.lane.b32.xlu0 %v3962_v28, %s3675_s27 }
  0x80   : > { %1692 = vrot.lane.b32.xlu1 %v3957_v27, %s3675_s27 }
  0x82   : > { %3341 = vmatmul.mubr.bf16.gmra.mrb[28].mxu1 %v3552_v59  ;;  %1694 = vrot.lane.b32.xlu0 %v4002_v36, %s3675_s27 }
  0x84   : > { %1696 = vrot.lane.b32.xlu1 %v3997_v35, %s3675_s27 }
  0x86   : > { %1850 = vrot.lane.b32.xlu0 %v3984_v32, %s3676_s22 }
  0x88   : > { %1852 = vrot.lane.b32.xlu1 %v3979_v31, %s3676_s22 }
  0x8a   : > { %1854 = vrot.lane.b32.xlu0 %v4020_v40, %s3676_s22 }
  0x8c   : > { %1856 = vrot.lane.b32.xlu1 %v4015_v39, %s3676_s22 }
  0x8e   : > { %1698 = vrot.lane.b32.xlu0 %v822_v43, %s3675_s27 }
  0x90   : > { %1700 = vrot.lane.b32.xlu1 %v823_v42, %s3675_s27 }
  0x92   : > { %1702 = vrot.lane.b32.xlu0 %v824_v49, %s3675_s27 }
  0x94   : > { %1704 = vrot.lane.b32.xlu1 %v825_v48, %s3675_s27 }
  0x96   : > { %1858 = vrot.lane.b32.xlu0 %v838_v46, %s3676_s22 }
  0x98   : > { %1860 = vrot.lane.b32.xlu1 %v839_v45, %s3676_s22 }
  0x9a   : > { %1862 = vrot.lane.b32.xlu0 %v840_v52, %s3676_s22 }
  0x9c   : > { %1864 = vrot.lane.b32.xlu1 %v841_v51, %s3676_s22 }
  0x9e   : > { %1706 = vrot.lane.b32.xlu0 %v826_v55, %s3675_s27 }
  0xa0   : > { %1708 = vrot.lane.b32.xlu1 %v827_v54, %s3675_s27  ;;  %v4147_v1 = vpop.permute.xlu0 %975 }
  0xa1   : > { %v4145_v0 = vpop.permute.xlu1 %977 }
  0xa2   : > { %1710 = vrot.lane.b32.xlu0 %v828_v61, %s3675_s27 }
  0xa4   : > { %1712 = vrot.lane.b32.xlu1 %v829_v60, %s3675_s27  ;;  %v4151_v3 = vpop.permute.xlu0 %1135 }
  0xa5   : > { %v4149_v2 = vpop.permute.xlu1 %1137 }
  0xa6   : > { %1866 = vrot.lane.b32.xlu0 %v842_v58, %s3676_s22 }
  0xa8   : > { %1868 = vrot.lane.b32.xlu1 %v843_v57, %s3676_s22  ;;  %v4155_v5 = vpop.permute.xlu0 %979 }
  0xa9   : > { %v4153_v4 = vpop.permute.xlu1 %981 }
  0xaa   : > { %1870 = vrot.lane.b32.xlu0 %v844_v63, %s3676_s22 }
  0xac   : > { %1872 = vrot.lane.b32.xlu1 %v845_v62, %s3676_s22  ;;  %v4159_v7 = vpop.permute.xlu0 %1139 }
  0xad   : > { %v4157_v6 = vpop.permute.xlu1 %1141 }
  0xb0   : > { %v4163_v9 = vpop.permute.xlu0 %983 }
  0xb1   : > { %v4161_v8 = vpop.permute.xlu1 %985 }
  0xb4   : > { %v4167_v11 = vpop.permute.xlu0 %1143 }
  0xb5   : > { %v4165_v10 = vpop.permute.xlu1 %1145 }
  0xb8   : > { %v4171_v13 = vpop.permute.xlu0 %987 }
  0xb9   : > { %v4169_v12 = vpop.permute.xlu1 %989 }
  0xbc   : > { %v4175_v15 = vpop.permute.xlu0 %1147 }
  0xbe   : > { %v4173_v14 = vpop.permute.xlu1 %1149 }
  0xc0   : > { %v4179_v17 = vpop.permute.xlu0 %991 }
  0xc2   : > { %v4177_v16 = vpop.permute.xlu1 %993 }
  0xc3   : > { %5326 = vst [vmem:[#allocation19_spill] sm:$0xff] %v4177_v16 }
  0xc4   : > { %v4183_v19 = vpop.permute.xlu0 %1151 }
  0xc5   : > { %5328 = vst [vmem:[#allocation21_spill] sm:$0xff] %v4183_v19 }
  0xc6   : > { %v4181_v18 = vpop.permute.xlu1 %1153 }
  0xc7   : > { %5327 = vst [vmem:[#allocation20_spill] sm:$0xff] %v4181_v18 }
  0xc8   : > { %v4187_v21 = vpop.permute.xlu0 %995 }
  0xca   : > { %v4185_v20 = vpop.permute.xlu1 %997 }
  0xcc   : > { %v4191_v23 = vpop.permute.xlu0 %1155 }
  0xce   : > { %v4189_v22 = vpop.permute.xlu1 %1157 }
  0xd0   : > { %v4198_v26 = vpop.permute.xlu0 %999 }
  0xd1   : > { %5330 = vst [vmem:[#allocation23_spill] sm:$0xff] %v4198_v26 }
  0xd2   : > { %v4193_v24 = vpop.permute.xlu1 %1001 }
  0xd3   : > { %5329 = vst [vmem:[#allocation22_spill] sm:$0xff] %v4193_v24 }
  0xd4   : > { %v4210_v34 = vpop.permute.xlu0 %1159 }
  0xd5   : > { %5333 = vst [vmem:[#allocation26_spill] sm:$0xff] %v4210_v34 }
  0xd6   : > { %v4206_v33 = vpop.permute.xlu1 %1161 }
  0xd7   : > { %5332 = vst [vmem:[#allocation25_spill] sm:$0xff] %v4206_v33 }
  0xd8   : > { %v4224_v42 = vpop.permute.xlu0 %1003 }
  0xd9   : > { %5335 = vst [vmem:[#allocation28_spill] sm:$0xff] %v4224_v42 }
  0xda   : > { %v4222_v40 = vpop.permute.xlu1 %1005 }
  0xdb   : > { %5334 = vst [vmem:[#allocation27_spill] sm:$0xff] %v4222_v40 }
  0xdc   : > { %v4240_v49 = vpop.permute.xlu0 %1163 }
  0xdd   : > { %5337 = vst [vmem:[#allocation30_spill] sm:$0xff] %v4240_v49 }
  0xde   : > { %v4236_v47 = vpop.permute.xlu1 %1165 }
  0xdf   : > { %5336 = vst [vmem:[#allocation29_spill] sm:$0xff] %v4236_v47 }
  0xe0   : > { %v4258_v58 = vpop.permute.xlu0 %1682 }
  0xe1   : > { %5339 = vst [vmem:[#allocation32_spill] sm:$0xff] %v4258_v58 }
  0xe2   : > { %v4256_v57 = vpop.permute.xlu1 %1684 }
  0xe3   : > { %5338 = vst [vmem:[#allocation31_spill] sm:$0xff] %v4256_v57 }
 0x11d   : > { %v3298_v27 = vpop.f32.mrb[0].mxu1 }
 0x11e   : > { %v4200_v28 = vadd.f32 %v3298_v27, %v3144_v25  ;;  %v735_v29 = vpop.f32.mrb[1].mxu1 }
 0x11f   : > { %v4202_v30 = vadd.f32 %v3144_v25, %v735_v29  ;;  %v3299_v31 = vpop.f32.mrb[2].mxu1  ;;  %v4268_v29 = vpop.permute.xlu1 %1688 }
 0x120   : > { %5331 = vst [vmem:[#allocation24_spill] sm:$0xff] %v4200_v28  ;;  %869 = vrot.lane.b32.xlu1 %v4200_v28, %s3677_s25  ;;  %v738_v32 = vpop.f32.mrb[3].mxu1  ;;  %v4212_v35 = vadd.f32 %v3299_v31, %v3144_v25  ;;  %5340 = vst [vmem:[#allocation33_spill] sm:$0xff] %v4268_v29 }
 0x121   : > { %863 = vrot.lane.b32.xlu0 %v4202_v30, %s3677_s25  ;;  %v4214_v36 = vadd.f32 %v3144_v25, %v738_v32  ;;  %v4274_v32 = vpop.permute.xlu0 %1686 }
 0x122   : > { %5341 = vst [vmem:[#allocation34_spill] sm:$0xff] %v4274_v32 }
 0x124   : > { %872 = vrot.lane.b32.xlu1 %v4212_v35, %s3677_s25 }
 0x125   : > { %v3302_v37 = vpop.f32.mrb[4].mxu1  ;;  %866 = vrot.lane.b32.xlu0 %v4214_v36, %s3677_s25 }
 0x126   : > { %v4220_v38 = vadd.f32 %v3302_v37, %v3144_v25  ;;  %v751_v39 = vpop.f32.mrb[5].mxu1 }
 0x127   : > { %v3303_v41 = vpop.f32.mrb[6].mxu1  ;;  %v4228_v45 = vadd.f32 %v3144_v25, %v751_v39  ;;  %v3161_v39 = vld [vmem:[%s5284_s2] ss:$0 sm:$0xff] }
 0x128   : > { %v4226_v43 = vadd.f32 %v3303_v41, %v3144_v25  ;;  %v754_v44 = vpop.f32.mrb[7].mxu1 }
 0x129   : > { %881 = vrot.lane.b32.xlu0 %v4220_v38, %s3677_s25  ;;  %v4234_v46 = vadd.f32 %v3144_v25, %v754_v44 }
 0x12a   : > { %884 = vrot.lane.b32.xlu1 %v4226_v43, %s3677_s25 }
 0x12d   : > { %v3306_v48 = vpop.f32.mrb[8].mxu1  ;;  %875 = vrot.lane.b32.xlu0 %v4228_v45, %s3677_s25 }
 0x12e   : > { %v4242_v50 = vadd.f32 %v3306_v48, %v3144_v25  ;;  %v767_v51 = vpop.f32.mrb[9].mxu1  ;;  %878 = vrot.lane.b32.xlu1 %v4234_v46, %s3677_s25 }
 0x12f   : > { %v3307_v52 = vpop.f32.mrb[10].mxu1  ;;  %v4248_v55 = vadd.f32 %v3144_v25, %v767_v51  ;;  %v4289_v51 = vpop.permute.xlu1 %1844 }
 0x130   : > { %v4246_v53 = vadd.f32 %v3307_v52, %v3144_v25  ;;  %v770_v54 = vpop.f32.mrb[11].mxu1  ;;  %5342 = vst [vmem:[#allocation35_spill] sm:$0xff] %v4289_v51 }
 0x131   : > { %893 = vrot.lane.b32.xlu0 %v4242_v50, %s3677_s25  ;;  %v4254_v56 = vadd.f32 %v3144_v25, %v770_v54  ;;  %v4291_v54 = vpop.permute.xlu0 %1842 }
 0x132   : > { %896 = vrot.lane.b32.xlu1 %v4246_v53, %s3677_s25  ;;  %5343 = vst [vmem:[#allocation36_spill] sm:$0xff] %v4291_v54 }
 0x135   : > { %v3310_v59 = vpop.f32.mrb[12].mxu1  ;;  %887 = vrot.lane.b32.xlu0 %v4248_v55, %s3677_s25  ;;  %v4307_v51 = vpop.permute.xlu0 %1846 }
 0x136   : > { %v4262_v60 = vadd.f32 %v3310_v59, %v3144_v25  ;;  %v783_v61 = vpop.f32.mrb[13].mxu1  ;;  %890 = vrot.lane.b32.xlu1 %v4254_v56, %s3677_s25  ;;  %5345 = vst [vmem:[#allocation38_spill] sm:$0xff] %v4307_v51 }
 0x137   : > { %v3311_v62 = vpop.f32.mrb[14].mxu1  ;;  %v4270_v31 = vadd.f32 %v3144_v25, %v783_v61 }
 0x138   : > { %v4266_v63 = vadd.f32 %v3311_v62, %v3144_v25  ;;  %v786_v27 = vpop.f32.mrb[15].mxu1 }
 0x139   : > { %905 = vrot.lane.b32.xlu0 %v4262_v60, %s3677_s25  ;;  %v4278_v37 = vadd.f32 %v3144_v25, %v786_v27  ;;  %v4303_v27 = vpop.permute.xlu1 %1848  ;;  %v4325_v29 = vpop.permute.xlu0 %1690 }
 0x13a   : > { %908 = vrot.lane.b32.xlu1 %v4266_v63, %s3677_s25  ;;  %5344 = vst [vmem:[#allocation37_spill] sm:$0xff] %v4303_v27  ;;  %5347 = vst [vmem:[#allocation40_spill] sm:$0xff] %v4325_v29 }
 0x13d   : > { %v3330_v41 = vpop.f32.mrb[16].mxu1  ;;  %899 = vrot.lane.b32.xlu0 %v4270_v31, %s3677_s25 }
 0x13e   : > { %v4285_v44 = vadd.f32 %v3330_v41, %v3161_v39  ;;  %v1440_v48 = vpop.f32.mrb[17].mxu1  ;;  %902 = vrot.lane.b32.xlu1 %v4278_v37, %s3677_s25 }
 0x13f   : > { %v3331_v52 = vpop.f32.mrb[18].mxu1  ;;  %v4295_v61 = vadd.f32 %v3161_v39, %v1440_v48 }
 0x140   : > { %v4293_v25 = vadd.f32 %v3331_v52, %v3161_v39  ;;  %v1443_v59 = vpop.f32.mrb[19].mxu1 }
 0x141   : > { %1576 = vrot.lane.b32.xlu0 %v4285_v44, %s3677_s25  ;;  %v4301_v62 = vadd.f32 %v3161_v39, %v1443_v59 }
 0x142   : > { %1579 = vrot.lane.b32.xlu1 %v4293_v25, %s3677_s25 }
 0x145   : > { %v3334_v41 = vpop.f32.mrb[20].mxu1  ;;  %1570 = vrot.lane.b32.xlu0 %v4295_v61, %s3677_s25 }
 0x146   : > { %v4309_v52 = vadd.f32 %v3334_v41, %v3161_v39  ;;  %v1456_v48 = vpop.f32.mrb[21].mxu1  ;;  %1573 = vrot.lane.b32.xlu1 %v4301_v62, %s3677_s25  ;;  %v4323_v41 = vpop.permute.xlu1 %1692 }
 0x147   : > { %v3335_v57 = vpop.f32.mrb[22].mxu1  ;;  %v4315_v59 = vadd.f32 %v3161_v39, %v1456_v48  ;;  %5346 = vst [vmem:[#allocation39_spill] sm:$0xff] %v4323_v41  ;;  %v4341_v41 = vpop.permute.xlu0 %1694 }
 0x148   : > { %v4313_v54 = vadd.f32 %v3335_v57, %v3161_v39  ;;  %v1459_v58 = vpop.f32.mrb[23].mxu1  ;;  %5349 = vst [vmem:[#allocation42_spill] sm:$0xff] %v4341_v41 }
 0x149   : > { %1588 = vrot.lane.b32.xlu0 %v4309_v52, %s3677_s25  ;;  %v4321_v27 = vadd.f32 %v3161_v39, %v1459_v58 }
 0x14a   : > { %1591 = vrot.lane.b32.xlu1 %v4313_v54, %s3677_s25  ;;  %v4335_v58 = vpop.permute.xlu1 %1696 }
 0x14b   : > { %5348 = vst [vmem:[#allocation41_spill] sm:$0xff] %v4335_v58  ;;  %v4355_v47 = vpop.permute.xlu0 %1850 }
 0x14c   : > { %5351 = vst [vmem:[#allocation44_spill] sm:$0xff] %v4355_v47 }
 0x14d   : > { %v3338_v51 = vpop.f32.mrb[24].mxu1  ;;  %1582 = vrot.lane.b32.xlu0 %v4315_v59, %s3677_s25 }
 0x14e   : > { %v4329_v57 = vadd.f32 %v3338_v51, %v3161_v39  ;;  %v1472_v48 = vpop.f32.mrb[25].mxu1  ;;  %1585 = vrot.lane.b32.xlu1 %v4321_v27, %s3677_s25 }
 0x14f   : > { %v3339_v32 = vpop.f32.mrb[26].mxu1  ;;  %v4337_v34 = vadd.f32 %v3161_v39, %v1472_v48  ;;  %v4353_v48 = vpop.permute.xlu1 %1852 }
 0x150   : > { %v4333_v33 = vadd.f32 %v3339_v32, %v3161_v39  ;;  %v1475_v24 = vpop.f32.mrb[27].mxu1  ;;  %5350 = vst [vmem:[#allocation43_spill] sm:$0xff] %v4353_v48  ;;  %v4371_v48 = vpop.permute.xlu0 %1854 }
 0x151   : > { %1600 = vrot.lane.b32.xlu0 %v4329_v57, %s3677_s25  ;;  %v4345_v51 = vadd.f32 %v3161_v39, %v1475_v24  ;;  %5353 = vst [vmem:[#allocation46_spill] sm:$0xff] %v4371_v48 }
 0x152   : > { %1603 = vrot.lane.b32.xlu1 %v4333_v33, %s3677_s25 }
 0x153   : > { %v4367_v49 = vpop.permute.xlu1 %1856 }
 0x154   : > { %5352 = vst [vmem:[#allocation45_spill] sm:$0xff] %v4367_v49 }
 0x155   : > { %v3342_v29 = vpop.f32.mrb[28].mxu1  ;;  %1594 = vrot.lane.b32.xlu0 %v4337_v34, %s3677_s25 }
 0x156   : > { %v4349_v32 = vadd.f32 %v3342_v29, %v3161_v39  ;;  %v1488_v26 = vpop.f32.mrb[29].mxu1  ;;  %1597 = vrot.lane.b32.xlu1 %v4345_v51, %s3677_s25 }
 0x157   : > { %v3343_v58 = vpop.f32.mrb[30].mxu1  ;;  %v4359_v24 = vadd.f32 %v3161_v39, %v1488_v26  ;;  %v4375_v26 = vpop.permute.xlu1 %1700 }
 0x158   : > { %v4357_v41 = vadd.f32 %v3343_v58, %v3161_v39  ;;  %v1491_v40 = vpop.f32.mrb[31].mxu1  ;;  %5354 = vst [vmem:[#allocation47_spill] sm:$0xff] %v4375_v26  ;;  %v4377_v58 = vpop.permute.xlu0 %1698 }
 0x159   : > { %1612 = vrot.lane.b32.xlu0 %v4349_v32, %s3677_s25  ;;  %v4365_v29 = vadd.f32 %v3161_v39, %v1491_v40  ;;  %5355 = vst [vmem:[#allocation48_spill] sm:$0xff] %v4377_v58 }
 0x15a   : > { %1615 = vrot.lane.b32.xlu1 %v4357_v41, %s3677_s25 }
 0x15b   : > { %v4379_v47 = vpop.permute.xlu1 %1704 }
 0x15c   : > { %5356 = vst [vmem:[#allocation49_spill] sm:$0xff] %v4379_v47  ;;  %v4381_v42 = vpop.permute.xlu0 %1702 }
 0x15d   : > { %1606 = vrot.lane.b32.xlu0 %v4359_v24, %s3677_s25  ;;  %5357 = vst [vmem:[#allocation50_spill] sm:$0xff] %v4381_v42 }
 0x15e   : > { %1609 = vrot.lane.b32.xlu1 %v4365_v29, %s3677_s25 }
 0x15f   : > { %v4383_v40 = vpop.permute.xlu1 %1860 }
 0x160   : > { %5358 = vst [vmem:[#allocation51_spill] sm:$0xff] %v4383_v40  ;;  %v4385_v39 = vpop.permute.xlu0 %1858 }
 0x161   : > { %5359 = vst [vmem:[#allocation52_spill] sm:$0xff] %v4385_v39 }
 0x163   : > { %v4387_v49 = vpop.permute.xlu1 %1864 }
 0x164   : > { %5360 = vst [vmem:[#allocation53_spill] sm:$0xff] %v4387_v49  ;;  %v4389_v18 = vpop.permute.xlu0 %1862 }
 0x167   : > { %v4391_v48 = vpop.permute.xlu1 %1708 }
 0x168   : > { %5361 = vst [vmem:[#allocation54_spill] sm:$0xff] %v4391_v48  ;;  %v4393_v16 = vpop.permute.xlu0 %1706 }
 0x169   : > { %5362 = vst [vmem:[#allocation55_spill] sm:$0xff] %v4393_v16 }
 0x16b   : > { %v4395_v19 = vpop.permute.xlu1 %1712 }
 0x16c   : > { %5363 = vst [vmem:[#allocation56_spill] sm:$0xff] %v4395_v19  ;;  %v4397_v26 = vpop.permute.xlu0 %1710 }
 0x16d   : > { %5364 = vst [vmem:[#allocation57_spill] sm:$0xff] %v4397_v26 }
 0x16f   : > { %v4399_v58 = vpop.permute.xlu1 %1868 }
 0x170   : > { %5365 = vst [vmem:[#allocation58_spill] sm:$0xff] %v4399_v58  ;;  %v4401_v47 = vpop.permute.xlu0 %1866 }
 0x173   : > { %v4403_v42 = vpop.permute.xlu1 %1872 }
 0x174   : > { %5366 = vst [vmem:[#allocation59_spill] sm:$0xff] %v4403_v42  ;;  %v4405_v40 = vpop.permute.xlu0 %1870 }
 0x175   : > { %5367 = vst [vmem:[#allocation60_spill] sm:$0xff] %v4405_v40 }
 0x192   : > { %v870_v39 = vpop.permute.xlu1 %869 }
 0x193   : > { %v864_v49 = vpop.permute.xlu0 %863  ;;  %v871_v48 = vsel %vm862_vm0, %v870_v39, %v4200_v28 }
 0x194   : > { %915 = vrot.lane.b32.xlu0 %v871_v48, %s3677_s25  ;;  %v865_v19 = vsel %vm862_vm0, %v864_v49, %v4202_v30 }
 0x196   : > { %v873_v16 = vpop.permute.xlu1 %872 }
 0x197   : > { %v867_v26 = vpop.permute.xlu0 %866  ;;  %v874_v58 = vsel %vm862_vm0, %v873_v16, %v4212_v35 }
 0x198   : > { %917 = vrot.lane.b32.xlu1 %v874_v58, %s3677_s25  ;;  %911 = vrot.lane.b32.xlu0 %v865_v19, %s3677_s25  ;;  %v868_v42 = vsel %vm862_vm0, %v867_v26, %v4214_v36 }
 0x19b   : > { %v882_v40 = vpop.permute.xlu0 %881 }
 0x19c   : > { %v883_v39 = vsel %vm862_vm0, %v882_v40, %v4220_v38  ;;  %v885_v48 = vpop.permute.xlu1 %884  ;;  %913 = vrot.lane.b32.xlu1 %v868_v42, %s3677_s25 }
 0x19d   : > { %923 = vrot.lane.b32.xlu0 %v883_v39, %s3677_s25  ;;  %v886_v49 = vsel %vm862_vm0, %v885_v48, %v4226_v43 }
 0x19f   : > { %v876_v16 = vpop.permute.xlu0 %875 }
 0x1a0   : > { %v877_v58 = vsel %vm862_vm0, %v876_v16, %v4228_v45  ;;  %v879_v19 = vpop.permute.xlu1 %878  ;;  %925 = vrot.lane.b32.xlu1 %v886_v49, %s3677_s25 }
 0x1a1   : > { %919 = vrot.lane.b32.xlu0 %v877_v58, %s3677_s25  ;;  %v880_v26 = vsel %vm862_vm0, %v879_v19, %v4234_v46 }
 0x1a3   : > { %v894_v40 = vpop.permute.xlu0 %893 }
 0x1a4   : > { %v895_v42 = vsel %vm862_vm0, %v894_v40, %v4242_v50  ;;  %v897_v39 = vpop.permute.xlu1 %896  ;;  %921 = vrot.lane.b32.xlu1 %v880_v26, %s3677_s25 }
 0x1a5   : > { %931 = vrot.lane.b32.xlu0 %v895_v42, %s3677_s25  ;;  %v898_v48 = vsel %vm862_vm0, %v897_v39, %v4246_v53 }
 0x1a7   : > { %v888_v16 = vpop.permute.xlu0 %887 }
 0x1a8   : > { %v889_v49 = vsel %vm862_vm0, %v888_v16, %v4248_v55  ;;  %v891_v58 = vpop.permute.xlu1 %890  ;;  %933 = vrot.lane.b32.xlu1 %v898_v48, %s3677_s25 }
 0x1a9   : > { %927 = vrot.lane.b32.xlu0 %v889_v49, %s3677_s25  ;;  %v892_v19 = vsel %vm862_vm0, %v891_v58, %v4254_v56 }
 0x1ab   : > { %v906_v40 = vpop.permute.xlu0 %905 }
 0x1ac   : > { %v907_v26 = vsel %vm862_vm0, %v906_v40, %v4262_v60  ;;  %v909_v42 = vpop.permute.xlu1 %908  ;;  %929 = vrot.lane.b32.xlu1 %v892_v19, %s3677_s25 }
 0x1ad   : > { %939 = vrot.lane.b32.xlu0 %v907_v26, %s3677_s25  ;;  %v910_v39 = vsel %vm862_vm0, %v909_v42, %v4266_v63 }
 0x1af   : > { %v900_v16 = vpop.permute.xlu0 %899 }
 0x1b0   : > { %v901_v48 = vsel %vm862_vm0, %v900_v16, %v4270_v31  ;;  %v903_v49 = vpop.permute.xlu1 %902  ;;  %941 = vrot.lane.b32.xlu1 %v910_v39, %s3677_s25 }
 0x1b1   : > { %935 = vrot.lane.b32.xlu0 %v901_v48, %s3677_s25  ;;  %v904_v58 = vsel %vm862_vm0, %v903_v49, %v4278_v37 }
 0x1b3   : > { %v1577_v40 = vpop.permute.xlu0 %1576 }
 0x1b4   : > { %v1578_v19 = vsel %vm862_vm0, %v1577_v40, %v4285_v44  ;;  %v1580_v26 = vpop.permute.xlu1 %1579  ;;  %937 = vrot.lane.b32.xlu1 %v904_v58, %s3677_s25 }
 0x1b5   : > { %1622 = vrot.lane.b32.xlu0 %v1578_v19, %s3677_s25  ;;  %v1581_v42 = vsel %vm862_vm0, %v1580_v26, %v4293_v25 }
 0x1b7   : > { %v1571_v16 = vpop.permute.xlu0 %1570 }
 0x1b8   : > { %v1572_v39 = vsel %vm862_vm0, %v1571_v16, %v4295_v61  ;;  %v1574_v48 = vpop.permute.xlu1 %1573  ;;  %1624 = vrot.lane.b32.xlu1 %v1581_v42, %s3677_s25 }
 0x1b9   : > { %1618 = vrot.lane.b32.xlu0 %v1572_v39, %s3677_s25  ;;  %v1575_v49 = vsel %vm862_vm0, %v1574_v48, %v4301_v62 }
 0x1bb   : > { %v1589_v40 = vpop.permute.xlu0 %1588 }
 0x1bc   : > { %v1590_v58 = vsel %vm862_vm0, %v1589_v40, %v4309_v52  ;;  %v1592_v19 = vpop.permute.xlu1 %1591  ;;  %1620 = vrot.lane.b32.xlu1 %v1575_v49, %s3677_s25 }
 0x1bd   : > { %1630 = vrot.lane.b32.xlu0 %v1590_v58, %s3677_s25  ;;  %v1593_v26 = vsel %vm862_vm0, %v1592_v19, %v4313_v54 }
 0x1bf   : > { %v1583_v16 = vpop.permute.xlu0 %1582 }
 0x1c0   : > { %v1584_v42 = vsel %vm862_vm0, %v1583_v16, %v4315_v59  ;;  %v1586_v39 = vpop.permute.xlu1 %1585  ;;  %1632 = vrot.lane.b32.xlu1 %v1593_v26, %s3677_s25 }
 0x1c1   : > { %1626 = vrot.lane.b32.xlu0 %v1584_v42, %s3677_s25  ;;  %v1587_v48 = vsel %vm862_vm0, %v1586_v39, %v4321_v27 }
 0x1c3   : > { %v1601_v40 = vpop.permute.xlu0 %1600 }
 0x1c4   : > { %v1602_v49 = vsel %vm862_vm0, %v1601_v40, %v4329_v57  ;;  %v1604_v58 = vpop.permute.xlu1 %1603  ;;  %1628 = vrot.lane.b32.xlu1 %v1587_v48, %s3677_s25 }
 0x1c5   : > { %1638 = vrot.lane.b32.xlu0 %v1602_v49, %s3677_s25  ;;  %v1605_v19 = vsel %vm862_vm0, %v1604_v58, %v4333_v33 }
 0x1c7   : > { %v1595_v16 = vpop.permute.xlu0 %1594 }
 0x1c8   : > { %v1596_v26 = vsel %vm862_vm0, %v1595_v16, %v4337_v34  ;;  %v1598_v42 = vpop.permute.xlu1 %1597  ;;  %1640 = vrot.lane.b32.xlu1 %v1605_v19, %s3677_s25 }
 0x1c9   : > { %1634 = vrot.lane.b32.xlu0 %v1596_v26, %s3677_s25  ;;  %v1599_v39 = vsel %vm862_vm0, %v1598_v42, %v4345_v51 }
 0x1cb   : > { %v1613_v40 = vpop.permute.xlu0 %1612 }
 0x1cc   : > { %v1614_v48 = vsel %vm862_vm0, %v1613_v40, %v4349_v32  ;;  %v1616_v49 = vpop.permute.xlu1 %1615  ;;  %1636 = vrot.lane.b32.xlu1 %v1599_v39, %s3677_s25 }
 0x1cd   : > { %1646 = vrot.lane.b32.xlu0 %v1614_v48, %s3677_s25  ;;  %v1617_v58 = vsel %vm862_vm0, %v1616_v49, %v4357_v41 }
 0x1cf   : > { %v1607_v16 = vpop.permute.xlu0 %1606 }
 0x1d0   : > { %v1608_v19 = vsel %vm862_vm0, %v1607_v16, %v4359_v24  ;;  %v1610_v26 = vpop.permute.xlu1 %1609  ;;  %1648 = vrot.lane.b32.xlu1 %v1617_v58, %s3677_s25 }
 0x1d1   : > { %1642 = vrot.lane.b32.xlu0 %v1608_v19, %s3677_s25  ;;  %v1611_v42 = vsel %vm862_vm0, %v1610_v26, %v4365_v29 }
 0x1d4   : > { %1644 = vrot.lane.b32.xlu1 %v1611_v42, %s3677_s25 }
 0x206   : > { %v916_v39 = vpop.permute.xlu0 %915 }
 0x207   : > { %v945_v40 = vsel %vm862_vm0, %v916_v39, %v4200_v28 }
 0x208   : > { %v1025_v48 = vmul.f32 %v4155_v5, %v945_v40  ;;  %v1185_v19 = vmul.f32 %v4159_v7, %v945_v40 }
 0x20a   : > { %v918_v49 = vpop.permute.xlu1 %917  ;;  %1059 = vrot.lane.b32.xlu0 %v1025_v48, %s3678_s18  ;;  %v912_v16 = vpop.permute.xlu0 %911 }
 0x20b   : > { %v946_v58 = vsel %vm862_vm0, %v918_v49, %v4212_v35  ;;  %v943_v42 = vsel %vm862_vm0, %v912_v16, %v4202_v30 }
 0x20c   : > { %v1026_v26 = vmul.f32 %v4153_v4, %v946_v58  ;;  %v1186_v5 = vmul.f32 %v4157_v6, %v946_v58  ;;  %v1023_v48 = vmul.f32 %v4147_v1, %v943_v42  ;;  %v1183_v4 = vmul.f32 %v4151_v3, %v943_v42 }
 0x20e   : > { %1061 = vrot.lane.b32.xlu1 %v1026_v26, %s3678_s18  ;;  %v914_v39 = vpop.permute.xlu1 %913  ;;  %1219 = vrot.lane.b32.xlu0 %v1185_v19, %s3679_s23 }
 0x20f   : > { %v944_v49 = vsel %vm862_vm0, %v914_v39, %v4214_v36  ;;  %v924_v28 = vpop.permute.xlu0 %923 }
 0x210   : > { %v1024_v7 = vmul.f32 %v4145_v0, %v944_v49  ;;  %v949_v40 = vsel %vm862_vm0, %v924_v28, %v4220_v38  ;;  %v1184_v1 = vmul.f32 %v4149_v2, %v944_v49 }
 0x211   : > { %v1029_v6 = vmul.f32 %v4171_v13, %v949_v40  ;;  %v1189_v0 = vmul.f32 %v4175_v15, %v949_v40 }
 0x212   : > { %1221 = vrot.lane.b32.xlu1 %v1186_v5, %s3679_s23  ;;  %1055 = vrot.lane.b32.xlu0 %v1023_v48, %s3678_s18  ;;  %v926_v16 = vpop.permute.xlu1 %925 }
 0x213   : > { %v950_v58 = vsel %vm862_vm0, %v926_v16, %v4226_v43  ;;  %v920_v19 = vpop.permute.xlu0 %919 }
 0x214   : > { %v1030_v3 = vmul.f32 %v4169_v12, %v950_v58  ;;  %v947_v28 = vsel %vm862_vm0, %v920_v19, %v4228_v45  ;;  %v1190_v2 = vmul.f32 %v4173_v14, %v950_v58 }
 0x215   : > { %v1027_v13 = vmul.f32 %v4163_v9, %v947_v28  ;;  %v1187_v12 = vmul.f32 %v4167_v11, %v947_v28 }
 0x216   : > { %1057 = vrot.lane.b32.xlu1 %v1024_v7, %s3678_s18  ;;  %1215 = vrot.lane.b32.xlu0 %v1183_v4, %s3679_s23  ;;  %v922_v26 = vpop.permute.xlu1 %921 }
 0x217   : > { %v948_v42 = vsel %vm862_vm0, %v922_v26, %v4234_v46  ;;  %v932_v39 = vpop.permute.xlu0 %931 }
 0x218   : > { %v1028_v15 = vmul.f32 %v4161_v8, %v948_v42  ;;  %v953_v5 = vsel %vm862_vm0, %v932_v39, %v4242_v50  ;;  %v1188_v9 = vmul.f32 %v4165_v10, %v948_v42  ;;  %v5373_v39 = vld [vmem:[#allocation27_spill] sm:$0xff] }
 0x219   : > { %v1033_v14 = vmul.f32 %v4187_v21, %v953_v5  ;;  %v1193_v8 = vmul.f32 %v4191_v23, %v953_v5 }
 0x21a   : > { %1217 = vrot.lane.b32.xlu1 %v1184_v1, %s3679_s23  ;;  %1067 = vrot.lane.b32.xlu0 %v1029_v6, %s3678_s18  ;;  %v934_v48 = vpop.permute.xlu1 %933  ;;  %v5369_v6 = vld [vmem:[#allocation19_spill] sm:$0xff] }
 0x21b   : > { %v954_v49 = vsel %vm862_vm0, %v934_v48, %v4246_v53  ;;  %v928_v4 = vpop.permute.xlu0 %927  ;;  %v5374_v48 = vld [vmem:[#allocation29_spill] sm:$0xff] }
 0x21c   : > { %v1034_v11 = vmul.f32 %v4185_v20, %v954_v49  ;;  %v951_v7 = vsel %vm862_vm0, %v928_v4, %v4248_v55  ;;  %v1194_v10 = vmul.f32 %v4189_v22, %v954_v49  ;;  %v5368_v20 = vld [vmem:[#allocation21_spill] sm:$0xff] }
 0x21d   : > { %v1031_v21 = vmul.f32 %v4179_v17, %v951_v7  ;;  %v1191_v23 = vmul.f32 %v5368_v20, %v951_v7  ;;  %v5370_v17 = vld [vmem:[#allocation20_spill] sm:$0xff]  ;;  %v5378_v20 = vld [vmem:[#allocation25_spill] sm:$0xff] }
 0x21e   : > { %1069 = vrot.lane.b32.xlu1 %v1030_v3, %s3678_s18  ;;  %1227 = vrot.lane.b32.xlu0 %v1189_v0, %s3679_s23  ;;  %v930_v40 = vpop.permute.xlu1 %929  ;;  %v5371_v3 = vld [vmem:[#allocation28_spill] sm:$0xff] }
 0x21f   : > { %v952_v16 = vsel %vm862_vm0, %v930_v40, %v4254_v56  ;;  %v940_v1 = vpop.permute.xlu0 %939  ;;  %v5377_v40 = vld [vmem:[#allocation22_spill] sm:$0xff] }
 0x220   : > { %v1032_v58 = vmul.f32 %v5369_v6, %v952_v16  ;;  %v957_v19 = vsel %vm862_vm0, %v940_v1, %v4262_v60  ;;  %v1192_v22 = vmul.f32 %v5370_v17, %v952_v16  ;;  %v3680_v1 = vmov 0.0   ;;  %v5379_v6 = vld [vmem:[#allocation34_spill] sm:$0xff] }
 0x221   : > { %v1037_v28 = vmul.f32 %v5371_v3, %v957_v19  ;;  %3376 = vmatprep.subr.bf16.mxu1 %v3680_v1  ;;  %3392 = vmatprep.mubr.msk.bf16.mxu1 %vm3681_vm1, %v3680_v1 }
 0x222   : > { %1229 = vrot.lane.b32.xlu1 %v1190_v2, %s3679_s23  ;;  %1063 = vrot.lane.b32.xlu0 %v1027_v13, %s3678_s18  ;;  %v942_v0 = vpop.permute.xlu1 %941  ;;  %v5372_v13 = vld [vmem:[#allocation30_spill] sm:$0xff] }
 0x223   : > { %v958_v26 = vsel %vm862_vm0, %v942_v0, %v4266_v63  ;;  %v936_v2 = vpop.permute.xlu0 %935  ;;  %v1197_v42 = vmul.f32 %v5372_v13, %v957_v19  ;;  %v3561_v19 = vld [vmem:[%s3847_s28] sm:$0xff]  }
 0x224   : > { %3377 = vmatpush3.bf16.xpose.msra.mxu1 %v3561_v19 }
 0x225   : > { %3378 = vmatprep.subr.bf16.mxu1 %v3680_v1 }
 0x226   : > { %1065 = vrot.lane.b32.xlu1 %v1028_v15, %s3678_s18  ;;  %1223 = vrot.lane.b32.xlu0 %v1187_v12, %s3679_s23  ;;  %v1038_v12 = vmul.f32 %v5373_v39, %v958_v26  ;;  %v955_v15 = vsel %vm862_vm0, %v936_v2, %v4270_v31  ;;  %v938_v5 = vpop.permute.xlu1 %937 }
 0x227   : > { %v956_v4 = vsel %vm862_vm0, %v938_v5, %v4278_v37  ;;  %v3562_v5 = vld [vmem:[%s3847_s28 + $0x8] sm:$0xff]  }
 0x22a   : > { %1225 = vrot.lane.b32.xlu1 %v1188_v9, %s3679_s23  ;;  %1075 = vrot.lane.b32.xlu0 %v1033_v14, %s3678_s18  ;;  %v1198_v9 = vmul.f32 %v5374_v48, %v958_v26  ;;  %v5375_v14 = vld [vmem:[#allocation23_spill] sm:$0xff]  ;;  %v1625_v16 = vpop.permute.xlu1 %1624 }
 0x22b   : > { %v1035_v49 = vmul.f32 %v5375_v14, %v955_v15  ;;  %v1653_v0 = vsel %vm862_vm0, %v1625_v16, %v4293_v25  ;;  %v5384_v14 = vld [vmem:[#allocation36_spill] sm:$0xff] }
 0x22c   : > { %3379 = vmatpush3.bf16.xpose.msra.mxu1 %v3562_v5 }
 0x22d   : > { %3380 = vmatprep.subr.bf16.mxu1 %v3680_v1 }
 0x22e   : > { %1077 = vrot.lane.b32.xlu1 %v1034_v11, %s3678_s18  ;;  %1235 = vrot.lane.b32.xlu0 %v1193_v8, %s3679_s23  ;;  %v1623_v8 = vpop.permute.xlu0 %1622  ;;  %v5376_v11 = vld [vmem:[#allocation26_spill] sm:$0xff]  ;;  %v1621_v13 = vpop.permute.xlu1 %1620 }
 0x22f   : > { %v1195_v7 = vmul.f32 %v5376_v11, %v955_v15  ;;  %v1651_v48 = vsel %vm862_vm0, %v1621_v13, %v4301_v62 }
 0x232   : > { %1237 = vrot.lane.b32.xlu1 %v1194_v10, %s3679_s23  ;;  %1071 = vrot.lane.b32.xlu0 %v1031_v21, %s3678_s18  ;;  %v1036_v10 = vmul.f32 %v5377_v40, %v956_v4  ;;  %v1652_v21 = vsel %vm862_vm0, %v1623_v8, %v4285_v44  ;;  %v1619_v17 = vpop.permute.xlu0 %1618  ;;  %v5386_v40 = vld [vmem:[#allocation35_spill] sm:$0xff] }
 0x233   : > { %v1650_v2 = vsel %vm862_vm0, %v1619_v17, %v4295_v61 }
 0x236   : > { %1073 = vrot.lane.b32.xlu1 %v1032_v58, %s3678_s18  ;;  %1231 = vrot.lane.b32.xlu0 %v1191_v23, %s3679_s23  ;;  %v1196_v23 = vmul.f32 %v5378_v20, %v956_v4  ;;  %v1732_v58 = vmul.f32 %v5379_v6, %v1652_v21  ;;  %v5385_v4 = vld [vmem:[#allocation31_spill] sm:$0xff]  ;;  %v3563_v20 = vld [vmem:[%s3847_s28 + $0x10] sm:$0xff]  }
 0x237   : > { %v1731_v8 = vmul.f32 %v5385_v4, %v1651_v48  ;;  %3381 = vmatpush3.bf16.xpose.msra.mxu1 %v3563_v20  ;;  %v5394_v4 = vld [vmem:[#allocation43_spill] sm:$0xff]  ;;  %v5396_v20 = vld [vmem:[#allocation49_spill] sm:$0xff] }
 0x238   : > { %3382 = vmatprep.subr.bf16.mxu1 %v3680_v1 }
 0x23a   : > { %1233 = vrot.lane.b32.xlu1 %v1192_v22, %s3679_s23  ;;  %1083 = vrot.lane.b32.xlu0 %v1037_v28, %s3678_s18  ;;  %v5380_v22 = vld [vmem:[#allocation38_spill] sm:$0xff]  ;;  %v5381_v28 = vld [vmem:[#allocation33_spill] sm:$0xff] }
 0x23b   : > { %v1892_v3 = vmul.f32 %v5380_v22, %v1652_v21  ;;  %v1733_v26 = vmul.f32 %v5381_v28, %v1653_v0  ;;  %v5387_v21 = vld [vmem:[#allocation42_spill] sm:$0xff]  ;;  %v5390_v28 = vld [vmem:[#allocation45_spill] sm:$0xff] }
 0x23e   : > { %1085 = vrot.lane.b32.xlu1 %v1038_v12, %s3678_s18  ;;  %1243 = vrot.lane.b32.xlu0 %v1197_v42, %s3679_s23  ;;  %v5382_v42 = vld [vmem:[#allocation37_spill] sm:$0xff]  ;;  %v5383_v12 = vld [vmem:[#allocation32_spill] sm:$0xff] }
 0x23f   : > { %v1893_v39 = vmul.f32 %v5382_v42, %v1653_v0  ;;  %v1730_v15 = vmul.f32 %v5383_v12, %v1650_v2  ;;  %v5389_v0 = vld [vmem:[#allocation41_spill] sm:$0xff] }
 0x240   : > { %v3564_v42 = vld [vmem:[%s3847_s28 + $0x18] sm:$0xff]  }
 0x241   : > { %3383 = vmatpush3.bf16.xpose.msra.mxu1 %v3564_v42 }
 0x242   : > { %1245 = vrot.lane.b32.xlu1 %v1198_v9, %s3679_s23  ;;  %1079 = vrot.lane.b32.xlu0 %v1035_v49, %s3678_s18  ;;  %v1631_v9 = vpop.permute.xlu0 %1630  ;;  %v1890_v49 = vmul.f32 %v5384_v14, %v1650_v2  ;;  %v5391_v2 = vld [vmem:[#allocation40_spill] sm:$0xff] }
 0x243   : > { %v1656_v11 = vsel %vm862_vm0, %v1631_v9, %v4309_v52  ;;  %3384 = vmatprep.subr.bf16.mxu1 %v3680_v1 }
 0x244   : > { %v1736_v16 = vmul.f32 %v5387_v21, %v1656_v11 }
 0x246   : > { %1081 = vrot.lane.b32.xlu1 %v1036_v10, %s3678_s18  ;;  %1239 = vrot.lane.b32.xlu0 %v1195_v7, %s3679_s23  ;;  %v1633_v7 = vpop.permute.xlu1 %1632  ;;  %v1891_v10 = vmul.f32 %v5386_v40, %v1651_v48  ;;  %v1627_v6 = vpop.permute.xlu0 %1626  ;;  %v5393_v48 = vld [vmem:[#allocation39_spill] sm:$0xff] }
 0x247   : > { %v1654_v22 = vsel %vm862_vm0, %v1627_v6, %v4315_v59  ;;  %v3565_v40 = vld [vmem:[%s3847_s28 + $0x20] sm:$0xff]  }
 0x248   : > { %v1734_v13 = vmul.f32 %v5391_v2, %v1654_v22 }
 0x249   : > { %3385 = vmatpush3.bf16.xpose.msra.mxu1 %v3565_v40 }
 0x24a   : > { %1241 = vrot.lane.b32.xlu1 %v1196_v23, %s3679_s23  ;;  %1766 = vrot.lane.b32.xlu0 %v1732_v58, %s3678_s18  ;;  %v1657_v23 = vsel %vm862_vm0, %v1633_v7, %v4313_v54  ;;  %v5388_v58 = vld [vmem:[#allocation46_spill] sm:$0xff]  ;;  %v1639_v12 = vpop.permute.xlu0 %1638 }
 0x24b   : > { %v1896_v19 = vmul.f32 %v5388_v58, %v1656_v11  ;;  %v1737_v17 = vmul.f32 %v5389_v0, %v1657_v23  ;;  %v1660_v14 = vsel %vm862_vm0, %v1639_v12, %v4329_v57  ;;  %v5395_v11 = vld [vmem:[#allocation50_spill] sm:$0xff]  ;;  %3386 = vmatprep.subr.bf16.mxu1 %v3680_v1 }
 0x24c   : > { %v1740_v7 = vmul.f32 %v5395_v11, %v1660_v14 }
 0x24e   : > { %1768 = vrot.lane.b32.xlu1 %v1733_v26, %s3678_s18  ;;  %1926 = vrot.lane.b32.xlu0 %v1892_v3, %s3679_s23  ;;  %v1629_v3 = vpop.permute.xlu1 %1628  ;;  %v1897_v26 = vmul.f32 %v5390_v28, %v1657_v23  ;;  %v1635_v21 = vpop.permute.xlu0 %1634  ;;  %v3566_v28 = vld [vmem:[%s3847_s28 + $0x28] sm:$0xff]  }
 0x24f   : > { %v1658_v6 = vsel %vm862_vm0, %v1635_v21, %v4337_v34 }
 0x251   : > { %3387 = vmatpush3.bf16.xpose.msra.mxu1 %v3566_v28  ;;  %v5407_v28 = vld [vmem:[#allocation58_spill] sm:$0xff] }
 0x252   : > { %1928 = vrot.lane.b32.xlu1 %v1893_v39, %s3679_s23  ;;  %1762 = vrot.lane.b32.xlu0 %v1730_v15, %s3678_s18  ;;  %v1655_v39 = vsel %vm862_vm0, %v1629_v3, %v4321_v27  ;;  %v5392_v15 = vld [vmem:[#allocation44_spill] sm:$0xff]  ;;  %v1647_v3 = vpop.permute.xlu0 %1646 }
 0x253   : > { %v1894_v5 = vmul.f32 %v5392_v15, %v1654_v22  ;;  %v1735_v9 = vmul.f32 %v5393_v48, %v1655_v39  ;;  %3388 = vmatprep.subr.bf16.mxu1 %v3680_v1  ;;  %v1664_v12 = vsel %vm862_vm0, %v1647_v3, %v4349_v32 }
 0x256   : > { %1764 = vrot.lane.b32.xlu1 %v1731_v8, %s3678_s18  ;;  %1922 = vrot.lane.b32.xlu0 %v1890_v49, %s3679_s23  ;;  %v1641_v49 = vpop.permute.xlu1 %1640  ;;  %v1895_v8 = vmul.f32 %v5394_v4, %v1655_v39  ;;  %v1643_v15 = vpop.permute.xlu0 %1642 }
 0x25a   : > { %1924 = vrot.lane.b32.xlu1 %v1891_v10, %s3679_s23  ;;  %1774 = vrot.lane.b32.xlu0 %v1736_v16, %s3678_s18  ;;  %v1661_v10 = vsel %vm862_vm0, %v1641_v49, %v4333_v33  ;;  %v1900_v16 = vmul.f32 %v4389_v18, %v1660_v14  ;;  %v1637_v58 = vpop.permute.xlu1 %1636  ;;  %v3567_v49 = vld [vmem:[%s3847_s28 + $0x30] sm:$0xff]  }
 0x25b   : > { %v1741_v23 = vmul.f32 %v5396_v20, %v1661_v10  ;;  %v1659_v18 = vsel %vm862_vm0, %v1637_v58, %v4345_v51  ;;  %3389 = vmatpush3.bf16.xpose.msra.mxu1 %v3567_v49 }
 0x25c   : > { %3390 = vmatprep.subr.bf16.mxu1 %v3680_v1 }
 0x25e   : > { %1776 = vrot.lane.b32.xlu1 %v1737_v17, %s3678_s18  ;;  %1934 = vrot.lane.b32.xlu0 %v1896_v19, %s3679_s23  ;;  %v5397_v19 = vld [vmem:[#allocation53_spill] sm:$0xff]  ;;  %v5398_v17 = vld [vmem:[#allocation48_spill] sm:$0xff]  ;;  %v1649_v39 = vpop.permute.xlu1 %1648 }
 0x25f   : > { %v1901_v0 = vmul.f32 %v5397_v19, %v1661_v10  ;;  %v1738_v22 = vmul.f32 %v5398_v17, %v1658_v6  ;;  %v1665_v4 = vsel %vm862_vm0, %v1649_v39, %v4357_v41  ;;  %v5404_v10 = vld [vmem:[#allocation55_spill] sm:$0xff]  ;;  %v3568_v17 = vld [vmem:[%s3847_s28 + $0x38] sm:$0xff]  }
 0x260   : > { %v4726_v39 = vld [vmem:[%s5291_s9 + $0x8] sm:$0xff] }
 0x262   : > { %1936 = vrot.lane.b32.xlu1 %v1897_v26, %s3679_s23  ;;  %1770 = vrot.lane.b32.xlu0 %v1734_v13, %s3678_s18  ;;  %v5399_v26 = vld [vmem:[#allocation52_spill] sm:$0xff]  ;;  %v5400_v13 = vld [vmem:[#allocation47_spill] sm:$0xff]  ;;  %v1645_v11 = vpop.permute.xlu1 %1644 }
 0x263   : > { %v1898_v2 = vmul.f32 %v5399_v26, %v1658_v6  ;;  %v1739_v42 = vmul.f32 %v5400_v13, %v1659_v18  ;;  %v1663_v20 = vsel %vm862_vm0, %v1645_v11, %v4365_v29  ;;  %v5405_v6 = vld [vmem:[#allocation54_spill] sm:$0xff]  ;;  %3391 = vmatpush3.bf16.xpose.msra.mxu1 %v3568_v17  ;;  %v5409_v11 = vld [vmem:[#allocation24_spill] sm:$0xff] }
 0x264   : > { %v1743_v58 = vmul.f32 %v5405_v6, %v1663_v20  ;;  %v4714_v13 = vld [vmem:[%s5291_s9] sm:$0xff] }
 0x265   : > { %v846_v49 = vmul.f32 %v4714_v13, %v4202_v30 }
 0x266   : > { %1772 = vrot.lane.b32.xlu1 %v1735_v9, %s3678_s18  ;;  %1930 = vrot.lane.b32.xlu0 %v1894_v5, %s3679_s23  ;;  %v5401_v5 = vld [vmem:[#allocation51_spill] sm:$0xff]  ;;  %v5402_v9 = vld [vmem:[#allocation57_spill] sm:$0xff] }
 0x267   : > { %v1899_v48 = vmul.f32 %v5401_v5, %v1659_v18  ;;  %v1744_v14 = vmul.f32 %v5402_v9, %v1664_v12  ;;  %v1903_v18 = vmul.f32 %v5407_v28, %v1663_v20  ;;  %v4732_v5 = vld [vmem:[%s5291_s9 + $0x10] sm:$0xff] }
 0x26a   : > { %1932 = vrot.lane.b32.xlu1 %v1895_v8, %s3679_s23  ;;  %1782 = vrot.lane.b32.xlu0 %v1740_v7, %s3678_s18  ;;  %v1662_v8 = vsel %vm862_vm0, %v1643_v15, %v4359_v24  ;;  %v5403_v7 = vld [vmem:[#allocation56_spill] sm:$0xff] }
 0x26b   : > { %v1745_v40 = vmul.f32 %v5403_v7, %v1665_v4  ;;  %v1742_v21 = vmul.f32 %v5404_v10, %v1662_v8 }
 0x26e   : > { %1784 = vrot.lane.b32.xlu1 %v1741_v23, %s3678_s18  ;;  %1942 = vrot.lane.b32.xlu0 %v1900_v16, %s3679_s23  ;;  %v1902_v23 = vmul.f32 %v4401_v47, %v1662_v8  ;;  %v2439_v47 = vld [vmem:[%s5287_s5] sm:$0x3]  ;;  %v847_v8 = vmul.f32 %v4726_v39, %v4214_v36 }
 0x26f   : > { %3393 = vmatmul.mubr.bf16.vlgmr.msra.gmra.mrb[32].mxu1 %v2439_v47 }
 0x272   : > { %1944 = vrot.lane.b32.xlu1 %v1901_v0, %s3679_s23  ;;  %1778 = vrot.lane.b32.xlu0 %v1738_v22, %s3678_s18  ;;  %v5406_v22 = vld [vmem:[#allocation60_spill] sm:$0xff] }
 0x273   : > { %v1904_v3 = vmul.f32 %v5406_v22, %v1664_v12  ;;  %v5408_v12 = vld [vmem:[#allocation59_spill] sm:$0xff] }
 0x274   : > { %v1905_v15 = vmul.f32 %v5408_v12, %v1665_v4  ;;  %v848_v4 = vmul.f32 %v4732_v5, %v5409_v11 }
 0x276   : > { %1780 = vrot.lane.b32.xlu1 %v1739_v42, %s3678_s18  ;;  %1938 = vrot.lane.b32.xlu0 %v1898_v2, %s3679_s23  ;;  %v4719_v42 = vld [vmem:[%s5291_s9 + $0x18] sm:$0xff] }
 0x27a   : > { %1940 = vrot.lane.b32.xlu1 %v1899_v48, %s3679_s23  ;;  %1790 = vrot.lane.b32.xlu0 %v1744_v14, %s3678_s18  ;;  %v849_v14 = vmul.f32 %v4719_v42, %v4212_v35 }
 0x27c   : > { %v1060_v16 = vpop.permute.xlu0 %1059 }
 0x27e   : > { %1792 = vrot.lane.b32.xlu1 %v1745_v40, %s3678_s18  ;;  %1786 = vrot.lane.b32.xlu0 %v1742_v21, %s3678_s18 }
 0x280   : > { %v1062_v19 = vpop.permute.xlu1 %1061  ;;  %v1220_v0 = vpop.permute.xlu0 %1219 }
 0x281   : > { %v1106_v7 = vadd.f32 %v1062_v19, %v849_v14 }
 0x282   : > { %1788 = vrot.lane.b32.xlu1 %v1743_v58, %s3678_s18  ;;  %1946 = vrot.lane.b32.xlu0 %v1902_v23, %s3679_s23  ;;  %v1105_v23 = vadd.f32 %v1060_v16, %v848_v4  ;;  %v4749_v16 = vld [vmem:[%s5291_s9 + $0x38] sm:$0xff] }
 0x284   : > { %v1222_v26 = vpop.permute.xlu1 %1221  ;;  %v1056_v2 = vpop.permute.xlu0 %1055  ;;  %v1265_v17 = vadd.f32 %v1220_v0, %v1105_v23  ;;  %v4754_v0 = vld [vmem:[%s5291_s9 + $0x20] sm:$0xff]  ;;  %v3682_v23 = vmov 0  }
 0x285   : > { %v1103_v40 = vadd.f32 %v1056_v2, %v846_v49  ;;  %v1266_v6 = vadd.f32 %v1222_v26, %v1106_v7  ;;  %v4759_v26 = vld [vmem:[%s5291_s9 + $0x28] sm:$0xff]  ;;  %v4764_v2 = vld [vmem:[%s5291_s9 + $0x30] sm:$0xff]  ;;  %3520 = vset.pattern.permute.xlu1 %v3682_v23  ;;  %3519 = vset.pattern.permute.xlu0 %v3682_v23 }
 0x286   : > { %1948 = vrot.lane.b32.xlu1 %v1903_v18, %s3679_s23  ;;  %1950 = vrot.lane.b32.xlu0 %v1904_v3, %s3679_s23  ;;  %v852_v49 = vmul.f32 %v4764_v2, %v4220_v38  ;;  %v2157_v7 = vld [vmem:[%s3852_s15 + $0x8] sm:$0xff] }
 0x287   : > { %v1280_v36 = vpack.c.bf16 %v1266_v6, %v1265_v17 }
 0x288   : > { %v1058_v48 = vpop.permute.xlu1 %1057  ;;  %v1216_v9 = vpop.permute.xlu0 %1215 }
 0x289   : > { %v1104_v10 = vadd.f32 %v1058_v48, %v847_v8  ;;  %v1263_v58 = vadd.f32 %v1216_v9, %v1103_v40  ;;  %v850_v48 = vmul.f32 %v4754_v0, %v4228_v45  ;;  %v851_v9 = vmul.f32 %v4759_v26, %v4234_v46  ;;  %v2156_v40 = vld [vmem:[%s3852_s15] sm:$0xff] }
 0x28a   : > { %1952 = vrot.lane.b32.xlu1 %v1905_v15, %s3679_s23  ;;  %v853_v15 = vmul.f32 %v4749_v16, %v4226_v43  ;;  %v2039_v14 = vsel %vm2010_vm2, %v1280_v36, 0  ;;  %2175 = vperm.xlu0 %3519, %v2156_v40   ;;  %v2163_v40 = vld [vmem:[%s3852_s15 + $0x38] sm:$0xff] }
 0x28c   : > { %v1218_v21 = vpop.permute.xlu1 %1217  ;;  %v1068_v20 = vpop.permute.xlu0 %1067 }
 0x28d   : > { %v1264_v35 = vadd.f32 %v1218_v21, %v1104_v10  ;;  %v1109_v10 = vadd.f32 %v1068_v20, %v852_v49 }
 0x28e   : > { %2180 = vperm.xlu1 %3520, %v2157_v7   ;;  %v2162_v7 = vld [vmem:[%s3852_s15 + $0x30] sm:$0xff] }
 0x28f   : > { %v1279_v22 = vpack.c.bf16 %v1264_v35, %v1263_v58 }
 0x290   : > { %v1070_v30 = vpop.permute.xlu1 %1069  ;;  %v1228_v3 = vpop.permute.xlu0 %1227 }
 0x291   : > { %3428 = vmatprep.subr.msk.bf16.mxu0 %vm2010_vm2, %v1279_v22  ;;  %v2036_v28 = vsel %vm2010_vm2, %v1279_v22, 0  ;;  %v1110_v8 = vadd.f32 %v1070_v30, %v853_v15  ;;  %v1269_v38 = vadd.f32 %v1228_v3, %v1109_v10  ;;  %v2158_v30 = vld [vmem:[%s3852_s15 + $0x10] sm:$0xff]  ;;  %v2160_v3 = vld [vmem:[%s3852_s15 + $0x20] sm:$0xff]  ;;  %v4797_v15 = vld [vmem:[%s5291_s9 + $0x48] sm:$0xff] }
 0x292   : > { %3345 = vmatpush3.bf16.xpose.msra.mxu0 %v2036_v28  ;;  %2185 = vperm.xlu1 %3520, %v2158_v30  }
 0x293   : > { %3429 = vmatprep.subr.msk.bf16.mxu0 %vm2010_vm2, %v1280_v36  ;;  %v2159_v36 = vld [vmem:[%s3852_s15 + $0x18] sm:$0xff] }
 0x294   : > { %v1230_v19 = vpop.permute.xlu1 %1229  ;;  %v1064_v18 = vpop.permute.xlu0 %1063  ;;  %2190 = vperm.xlu0 %3519, %v2159_v36  }
 0x295   : > { %v1107_v11 = vadd.f32 %v1064_v18, %v850_v48  ;;  %v1270_v45 = vadd.f32 %v1230_v19, %v1110_v8  ;;  %v2161_v18 = vld [vmem:[%s3852_s15 + $0x28] sm:$0xff]  ;;  %v4802_v48 = vld [vmem:[%s5291_s9 + $0x50] sm:$0xff] }
 0x296   : > { %2195 = vperm.xlu1 %3520, %v2160_v3   ;;  %v856_v10 = vmul.f32 %v4802_v48, %v4242_v50  ;;  %v2167_v3 = vld [vmem:[%s3852_s15 + $0x58] sm:$0xff] }
 0x297   : > { %v1282_v22 = vpack.c.bf16 %v1270_v45, %v1269_v38 }
 0x298   : > { %v1066_v47 = vpop.permute.xlu1 %1065  ;;  %v1224_v12 = vpop.permute.xlu0 %1223  ;;  %2200 = vperm.xlu0 %3519, %v2161_v18  }
 0x299   : > { %v1108_v4 = vadd.f32 %v1066_v47, %v851_v9  ;;  %v1267_v46 = vadd.f32 %v1224_v12, %v1107_v11  ;;  %v4787_v47 = vld [vmem:[%s5291_s9 + $0x58] sm:$0xff]  ;;  %v4792_v12 = vld [vmem:[%s5291_s9 + $0x40] sm:$0xff]  ;;  %v855_v11 = vmul.f32 %v4797_v15, %v4254_v56 }
 0x29a   : > { %3347 = vmatpush3.bf16.xpose.msra.mxu0 %v2039_v14  ;;  %v857_v49 = vmul.f32 %v4787_v47, %v4246_v53  ;;  %v854_v8 = vmul.f32 %v4792_v12, %v4248_v55  ;;  %2205 = vperm.xlu1 %3520, %v2162_v7  }
 0x29c   : > { %v1226_v21 = vpop.permute.xlu1 %1225  ;;  %v1076_v43 = vpop.permute.xlu0 %1075  ;;  %2210 = vperm.xlu0 %3519, %v2163_v40  }
 0x29d   : > { %v1268_v6 = vadd.f32 %v1226_v21, %v1108_v4  ;;  %v2045_v4 = vsel %vm2010_vm2, %v1282_v22, 0  ;;  %v1113_v55 = vadd.f32 %v1076_v43, %v856_v10  ;;  %v2166_v43 = vld [vmem:[%s3852_s15 + $0x50] sm:$0xff] }
 0x29f   : > { %v1281_v58 = vpack.c.bf16 %v1268_v6, %v1267_v46 }
 0x2a0   : > { %v1078_v35 = vpop.permute.xlu1 %1077  ;;  %v1236_v17 = vpop.permute.xlu0 %1235 }
 0x2a1   : > { %3430 = vmatprep.subr.msk.bf16.mxu0 %vm2010_vm2, %v1281_v58  ;;  %v2042_v20 = vsel %vm2010_vm2, %v1281_v58, 0  ;;  %v1114_v21 = vadd.f32 %v1078_v35, %v857_v49  ;;  %v2164_v58 = vld [vmem:[%s3852_s15 + $0x40] sm:$0xff] }
 0x2a2   : > { %3349 = vmatpush3.bf16.xpose.msra.mxu0 %v2042_v20  ;;  %v1273_v20 = vadd.f32 %v1236_v17, %v1113_v55  ;;  %2215 = vperm.xlu1 %3520, %v2164_v58   ;;  %v2168_v17 = vld [vmem:[%s3852_s15 + $0x60] sm:$0xff] }
 0x2a3   : > { %3431 = vmatprep.subr.msk.bf16.mxu0 %vm2010_vm2, %v1282_v22  ;;  %v2165_v22 = vld [vmem:[%s3852_s15 + $0x48] sm:$0xff]  ;;  %v4832_v49 = vld [vmem:[%s5291_s9 + $0x60] sm:$0xff] }
 0x2a4   : > { %v1238_v28 = vpop.permute.xlu1 %1237  ;;  %v1072_v19 = vpop.permute.xlu0 %1071  ;;  %2220 = vperm.xlu0 %3519, %v2165_v22   ;;  %v858_v10 = vmul.f32 %v4832_v49, %v4270_v31 }
 0x2a5   : > { %v1111_v23 = vadd.f32 %v1072_v19, %v854_v8  ;;  %v1274_v56 = vadd.f32 %v1238_v28, %v1114_v21  ;;  %v4837_v8 = vld [vmem:[%s5291_s9 + $0x68] sm:$0xff] }
 0x2a6   : > { %2225 = vperm.xlu1 %3520, %v2166_v43   ;;  %v859_v21 = vmul.f32 %v4837_v8, %v4278_v37  ;;  %v2440_v37 = vld [vmem:[%s5288_s6] sm:$0xf] }
 0x2a7   : > { %v1284_v35 = vpack.c.bf16 %v1274_v56, %v1273_v20 }
 0x2a8   : > { %v1074_v9 = vpop.permute.xlu1 %1073  ;;  %v1232_v14 = vpop.permute.xlu0 %1231  ;;  %2230 = vperm.xlu0 %3519, %v2167_v3  }
 0x2a9   : > { %v1112_v45 = vadd.f32 %v1074_v9, %v855_v11  ;;  %v1271_v6 = vadd.f32 %v1232_v14, %v1111_v23  ;;  %v2169_v9 = vld [vmem:[%s3852_s15 + $0x68] sm:$0xff]  ;;  %v4827_v14 = vld [vmem:[%s5291_s9 + $0x78] sm:$0xff]  ;;  %v4842_v11 = vld [vmem:[%s5291_s9 + $0x70] sm:$0xff]  ;;  %v2051_v23 = vsel %vm2010_vm2, %v1284_v35, 0 }
 0x2aa   : > { %3351 = vmatpush3.bf16.xpose.msra.mxu0 %v2045_v4  ;;  %2235 = vperm.xlu1 %3520, %v2168_v17   ;;  %v861_v40 = vmul.f32 %v4827_v14, %v4266_v63  ;;  %v860_v55 = vmul.f32 %v4842_v11, %v4262_v60  ;;  %v3553_v17 = vld [vmem:[%s5289_s7] sm:$0xff]  }
 0x2ac   : > { %v1234_v53 = vpop.permute.xlu1 %1233  ;;  %v1084_v46 = vpop.permute.xlu0 %1083  ;;  %2240 = vperm.xlu0 %3519, %v2169_v9   ;;  %v1556_v9 = vmul.f32 %v4285_v44, %v4732_v5 }
 0x2ad   : > { %v1272_v38 = vadd.f32 %v1234_v53, %v1112_v45  ;;  %v2170_v45 = vld [vmem:[%s3852_s15 + $0x70] sm:$0xff]  ;;  %v2171_v53 = vld [vmem:[%s3852_s15 + $0x78] sm:$0xff]  ;;  %v1117_v63 = vadd.f32 %v1084_v46, %v860_v55 }
 0x2ae   : > { %2245 = vperm.xlu1 %3520, %v2170_v45  }
 0x2af   : > { %v1283_v30 = vpack.c.bf16 %v1272_v38, %v1271_v6 }
 0x2b0   : > { %v1086_v36 = vpop.permute.xlu1 %1085  ;;  %v1244_v50 = vpop.permute.xlu0 %1243  ;;  %2250 = vperm.xlu0 %3519, %v2171_v53  }
 0x2b1   : > { %3432 = vmatprep.subr.msk.bf16.mxu0 %vm2010_vm2, %v1283_v30  ;;  %v2048_v19 = vsel %vm2010_vm2, %v1283_v30, 0  ;;  %v1118_v56 = vadd.f32 %v1086_v36, %v861_v40 }
 0x2b2   : > { %3353 = vmatpush3.bf16.xpose.msra.mxu0 %v2048_v19  ;;  %2443 = vperm.xlu1 %3520, %v2440_v37   ;;  %v3555_v37 = vld [vmem:[%s5289_s7 + $0x10] sm:$0xff]  }
 0x2b3   : > { %3433 = vmatprep.subr.msk.bf16.mxu0 %vm2010_vm2, %v1284_v35  ;;  %v1277_v35 = vadd.f32 %v1244_v50, %v1117_v63  ;;  %v1554_v50 = vmul.f32 %v4295_v61, %v4714_v13 }
 0x2b4   : > { %v1246_v28 = vpop.permute.xlu1 %1245  ;;  %v1080_v18 = vpop.permute.xlu0 %1079 }
 0x2b5   : > { %v1115_v6 = vadd.f32 %v1080_v18, %v858_v10  ;;  %v1278_v31 = vadd.f32 %v1246_v28, %v1118_v56  ;;  %v1557_v18 = vmul.f32 %v4293_v25, %v4719_v42 }
 0x2b7   : > { %v1286_v60 = vpack.c.bf16 %v1278_v31, %v1277_v35  ;;  %v1558_v35 = vmul.f32 %v4315_v59, %v4754_v0 }
 0x2b8   : > { %v1082_v4 = vpop.permute.xlu1 %1081  ;;  %v1240_v7 = vpop.permute.xlu0 %1239 }
 0x2b9   : > { %v1116_v38 = vadd.f32 %v1082_v4, %v859_v21  ;;  %v1275_v20 = vadd.f32 %v1240_v7, %v1115_v6  ;;  %v1555_v21 = vmul.f32 %v4301_v62, %v4726_v39  ;;  %v3554_v39 = vld [vmem:[%s5289_s7 + $0x8] sm:$0xff]  }
 0x2ba   : > { %3355 = vmatpush3.bf16.xpose.msra.mxu0 %v2051_v23  ;;  %v2057_v23 = vsel %vm2010_vm2, %v1286_v60, 0 }
 0x2bc   : > { %v1242_v58 = vpop.permute.xlu1 %1241  ;;  %v1767_v22 = vpop.permute.xlu0 %1766 }
 0x2bd   : > { %v1276_v30 = vadd.f32 %v1242_v58, %v1116_v38  ;;  %v1812_v25 = vadd.f32 %v1767_v22, %v1556_v9 }
 0x2bf   : > { %v1285_v19 = vpack.c.bf16 %v1276_v30, %v1275_v20  ;;  %v1561_v30 = vmul.f32 %v4313_v54, %v4749_v16 }
 0x2c0   : > { %v1769_v43 = vpop.permute.xlu1 %1768  ;;  %v1927_v3 = vpop.permute.xlu0 %1926 }
 0x2c1   : > { %3434 = vmatprep.subr.msk.bf16.mxu0 %vm2010_vm2, %v1285_v19  ;;  %v2054_v36 = vsel %vm2010_vm2, %v1285_v19, 0  ;;  %v1813_v4 = vadd.f32 %v1769_v43, %v1557_v18  ;;  %v1972_v45 = vadd.f32 %v1927_v3, %v1812_v25  ;;  %v1560_v19 = vmul.f32 %v4309_v52, %v4764_v2 }
 0x2c2   : > { %3357 = vmatpush3.bf16.xpose.msra.mxu0 %v2054_v36 }
 0x2c3   : > { %3435 = vmatprep.subr.msk.bf16.mxu0 %vm2010_vm2, %v1286_v60  ;;  %v1988_v38 = vmul.f32 0.125, %v1972_v45  ;;  %v1562_v45 = vmul.f32 %v4337_v34, %v4792_v12 }
 0x2c4   : > { %v1929_v46 = vpop.permute.xlu1 %1928  ;;  %v1763_v28 = vpop.permute.xlu0 %1762 }
 0x2c5   : > { %v1810_v10 = vadd.f32 %v1763_v28, %v1554_v50  ;;  %v1973_v42 = vadd.f32 %v1929_v46, %v1813_v4  ;;  %v1559_v46 = vmul.f32 %v4321_v27, %v4759_v26  ;;  %v3556_v28 = vld [vmem:[%s5289_s7 + $0x18] sm:$0xff]   ;;  %v3557_v27 = vld [vmem:[%s5289_s7 + $0x20] sm:$0xff]  }
 0x2c7   : > { %v1989_v44 = vmul.f32 0.125, %v1973_v42 }
 0x2c8   : > { %v1765_v7 = vpop.permute.xlu1 %1764  ;;  %v1923_v40 = vpop.permute.xlu0 %1922 }
 0x2c9   : > { %v1811_v61 = vadd.f32 %v1765_v7, %v1555_v21  ;;  %v1970_v13 = vadd.f32 %v1923_v40, %v1810_v10  ;;  %v2003_v62 = vpack.c.bf16 %v1989_v44, %v1988_v38  ;;  %v3560_v38 = vld [vmem:[%s5289_s7 + $0x38] sm:$0xff]  }
 0x2ca   : > { %3359 = vmatpush3.bf16.xpose.msra.mxu0 %v2057_v23  ;;  %v3558_v23 = vld [vmem:[%s5289_s7 + $0x28] sm:$0xff]  }
 0x2cb   : > { %3396 = vmatprep.subr.bf16.mxu0 %v3553_v17  ;;  %v1986_v5 = vmul.f32 0.125, %v1970_v13  ;;  %v3559_v13 = vld [vmem:[%s5289_s7 + $0x30] sm:$0xff]  }
 0x2cc   : > { %v1925_v53 = vpop.permute.xlu1 %1924  ;;  %v1775_v55 = vpop.permute.xlu0 %1774 }
 0x2cd   : > { %v1971_v56 = vadd.f32 %v1925_v53, %v1811_v61  ;;  %v1816_v54 = vadd.f32 %v1775_v55, %v1560_v19  ;;  %v1565_v61 = vmul.f32 %v4333_v33, %v4787_v47  ;;  %v1564_v53 = vmul.f32 %v4329_v57, %v4802_v48 }
 0x2cf   : > { %v1987_v6 = vmul.f32 0.125, %v1971_v56 }
 0x2d0   : > { %v1777_v58 = vpop.permute.xlu1 %1776  ;;  %v1935_v63 = vpop.permute.xlu0 %1934 }
 0x2d1   : > { %v2002_v31 = vpack.c.bf16 %v1987_v6, %v1986_v5  ;;  %v1817_v43 = vadd.f32 %v1777_v58, %v1561_v30  ;;  %v1976_v0 = vadd.f32 %v1935_v63, %v1816_v54  ;;  %v1563_v6 = vmul.f32 %v4345_v51, %v4797_v15 }
 0x2d3   : > { %3360 = vmatprep.mubr.msk.bf16.mxu0 %vm2010_vm2, %v2002_v31  ;;  %v1992_v4 = vmul.f32 0.125, %v1976_v0 }
 0x2d4   : > { %v1937_v22 = vpop.permute.xlu1 %1936  ;;  %v1771_v20 = vpop.permute.xlu0 %1770  ;;  %3361 = vmatmul.mubr.msk.bf16.vlgmr.msra.gmra.mrb[0].mxu0 %vm2010_vm2, %v2003_v62 }
 0x2d5   : > { %3397 = vmatpush3.bf16.msra.mxu0 %v3553_v17  ;;  %v1814_v36 = vadd.f32 %v1771_v20, %v1558_v35  ;;  %v1977_v16 = vadd.f32 %v1937_v22, %v1817_v43 }
 0x2d6   : > { %3398 = vmatprep.subr.bf16.mxu0 %v3554_v39 }
 0x2d7   : > { %v1993_v17 = vmul.f32 0.125, %v1977_v16 }
 0x2d8   : > { %v1773_v3 = vpop.permute.xlu1 %1772  ;;  %v1931_v60 = vpop.permute.xlu0 %1930 }
 0x2d9   : > { %3399 = vmatpush3.bf16.msra.mxu0 %v3554_v39  ;;  %v1815_v18 = vadd.f32 %v1773_v3, %v1559_v46  ;;  %v1974_v59 = vadd.f32 %v1931_v60, %v1814_v36  ;;  %v2005_v21 = vpack.c.bf16 %v1993_v17, %v1992_v4  ;;  %v1567_v3 = vmul.f32 %v4365_v29, %v4837_v8  ;;  %v3571_v17 = vld [vmem:[%s3847_s28 + $0x10] sm:$0xff]  }
 0x2da   : > { %3400 = vmatprep.subr.bf16.mxu0 %v3555_v37  ;;  %v1568_v60 = vmul.f32 %v4349_v32, %v4842_v11  ;;  %v3575_v4 = vld [vmem:[%s3847_s28 + $0x30] sm:$0xff]  }
 0x2db   : > { %v1990_v26 = vmul.f32 0.125, %v1974_v59 }
 0x2dc   : > { %v1933_v50 = vpop.permute.xlu1 %1932  ;;  %v1783_v52 = vpop.permute.xlu0 %1782 }
 0x2dd   : > { %v1975_v2 = vadd.f32 %v1933_v50, %v1815_v18  ;;  %3401 = vmatpush3.bf16.msra.mxu0 %v3555_v37  ;;  %v1820_v33 = vadd.f32 %v1783_v52, %v1564_v53  ;;  %v1566_v37 = vmul.f32 %v4359_v24, %v4832_v49  ;;  %v1569_v24 = vmul.f32 %v4357_v41, %v4827_v14  ;;  %v3569_v41 = vld [vmem:[%s3847_s28] sm:$0xff]   ;;  %v3570_v14 = vld [vmem:[%s3847_s28 + $0x8] sm:$0xff]  }
 0x2de   : > { %3402 = vmatprep.subr.bf16.mxu0 %v3556_v28 }
 0x2df   : > { %v1991_v9 = vmul.f32 0.125, %v1975_v2 }
 0x2e0   : > { %v1785_v7 = vpop.permute.xlu1 %1784  ;;  %v1943_v40 = vpop.permute.xlu0 %1942 }
 0x2e1   : > { %v2004_v10 = vpack.c.bf16 %v1991_v9, %v1990_v26  ;;  %3403 = vmatpush3.bf16.msra.mxu0 %v3556_v28  ;;  %v1821_v55 = vadd.f32 %v1785_v7, %v1565_v61  ;;  %v1980_v12 = vadd.f32 %v1943_v40, %v1820_v33  ;;  %v3573_v26 = vld [vmem:[%s3847_s28 + $0x20] sm:$0xff]   ;;  %v3574_v9 = vld [vmem:[%s3847_s28 + $0x28] sm:$0xff]   ;;  %v3576_v7 = vld [vmem:[%s3847_s28 + $0x38] sm:$0xff]  }
 0x2e2   : > { %3404 = vmatprep.subr.bf16.mxu0 %v3557_v27  ;;  %v4951_v33 = vld [vmem:[%s3842_s24] ss:$0 sm:$0xff] }
 0x2e3   : > { %3364 = vmatprep.mubr.msk.bf16.mxu0 %vm2010_vm2, %v2004_v10  ;;  %v1996_v51 = vmul.f32 0.125, %v1980_v12 }
 0x2e4   : > { %v1945_v25 = vpop.permute.xlu1 %1944  ;;  %v1779_v42 = vpop.permute.xlu0 %1778  ;;  %3365 = vmatmul.mubr.msk.bf16.gmra.mrb[4].mxu0 %vm2010_vm2, %v2005_v21 }
 0x2e5   : > { %3405 = vmatpush3.bf16.msra.mxu0 %v3557_v27  ;;  %v1818_v5 = vadd.f32 %v1779_v42, %v1562_v45  ;;  %v1981_v47 = vadd.f32 %v1945_v25, %v1821_v55  ;;  %v3572_v27 = vld [vmem:[%s3847_s28 + $0x18] sm:$0xff]  }
 0x2e6   : > { %3406 = vmatprep.subr.bf16.mxu0 %v3558_v23 }
 0x2e7   : > { %v1997_v31 = vmul.f32 0.125, %v1981_v47 }
 0x2e8   : > { %v1781_v56 = vpop.permute.xlu1 %1780  ;;  %v1939_v44 = vpop.permute.xlu0 %1938 }
 0x2e9   : > { %3407 = vmatpush3.bf16.msra.mxu0 %v3558_v23  ;;  %v1819_v58 = vadd.f32 %v1781_v56, %v1563_v6  ;;  %v1978_v34 = vadd.f32 %v1939_v44, %v1818_v5  ;;  %v2007_v30 = vpack.c.bf16 %v1997_v31, %v1996_v51 }
 0x2ea   : > { %3408 = vmatprep.subr.bf16.mxu0 %v3559_v13 }
 0x2eb   : > { %v1994_v62 = vmul.f32 0.125, %v1978_v34 }
 0x2ec   : > { %v1941_v63 = vpop.permute.xlu1 %1940  ;;  %v1791_v57 = vpop.permute.xlu0 %1790 }
 0x2ed   : > { %v1979_v48 = vadd.f32 %v1941_v63, %v1819_v58  ;;  %3409 = vmatpush3.bf16.msra.mxu0 %v3559_v13  ;;  %v1824_v28 = vadd.f32 %v1791_v57, %v1568_v60  ;;  %v2275_v58 = vlaneseq }
 0x2ee   : > { %3410 = vmatprep.subr.bf16.mxu0 %v3560_v38 }
 0x2ef   : > { %v1995_v39 = vmul.f32 0.125, %v1979_v48  ;;  %v4960_v63 = vshrl.u32 %v2275_v58, 7  ;;  %v4969_v51 = vand.u32 127, %v2275_v58 }
 0x2f0   : > { %v1793_v15 = vpop.permute.xlu1 %1792  ;;  %v1787_v22 = vpop.permute.xlu0 %1786 }
 0x2f1   : > { %v2006_v20 = vpack.c.bf16 %v1995_v39, %v1994_v62  ;;  %3411 = vmatpush3.bf16.msra.mxu0 %v3560_v38  ;;  %v1822_v43 = vadd.f32 %v1787_v22, %v1566_v37  ;;  %v1825_v18 = vadd.f32 %v1793_v15, %v1569_v24  ;;  %v2278_v39 = vadd.s32 16, %v4960_v63 }
 0x2f2   : > { %v2277_v37 = vadd.s32 8, %v4960_v63  ;;  %vm2311_vm4 = vcmp.gt.s32.totalorder %v4960_v63, %v4969_v51 }
 0x2f3   : > { %3368 = vmatprep.mubr.msk.bf16.mxu0 %vm2010_vm2, %v2006_v20  ;;  %v2279_v20 = vadd.s32 24, %v4960_v63  ;;  %vm2313_vm3 = vcmp.gt.s32.totalorder %v2278_v39, %v4969_v51 }
 0x2f4   : > { %v1789_v35 = vpop.permute.xlu1 %1788  ;;  %v1947_v19 = vpop.permute.xlu0 %1946  ;;  %3369 = vmatmul.mubr.msk.bf16.gmra.mrb[8].mxu0 %vm2010_vm2, %v2007_v30  ;;  %vm2312_vm6 = vcmp.gt.s32.totalorder %v2277_v37, %v4969_v51 }
 0x2f5   : > { %v1823_v36 = vadd.f32 %v1789_v35, %v1567_v3  ;;  %v1982_v46 = vadd.f32 %v1947_v19, %v1822_v43  ;;  %vm2314_vm5 = vcmp.gt.s32.totalorder %v2279_v20, %v4969_v51 }
 0x2f7   : > { %v1998_v59 = vmul.f32 0.125, %v1982_v46 }
 0x2f8   : > { %v1949_v54 = vpop.permute.xlu1 %1948  ;;  %v1951_v16 = vpop.permute.xlu0 %1950 }
 0x2f9   : > { %v1983_v49 = vadd.f32 %v1949_v54, %v1823_v36  ;;  %v1984_v29 = vadd.f32 %v1951_v16, %v1824_v28  ;;  %v2329_v16 = vsel %vm2313_vm3, -1e+12, %v3680_v1  ;;  %vm2689_vm3 = vcmask 31744  }
 0x2fb   : > { %v1999_v0 = vmul.f32 0.125, %v1983_v49  ;;  %v2000_v50 = vmul.f32 0.125, %v1984_v29 }
 0x2fc   : > { %v1953_v8 = vpop.permute.xlu1 %1952 }
 0x2fd   : > { %v2008_v32 = vpack.c.bf16 %v1999_v0, %v1998_v59  ;;  %v1985_v11 = vadd.f32 %v1953_v8, %v1825_v18  ;;  %v2327_v18 = vsel %vm2311_vm4, -1e+12, %v3680_v1  ;;  %v2330_v8 = vsel %vm2314_vm5, -1e+12, %v3680_v1 }
 0x2ff   : > { %v2001_v52 = vmul.f32 0.125, %v1985_v11  ;;  %3372 = vmatprep.mubr.msk.bf16.mxu0 %vm2010_vm2, %v2008_v32 }
 0x301   : > { %v2009_v2 = vpack.c.bf16 %v2001_v52, %v2000_v50  ;;  %v2328_v52 = vsel %vm2312_vm6, -1e+12, %v3680_v1 }
 0x303   : > { %3373 = vmatmul.mubr.msk.bf16.gmra.mrb[12].mxu0 %vm2010_vm2, %v2009_v2 }
 0x304   : > { %3412 = vmatprep.mubr.bf16.mxu0 %v3569_v41 }
 0x309   : > { %v4954_v38 = vpop.permute.xlu0 %2175 }
 0x30a   : > { %v2259_v57 = vmul.f32 %v4951_v33, %v4954_v38 }
 0x30b   : > { %3413 = vmatmul.mubr.bf16.vlgmr.msra.gmra.mrb[16].mxu0 %v3570_v14 }
 0x30c   : > { %3416 = vmatprep.mubr.bf16.mxu0 %v3571_v17  ;;  %v2359_v15 = vsub.f32 1.0, %v2259_v57 }
 0x30d   : > { %v4934_v40 = vpop.permute.xlu1 %2180 }
 0x30e   : > { %v2260_v31 = vmul.f32 %v4951_v33, %v4934_v40  ;;  %v2375_v19 = vmul.f32 1e+12, %v2359_v15 }
 0x310   : > { %v2360_v30 = vsub.f32 1.0, %v2260_v31 }
 0x311   : > { %v4936_v10 = vpop.permute.xlu1 %2185 }
 0x312   : > { %v2261_v12 = vmul.f32 %v4951_v33, %v4936_v10  ;;  %v2376_v54 = vmul.f32 1e+12, %v2360_v30 }
 0x313   : > { %3417 = vmatmul.mubr.bf16.gmra.mrb[20].mxu0 %v3572_v27  ;;  %v4956_v34 = vpop.permute.xlu0 %2190 }
 0x314   : > { %3420 = vmatprep.mubr.bf16.mxu0 %v3573_v26  ;;  %v2262_v48 = vmul.f32 %v4951_v33, %v4956_v34  ;;  %v2361_v62 = vsub.f32 1.0, %v2261_v12 }
 0x315   : > { %v4938_v21 = vpop.permute.xlu1 %2195 }
 0x316   : > { %v2362_v22 = vsub.f32 1.0, %v2262_v48  ;;  %v2377_v35 = vmul.f32 1e+12, %v2361_v62 }
 0x317   : > { %v4976_v3 = vpop.permute.xlu0 %2200 }
 0x318   : > { %v2378_v60 = vmul.f32 1e+12, %v2362_v22 }
 0x319   : > { %v4940_v23 = vpop.permute.xlu1 %2205 }
 0x31a   : > { %v2265_v27 = vmul.f32 %v4951_v33, %v4940_v23 }
 0x31b   : > { %3421 = vmatmul.mubr.bf16.gmra.mrb[24].mxu0 %v3574_v9  ;;  %v4984_v14 = vpop.permute.xlu0 %2210  ;;  %v2263_v9 = vmul.f32 %v4951_v33, %v4938_v21 }
 0x31c   : > { %3424 = vmatprep.mubr.bf16.mxu0 %v3575_v4  ;;  %v2266_v4 = vmul.f32 %v4951_v33, %v4984_v14 }
 0x321   : > { %v4942_v25 = vpop.permute.xlu1 %2215 }
 0x323   : > { %3425 = vmatmul.mubr.bf16.gmra.mrb[28].mxu0 %v3576_v7  ;;  %v2264_v7 = vmul.f32 %v4951_v33, %v4976_v3 }
 0x325   : > { %v4944_v42 = vpop.permute.xlu1 %2225 }
 0x329   : > { %v4946_v61 = vpop.permute.xlu1 %2235 }
 0x32d   : > { %v4948_v13 = vpop.permute.xlu1 %2245 }
 0x331   : > { %v2444_v45 = vpop.permute.xlu1 %2443 }
 0x342   : > { %v2480_v53 = vpop.f32.mrb[32].mxu1 }
 0x343   : > { %v2481_v55 = vadd.f32 %v2480_v53, %v2444_v45  ;;  %v3394_v56 = vpop.f32.mrb[33].mxu1  ;;  %v2365_v45 = vsub.f32 1.0, %v2265_v27  ;;  %v2282_v53 = vadd.s32 48, %v4960_v63 }
 0x344   : > { %v2483_v44 = vpop.f32.mrb[34].mxu1  ;;  %v2280_v56 = vadd.s32 32, %v4960_v63 }
 0x345   : > { %v2486_v5 = vmul.f32 0.5, %v2481_v55  ;;  %v3395_v6 = vpop.f32.mrb[35].mxu1  ;;  %v2363_v55 = vsub.f32 1.0, %v2263_v9  ;;  %v2366_v44 = vsub.f32 1.0, %v2266_v4  ;;  %v2381_v58 = vmul.f32 1e+12, %v2365_v45 }
 0x346   : > { %v2364_v6 = vsub.f32 1.0, %v2264_v7  ;;  %vm2317_vm7 = vcmp.gt.s32.totalorder %v2282_v53, %v4969_v51  ;;  %vm2315_vm8 = vcmp.gt.s32.totalorder %v2280_v56, %v4969_v51 }
 0x347   : > { %v2487_v47 = vmul.f32 %v4951_v33, %v2486_v5  ;;  %v2283_v5 = vadd.s32 56, %v4960_v63  ;;  %v2333_v22 = vsel %vm2317_vm7, -1e+12, %v3680_v1 }
 0x348   : > { %v2380_v15 = vmul.f32 1e+12, %v2364_v6 }
 0x349   : > { %2488 = vst [vmem:[#allocation3] sm:$0xf] %v2487_v47  ;;  %v2281_v47 = vadd.s32 40, %v4960_v63  ;;  %vm2318_vm9 = vcmp.gt.s32.totalorder %v2283_v5, %v4969_v51 }
 0x34b   : > { %vm2316_vm10 = vcmp.gt.s32.totalorder %v2281_v47, %v4969_v51 }
 0x3a7   : > { %v3362_v43 = vpop.f32.mrb[0].mxu0 }
 0x3a8   : > { %v2345_v36 = vmul.f32 %v3362_v43, %v2261_v12  ;;  %v2093_v46 = vpop.f32.mrb[1].mxu0  ;;  %v2379_v12 = vmul.f32 1e+12, %v2363_v55 }
 0x3a9   : > { %v2343_v28 = vmul.f32 %v2259_v57, %v2093_v46  ;;  %v3363_v24 = vpop.f32.mrb[2].mxu0 }
 0x3aa   : > { %v2393_v49 = vsub.f32 %v2345_v36, %v2377_v35  ;;  %v2346_v59 = vmul.f32 %v3363_v24, %v2262_v48  ;;  %v2096_v0 = vpop.f32.mrb[3].mxu0  ;;  %v5000_v48 = vpop.permute.xlu0 %2220  ;;  %v2331_v35 = vsel %vm2315_vm8, -1e+12, %v3680_v1  ;;  %v2334_v36 = vsel %vm2318_vm9, -1e+12, %v3680_v1 }
 0x3ab   : > { %v2391_v29 = vsub.f32 %v2343_v28, %v2375_v19  ;;  %v2344_v32 = vmul.f32 %v2260_v31, %v2096_v0  ;;  %v2382_v31 = vmul.f32 1e+12, %v2366_v44  ;;  %v2332_v28 = vsel %vm2316_vm10, -1e+12, %v3680_v1 }
 0x3ac   : > { %v2409_v11 = vadd.f32 %v2393_v49, %v2329_v16  ;;  %v2394_v50 = vsub.f32 %v2346_v59, %v2378_v60  ;;  %v2269_v0 = vmul.f32 %v4951_v33, %v4944_v42 }
 0x3ad   : > { %v2407_v2 = vadd.f32 %v2391_v29, %v2327_v18  ;;  %v2392_v41 = vsub.f32 %v2344_v32, %v2376_v54 }
 0x3ae   : > { %2425 = vst [vmem:[#allocation2 + $0x10] sm:$0xff] %v2409_v11  ;;  %v2410_v17 = vadd.f32 %v2394_v50, %v2330_v8  ;;  %v5008_v18 = vpop.permute.xlu0 %2230  ;;  %v2267_v8 = vmul.f32 %v4951_v33, %v4942_v25  ;;  %v2268_v11 = vmul.f32 %v4951_v33, %v5000_v48  ;;  %v2369_v50 = vsub.f32 1.0, %v2269_v0 }
 0x3af   : > { %2423 = vst [vmem:[#allocation2] sm:$0xff] %v2407_v2  ;;  %v2408_v26 = vadd.f32 %v2392_v41, %v2328_v52  ;;  %v2270_v32 = vmul.f32 %v4951_v33, %v5008_v18  ;;  %v2286_v52 = vadd.s32 80, %v4960_v63  ;;  %v2284_v41 = vadd.s32 64, %v4960_v63 }
 0x3b0   : > { %2426 = vst [vmem:[#allocation2 + $0x18] sm:$0xff] %v2410_v17  ;;  %v2367_v2 = vsub.f32 1.0, %v2267_v8 }
 0x3b1   : > { %2424 = vst [vmem:[#allocation2 + $0x8] sm:$0xff] %v2408_v26  ;;  %v2370_v17 = vsub.f32 1.0, %v2270_v32  ;;  %v2368_v26 = vsub.f32 1.0, %v2268_v11  ;;  %vm2321_vm11 = vcmp.gt.s32.totalorder %v2286_v52, %v4969_v51  ;;  %vm2319_vm12 = vcmp.gt.s32.totalorder %v2284_v41, %v4969_v51 }
 0x3b2   : > { %v2383_v45 = vmul.f32 1e+12, %v2367_v2  ;;  %v2337_v6 = vsel %vm2321_vm11, -1e+12, %v3680_v1 }
 0x3b3   : > { %v2386_v55 = vmul.f32 1e+12, %v2370_v17  ;;  %v2384_v5 = vmul.f32 1e+12, %v2368_v26 }
 0x3b7   : > { %v3366_v57 = vpop.f32.mrb[4].mxu0 }
 0x3b8   : > { %v2349_v62 = vmul.f32 %v3366_v57, %v2265_v27  ;;  %v2109_v39 = vpop.f32.mrb[5].mxu0  ;;  %v2287_v27 = vadd.s32 88, %v4960_v63  ;;  %v2335_v57 = vsel %vm2319_vm12, -1e+12, %v3680_v1 }
 0x3b9   : > { %v2347_v20 = vmul.f32 %v2263_v9, %v2109_v39  ;;  %v3367_v30 = vpop.f32.mrb[6].mxu0  ;;  %v2285_v9 = vadd.s32 72, %v4960_v63 }
 0x3ba   : > { %v2397_v37 = vsub.f32 %v2349_v62, %v2381_v58  ;;  %v2350_v19 = vmul.f32 %v3367_v30, %v2266_v4  ;;  %v2112_v43 = vpop.f32.mrb[7].mxu0  ;;  %v2385_v4 = vmul.f32 1e+12, %v2369_v50  ;;  %vm2322_vm13 = vcmp.gt.s32.totalorder %v2287_v27, %v4969_v51 }
 0x3bb   : > { %v2395_v60 = vsub.f32 %v2347_v20, %v2379_v12  ;;  %v2348_v46 = vmul.f32 %v2264_v7, %v2112_v43  ;;  %v5023_v7 = vpop.permute.xlu0 %2240  ;;  %vm2320_vm14 = vcmp.gt.s32.totalorder %v2285_v9, %v4969_v51 }
 0x3bc   : > { %v2413_v54 = vadd.f32 %v2397_v37, %v2333_v22  ;;  %v2398_v16 = vsub.f32 %v2350_v19, %v2382_v31  ;;  %v2336_v37 = vsel %vm2320_vm14, -1e+12, %v3680_v1 }
 0x3bd   : > { %v2411_v24 = vadd.f32 %v2395_v60, %v2331_v35  ;;  %v2396_v49 = vsub.f32 %v2348_v46, %v2380_v15  ;;  %v2338_v15 = vsel %vm2322_vm13, -1e+12, %v3680_v1  ;;  %v2273_v60 = vmul.f32 %v4951_v33, %v4948_v13 }
 0x3be   : > { %2429 = vst [vmem:[#allocation2 + $0x30] sm:$0xff] %v2413_v54  ;;  %v2414_v59 = vadd.f32 %v2398_v16, %v2334_v36  ;;  %v2271_v46 = vmul.f32 %v4951_v33, %v4946_v61 }
 0x3bf   : > { %2427 = vst [vmem:[#allocation2 + $0x20] sm:$0xff] %v2411_v24  ;;  %v2412_v29 = vadd.f32 %v2396_v49, %v2332_v28  ;;  %v5032_v35 = vpop.permute.xlu0 %2250  ;;  %v2272_v28 = vmul.f32 %v4951_v33, %v5023_v7  ;;  %v2373_v24 = vsub.f32 1.0, %v2273_v60  ;;  %v2290_v49 = vadd.s32 112, %v4960_v63 }
 0x3c0   : > { %2430 = vst [vmem:[#allocation2 + $0x38] sm:$0xff] %v2414_v59  ;;  %v2274_v16 = vmul.f32 %v4951_v33, %v5032_v35  ;;  %v2371_v59 = vsub.f32 1.0, %v2271_v46 }
 0x3c1   : > { %2428 = vst [vmem:[#allocation2 + $0x28] sm:$0xff] %v2412_v29  ;;  %v2389_v50 = vmul.f32 1e+12, %v2373_v24  ;;  %vm2325_vm15 = vcmp.gt.s32.totalorder %v2290_v49, %v4969_v51 }
 0x3c2   : > { %v2374_v29 = vsub.f32 1.0, %v2274_v16  ;;  %v2387_v52 = vmul.f32 1e+12, %v2371_v59  ;;  %v2341_v26 = vsel %vm2325_vm15, -1e+12, %v3680_v1 }
 0x3c4   : > { %v2390_v33 = vmul.f32 1e+12, %v2374_v29 }
 0x3c7   : > { %v3370_v53 = vpop.f32.mrb[8].mxu0 }
 0x3c8   : > { %v2353_v56 = vmul.f32 %v3370_v53, %v2269_v0  ;;  %v2125_v44 = vpop.f32.mrb[9].mxu0  ;;  %v2288_v0 = vadd.s32 96, %v4960_v63 }
 0x3c9   : > { %v2351_v47 = vmul.f32 %v2267_v8, %v2125_v44  ;;  %v3371_v58 = vpop.f32.mrb[10].mxu0  ;;  %v2291_v8 = vadd.s32 120, %v4960_v63 }
 0x3ca   : > { %v2401_v12 = vsub.f32 %v2353_v56, %v2385_v4  ;;  %v2354_v31 = vmul.f32 %v3371_v58, %v2270_v32  ;;  %v2128_v62 = vpop.f32.mrb[11].mxu0  ;;  %v2372_v32 = vsub.f32 1.0, %v2272_v28  ;;  %vm2323_vm0 = vcmp.gt.s32.totalorder %v2288_v0, %v4969_v51 }
 0x3cb   : > { %v2399_v39 = vsub.f32 %v2351_v47, %v2383_v45  ;;  %v2352_v22 = vmul.f32 %v2268_v11, %v2128_v62  ;;  %v2289_v11 = vadd.s32 104, %v4960_v63  ;;  %vm2326_vm1 = vcmp.gt.s32.totalorder %v2291_v8, %v4969_v51 }
 0x3cc   : > { %v2417_v20 = vadd.f32 %v2401_v12, %v2337_v6  ;;  %v2402_v30 = vsub.f32 %v2354_v31, %v2386_v55  ;;  %v2388_v27 = vmul.f32 1e+12, %v2372_v32  ;;  %v2339_v45 = vsel %vm2323_vm0, -1e+12, %v3680_v1  ;;  %v5057_v31 = vld [vmem:[%s5290_s8] ss:$0 sm:$0xff] }
 0x3cd   : > { %v2415_v19 = vadd.f32 %v2399_v39, %v2335_v57  ;;  %v2400_v43 = vsub.f32 %v2352_v22, %v2384_v5  ;;  %vm2324_vm2 = vcmp.gt.s32.totalorder %v2289_v11, %v4969_v51  ;;  %v2342_v44 = vsel %vm2326_vm1, -1e+12, %v3680_v1 }
 0x3ce   : > { %2433 = vst [vmem:[#allocation2 + $0x50] sm:$0xff] %v2417_v20  ;;  %v2418_v36 = vadd.f32 %v2402_v30, %v2338_v15  ;;  %v2340_v58 = vsel %vm2324_vm2, -1e+12, %v3680_v1 }
 0x3cf   : > { %2431 = vst [vmem:[#allocation2 + $0x40] sm:$0xff] %v2415_v19  ;;  %v2416_v54 = vadd.f32 %v2400_v43, %v2336_v37 }
 0x3d0   : > { %2434 = vst [vmem:[#allocation2 + $0x58] sm:$0xff] %v2418_v36 }
 0x3d1   : > { %2432 = vst [vmem:[#allocation2 + $0x48] sm:$0xff] %v2416_v54 }
 0x3d6   : > { %v3374_v2 = vpop.f32.mrb[12].mxu0 }
 0x3d7   : > { %v2357_v41 = vmul.f32 %v3374_v2, %v2273_v60  ;;  %v2141_v17 = vpop.f32.mrb[13].mxu0 }
 0x3d8   : > { %v2355_v9 = vmul.f32 %v2271_v46, %v2141_v17  ;;  %v3375_v4 = vpop.f32.mrb[14].mxu0 }
 0x3d9   : > { %v2405_v63 = vsub.f32 %v2357_v41, %v2389_v50  ;;  %v2358_v53 = vmul.f32 %v3375_v4, %v2274_v16  ;;  %v2144_v55 = vpop.f32.mrb[15].mxu0 }
 0x3da   : > { %v2403_v56 = vsub.f32 %v2355_v9, %v2387_v52  ;;  %v2356_v5 = vmul.f32 %v2272_v28, %v2144_v55 }
 0x3db   : > { %v2421_v6 = vadd.f32 %v2405_v63, %v2341_v26  ;;  %v2406_v47 = vsub.f32 %v2358_v53, %v2390_v33 }
 0x3dc   : > { %v2419_v12 = vadd.f32 %v2403_v56, %v2339_v45  ;;  %v2404_v57 = vsub.f32 %v2356_v5, %v2388_v27 }
 0x3dd   : > { %2437 = vst [vmem:[#allocation2 + $0x70] sm:$0xff] %v2421_v6  ;;  %v2422_v51 = vadd.f32 %v2406_v47, %v2342_v44 }
 0x3de   : > { %2435 = vst [vmem:[#allocation2 + $0x60] sm:$0xff] %v2419_v12  ;;  %v2420_v62 = vadd.f32 %v2404_v57, %v2340_v58  ;;  %v3414_v39 = vpop.f32.mrb[16].mxu0 }
 0x3df   : > { %2438 = vst [vmem:[#allocation2 + $0x78] sm:$0xff] %v2422_v51  ;;  %v2603_v15 = vadd.f32 %v3414_v39, %v5057_v31  ;;  %v2594_v22 = vpop.f32.mrb[17].mxu0 }
 0x3e0   : > { %2436 = vst [vmem:[#allocation2 + $0x68] sm:$0xff] %v2420_v62  ;;  %v2595_v20 = vadd.f32 %v5057_v31, %v2594_v22  ;;  %v3415_v1 = vpop.f32.mrb[18].mxu0 }
 0x3e1   : > { %v2659_v30 = vmul.f32 0.5, %v2603_v15  ;;  %v2606_v37 = vadd.f32 %v3415_v1, %v5057_v31  ;;  %v2597_v19 = vpop.f32.mrb[19].mxu0 }
 0x3e2   : > { %v2657_v43 = vmul.f32 0.5, %v2595_v20  ;;  %v2598_v60 = vadd.f32 %v5057_v31, %v2597_v19 }
 0x3e3   : > { %v2675_v36 = vmul.f32 %v2659_v30, %v4936_v10  ;;  %v2660_v46 = vmul.f32 0.5, %v2606_v37 }
 0x3e4   : > { %v2673_v54 = vmul.f32 %v2657_v43, %v4954_v38  ;;  %v2658_v16 = vmul.f32 0.5, %v2598_v60 }
 0x3e5   : > { %2692 = vst.msk [vmem:[#allocation4 + $0x10] sm:$0xff] %vm2689_vm3, %v2675_v36  ;;  %v2676_v28 = vmul.f32 %v2660_v46, %v4956_v34 }
 0x3e6   : > { %2690 = vst.msk [vmem:[#allocation4] sm:$0xff] %vm2689_vm3, %v2673_v54  ;;  %v2674_v24 = vmul.f32 %v2658_v16, %v4934_v40  ;;  %v3418_v49 = vpop.f32.mrb[20].mxu0 }
 0x3e7   : > { %2693 = vst.msk [vmem:[#allocation4 + $0x18] sm:$0xff] %vm2689_vm3, %v2676_v28  ;;  %v2619_v59 = vadd.f32 %v3418_v49, %v5057_v31  ;;  %v2610_v0 = vpop.f32.mrb[21].mxu0 }
 0x3e8   : > { %2691 = vst.msk [vmem:[#allocation4 + $0x8] sm:$0xff] %vm2689_vm3, %v2674_v24  ;;  %v2611_v10 = vadd.f32 %v5057_v31, %v2610_v0  ;;  %v3419_v38 = vpop.f32.mrb[22].mxu0 }
 0x3e9   : > { %v2663_v29 = vmul.f32 0.5, %v2619_v59  ;;  %v2622_v8 = vadd.f32 %v3419_v38, %v5057_v31  ;;  %v2613_v32 = vpop.f32.mrb[23].mxu0 }
 0x3ea   : > { %v2661_v34 = vmul.f32 0.5, %v2611_v10  ;;  %v2614_v11 = vadd.f32 %v5057_v31, %v2613_v32 }
 0x3eb   : > { %v2679_v40 = vmul.f32 %v2663_v29, %v4940_v23  ;;  %v2664_v50 = vmul.f32 0.5, %v2622_v8 }
 0x3ec   : > { %v2677_v52 = vmul.f32 %v2661_v34, %v4938_v21  ;;  %v2662_v2 = vmul.f32 0.5, %v2614_v11 }
 0x3ed   : > { %2696 = vst.msk [vmem:[#allocation4 + $0x30] sm:$0xff] %vm2689_vm3, %v2679_v40  ;;  %v2680_v33 = vmul.f32 %v2664_v50, %v4984_v14 }
 0x3ee   : > { %2694 = vst.msk [vmem:[#allocation4 + $0x20] sm:$0xff] %vm2689_vm3, %v2677_v52  ;;  %v2678_v41 = vmul.f32 %v2662_v2, %v4976_v3  ;;  %v3422_v17 = vpop.f32.mrb[24].mxu0 }
 0x3ef   : > { %2697 = vst.msk [vmem:[#allocation4 + $0x38] sm:$0xff] %vm2689_vm3, %v2680_v33  ;;  %v2635_v27 = vadd.f32 %v3422_v17, %v5057_v31  ;;  %v2626_v26 = vpop.f32.mrb[25].mxu0 }
 0x3f0   : > { %2695 = vst.msk [vmem:[#allocation4 + $0x28] sm:$0xff] %vm2689_vm3, %v2678_v41  ;;  %v2627_v23 = vadd.f32 %v5057_v31, %v2626_v26  ;;  %v3423_v21 = vpop.f32.mrb[26].mxu0 }
 0x3f1   : > { %v2667_v9 = vmul.f32 0.5, %v2635_v27  ;;  %v2638_v4 = vadd.f32 %v3423_v21, %v5057_v31  ;;  %v2629_v63 = vpop.f32.mrb[27].mxu0 }
 0x3f2   : > { %v2665_v14 = vmul.f32 0.5, %v2627_v23  ;;  %v2630_v45 = vadd.f32 %v5057_v31, %v2629_v63 }
 0x3f3   : > { %v2683_v3 = vmul.f32 %v2667_v9, %v4944_v42  ;;  %v2668_v53 = vmul.f32 0.5, %v2638_v4 }
 0x3f4   : > { %v2681_v55 = vmul.f32 %v2665_v14, %v4942_v25  ;;  %v2666_v56 = vmul.f32 0.5, %v2630_v45 }
 0x3f5   : > { %2700 = vst.msk [vmem:[#allocation4 + $0x50] sm:$0xff] %vm2689_vm3, %v2683_v3  ;;  %v2684_v44 = vmul.f32 %v2668_v53, %v5008_v18 }
 0x3f6   : > { %2698 = vst.msk [vmem:[#allocation4 + $0x40] sm:$0xff] %vm2689_vm3, %v2681_v55  ;;  %v2682_v5 = vmul.f32 %v2666_v56, %v5000_v48  ;;  %v3426_v6 = vpop.f32.mrb[28].mxu0 }
 0x3f7   : > { %2701 = vst.msk [vmem:[#allocation4 + $0x58] sm:$0xff] %vm2689_vm3, %v2684_v44  ;;  %v2651_v47 = vadd.f32 %v3426_v6, %v5057_v31  ;;  %v2642_v58 = vpop.f32.mrb[29].mxu0 }
 0x3f8   : > { %2699 = vst.msk [vmem:[#allocation4 + $0x48] sm:$0xff] %vm2689_vm3, %v2682_v5  ;;  %v2643_v42 = vadd.f32 %v5057_v31, %v2642_v58  ;;  %v3427_v25 = vpop.f32.mrb[30].mxu0 }
 0x3f9   : > { %v2671_v12 = vmul.f32 0.5, %v2651_v47  ;;  %v2654_v57 = vadd.f32 %v3427_v25, %v5057_v31  ;;  %v2645_v51 = vpop.f32.mrb[31].mxu0 }
 0x3fa   : > { %v2669_v18 = vmul.f32 0.5, %v2643_v42  ;;  %v2646_v62 = vadd.f32 %v5057_v31, %v2645_v51 }
 0x3fb   : > { %v2687_v48 = vmul.f32 %v2671_v12, %v4948_v13  ;;  %v2672_v39 = vmul.f32 0.5, %v2654_v57 }
 0x3fc   : > { %v2685_v15 = vmul.f32 %v2669_v18, %v4946_v61  ;;  %v2670_v22 = vmul.f32 0.5, %v2646_v62 }
 0x3fd   : > { %2704 = vst.msk [vmem:[#allocation4 + $0x70] sm:$0xff] %vm2689_vm3, %v2687_v48  ;;  %v2688_v20 = vmul.f32 %v2672_v39, %v5032_v35 }
 0x3fe   : > { %2702 = vst.msk [vmem:[#allocation4 + $0x60] sm:$0xff] %vm2689_vm3, %v2685_v15  ;;  %v2686_v1 = vmul.f32 %v2670_v22, %v5023_v7 }
 0x3ff   : > { %2705 = vst.msk [vmem:[#allocation4 + $0x78] sm:$0xff] %vm2689_vm3, %v2688_v20 }
 0x400   : > { %2703 = vst.msk [vmem:[#allocation4 + $0x68] sm:$0xff] %vm2689_vm3, %v2686_v1 }
 0x401 PF: > { %v2708_v31 = vlaneseq  ;;  %v2710_v13 = vstv %s3657_s16  ;;  %v2716_v37 = vld [vmem:[#allocation4 + $0x10] sm:$0xff]  ;;  %v3683_v61 = vmov 0   ;;  %v2714_v19 = vld [vmem:[#allocation4] sm:$0xff]  ;;  %v2717_v43 = vld [vmem:[#allocation4 + $0x18] sm:$0xff]  ;;  %v3684_v60 = vmov 0.0   ;;  %s3201_s18 = sshll.u32 %s3661_s17, 6 }
 0x402   : > { %3578 = vset.pattern.permute.xlu1 %v3683_v61  ;;  %3577 = vset.pattern.permute.xlu0 %v3683_v61  ;;  %v2715_v35 = vld [vmem:[#allocation4 + $0x8] sm:$0xff]  ;;  %vm2746_vm5 = vcmask 31744   ;;  %v2718_v24 = vld [vmem:[#allocation4 + $0x20] sm:$0xff]  ;;  %v2721_v8 = vld [vmem:[#allocation4 + $0x38] sm:$0xff]  ;;  %s5410_s26 = sld [smem:[#allocation9_spill]]  ;;  %s3016_s17 = sshll.u32 %s3854_s30, 4  ;;  %s5225_s17 = int_to_ptr.vmem [resolvable:$true] %s3016_s17 }
 0x403   : > { %v2709_v30 = vand.u32 127, %v2708_v31  ;;  %v2719_v28 = vld [vmem:[#allocation4 + $0x28] sm:$0xff]  ;;  %v2720_v32 = vld [vmem:[#allocation4 + $0x30] sm:$0xff]  ;;  %v2722_v2 = vld [vmem:[#allocation4 + $0x40] sm:$0xff]  ;;  %s5412_s27 = sld [smem:[#allocation61_spill]]  ;;  %s3579_s28 = scalar_lea.vmem %s5225_s17, 2048 }
 0x404   : > { %v2723_v52 = vld [vmem:[#allocation4 + $0x48] sm:$0xff]  ;;  %v2725_v26 = vld [vmem:[#allocation4 + $0x58] sm:$0xff]  ;;  %v2724_v23 = vld [vmem:[#allocation4 + $0x50] sm:$0xff]  ;;  %p3580_p0 = scmp.ne.s32.totalorder %s5225_s17, %s3579_s28  ;;  %s3685_s19 = smov [#allocation5]  }
 0x405   : > { %vm2711_vm4 = vcmp.eq.s32.totalorder %v2709_v30, %v2710_v13  ;;  %v2726_v45 = vld [vmem:[#allocation4 + $0x60] sm:$0xff]  ;;  %v2728_v5 = vld [vmem:[#allocation4 + $0x70] sm:$0xff] }
 0x406   : > { %v3196_v36 = vsel %vm2711_vm4, 1.0, %v3684_v60  ;;  %v2729_v44 = vld [vmem:[#allocation4 + $0x78] sm:$0xff]  ;;  %v2796_v57 = vld [vmem:[%s3852_s15 + $0x8] sm:$0xff]  ;;  %v2797_v51 = vld [vmem:[%s3852_s15 + $0x10] sm:$0xff]  ;;  %p3581_p1 = pnand %p3580_p0, %p3814_p3 }
 0x407   : > { %v2732_v7 = vmul.f32 %v3196_v36, %v2716_v37  ;;  %v2730_v46 = vmul.f32 %v3196_v36, %v2714_v19  ;;  %v2733_v54 = vmul.f32 %v3196_v36, %v2717_v43  ;;  %v2731_v16 = vmul.f32 %v3196_v36, %v2715_v35  ;;  %v2727_v14 = vld [vmem:[#allocation4 + $0x68] sm:$0xff]  ;;  %v2795_v18 = vld [vmem:[%s3852_s15] sm:$0xff]  ;;  %v2798_v62 = vld [vmem:[%s3852_s15 + $0x18] sm:$0xff] }
 0x408   : > { %v2735_v38 = vmul.f32 %v3196_v36, %v2719_v28  ;;  %v2734_v29 = vmul.f32 %v3196_v36, %v2718_v24  ;;  %v2737_v40 = vmul.f32 %v3196_v36, %v2721_v8  ;;  %v2736_v50 = vmul.f32 %v3196_v36, %v2720_v32  ;;  %v2804_v48 = vld [vmem:[%s3852_s15 + $0x48] sm:$0xff]  ;;  %v2799_v39 = vld [vmem:[%s3852_s15 + $0x20] sm:$0xff]  ;;  %v2806_v15 = vld [vmem:[%s3852_s15 + $0x58] sm:$0xff]  ;;  %s5413_s25 = sand.u32 1, %s5410_s26   ;;  %p3582_p2 = pneg %p3581_p1 }
 0x409   : > { %v2753_v49 = vsel %vm2746_vm5, %v2732_v7, 0.0  ;;  %v2747_v59 = vsel %vm2746_vm5, %v2730_v46, 0.0  ;;  %v2756_v0 = vsel %vm2746_vm5, %v2733_v54, 0.0  ;;  %v2750_v10 = vsel %vm2746_vm5, %v2731_v16, 0.0  ;;  %v2800_v22 = vld [vmem:[%s3852_s15 + $0x28] sm:$0xff]  ;;  %v2801_v1 = vld [vmem:[%s3852_s15 + $0x30] sm:$0xff] }
 0x40a   : > { %2754 = vadd.xlane.f32.xlu1 %v2753_v49  ;;  %2748 = vadd.xlane.f32.xlu0 %v2747_v59  ;;  %v2762_v34 = vsel %vm2746_vm5, %v2735_v38, 0.0  ;;  %v2759_v11 = vsel %vm2746_vm5, %v2734_v29, 0.0  ;;  %v2768_v33 = vsel %vm2746_vm5, %v2737_v40, 0.0  ;;  %v2765_v41 = vsel %vm2746_vm5, %v2736_v50, 0.0  ;;  %v2808_v20 = vld [vmem:[%s3852_s15 + $0x68] sm:$0xff]  ;;  %v2810_v31 = vld [vmem:[%s3852_s15 + $0x78] sm:$0xff] }
 0x40b   : > { %v2739_v17 = vmul.f32 %v3196_v36, %v2723_v52  ;;  %v2738_v27 = vmul.f32 %v3196_v36, %v2722_v2  ;;  %v2741_v4 = vmul.f32 %v3196_v36, %v2725_v26  ;;  %v2740_v63 = vmul.f32 %v3196_v36, %v2724_v23  ;;  %v2802_v13 = vld [vmem:[%s3852_s15 + $0x38] sm:$0xff]  ;;  %v2803_v30 = vld [vmem:[%s3852_s15 + $0x40] sm:$0xff]  ;;  %v2805_v37 = vld [vmem:[%s3852_s15 + $0x50] sm:$0xff]  ;;  %s5230_s29 = scalar_lea.sflag [#allocation6], %s5413_s25 }
 0x40c   : > { %v2743_v55 = vmul.f32 %v3196_v36, %v2727_v14  ;;  %v2742_v56 = vmul.f32 %v3196_v36, %v2726_v45  ;;  %v2745_v58 = vmul.f32 %v3196_v36, %v2729_v44  ;;  %v2744_v42 = vmul.f32 %v3196_v36, %v2728_v5  ;;  %v2807_v61 = vld [vmem:[%s3852_s15 + $0x60] sm:$0xff]  ;;  %v2809_v19 = vld [vmem:[%s3852_s15 + $0x70] sm:$0xff]  ;;  %s2706_s15 = scalar_lea.vmem [#allocation3], %s3657_s16  ;;  %v2813_v32 = vld [vmem:[#allocation2 + $0x8] sm:$0xff] }
 0x40d   : > { %v2774_v21 = vsel %vm2746_vm5, %v2739_v17, 0.0  ;;  %v2771_v9 = vsel %vm2746_vm5, %v2738_v27, 0.0  ;;  %v2780_v3 = vsel %vm2746_vm5, %v2741_v4, 0.0  ;;  %v2777_v53 = vsel %vm2746_vm5, %v2740_v63, 0.0  ;;  %v5155_v29 = vld [vmem:[%s2706_s15] ss:$0 sm:$0xff] }
 0x40e   : > { %2757 = vadd.xlane.f32.xlu1 %v2756_v0  ;;  %2751 = vadd.xlane.f32.xlu0 %v2750_v10  ;;  %v2786_v6 = vsel %vm2746_vm5, %v2743_v55, 0.0  ;;  %v2783_v47 = vsel %vm2746_vm5, %v2742_v56, 0.0  ;;  %v2792_v25 = vsel %vm2746_vm5, %v2745_v58, 0.0  ;;  %v2789_v12 = vsel %vm2746_vm5, %v2744_v42, 0.0  ;;  %v5161_v40 = vld [vmem:[%s3842_s24] ss:$0 sm:$0xff] }
 0x40f   : > { %v2814_v2 = vld [vmem:[#allocation2 + $0x10] sm:$0xff]  ;;  %v2815_v14 = vld [vmem:[#allocation2 + $0x18] sm:$0xff]  ;;  %s3200_s24 = sshll.u32 %s3657_s16, 4  ;;  %s3583_s15 = sshll.u32 %s3685_s19, 4  ;;  %s3584_s15 = int_to_ptr.vmem [resolvable:$false] %s3583_s15 }
 0x410   : > { %s3013_s23 = sadd.s32 %s3201_s18, %s3200_s24  ;;  %s3585_s24 = scalar_lea.vmem %s3584_s15, 4096 }
 0x411   : > { %s3202_s16 = sshll.u32 %s3013_s23, 7  ;;  %p3586_p4 = scmp.lt.s32.totalorder %s5225_s17, %s3584_s15 }
 0x412   : > { %2763 = vadd.xlane.f32.xlu1 %v2762_v34  ;;  %2760 = vadd.xlane.f32.xlu0 %v2759_v11  ;;  %s5223_s22 = scalar_lea.hbm %s5412_s27, %s3202_s16  ;;  %p3587_p5 = scmp.lt.s32.totalorder %s3585_s24, %s3579_s28 }
 0x414   : > { %p3588_p6 = por %p3587_p5, %p3586_p4 }
 0x416   : > { %2769 = vadd.xlane.f32.xlu1 %v2768_v33  ;;  %2766 = vadd.xlane.f32.xlu0 %v2765_v41  ;;  %v2812_v41 = vld [vmem:[#allocation2] sm:$0xff]  ;;  %p3589_p7 = pnand %p3588_p6, %p3582_p2 }
 0x41a   : > { %2775 = vadd.xlane.f32.xlu1 %v2774_v21  ;;  %2772 = vadd.xlane.f32.xlu0 %v2771_v9 }
 0x41e   : > { %2781 = vadd.xlane.f32.xlu1 %v2780_v3  ;;  %2778 = vadd.xlane.f32.xlu0 %v2777_v53  ;;  %v2821_v3 = vld [vmem:[#allocation2 + $0x48] sm:$0xff] }
 0x422   : > { %2787 = vadd.xlane.f32.xlu1 %v2786_v6  ;;  %2784 = vadd.xlane.f32.xlu0 %v2783_v47 }
 0x426   : > { %2793 = vadd.xlane.f32.xlu1 %v2792_v25  ;;  %2790 = vadd.xlane.f32.xlu0 %v2789_v12  ;;  %v2816_v25 = vld [vmem:[#allocation2 + $0x20] sm:$0xff] }
 0x437   : > { %2835 = vperm.xlu1 %3578, %v2796_v57   ;;  %v2823_v57 = vld [vmem:[#allocation2 + $0x58] sm:$0xff] }
 0x43b   : > { %2840 = vperm.xlu1 %3578, %v2797_v51  }
 0x43c   : > { %2830 = vperm.xlu0 %3577, %v2795_v18  }
 0x43f   : > { %2845 = vperm.xlu1 %3578, %v2798_v62  }
 0x440   : > { %2875 = vperm.xlu0 %3577, %v2804_v48  }
 0x443   : > { %2850 = vperm.xlu1 %3578, %v2799_v39  }
 0x444   : > { %2885 = vperm.xlu0 %3577, %v2806_v15  }
 0x447   : > { %2855 = vperm.xlu1 %3578, %v2800_v22  }
 0x448   : > { %2895 = vperm.xlu0 %3577, %v2808_v20  }
 0x44b   : > { %2860 = vperm.xlu1 %3578, %v2801_v1  }
 0x44c   : > { %2905 = vperm.xlu0 %3577, %v2810_v31   ;;  %v2817_v31 = vld [vmem:[#allocation2 + $0x28] sm:$0xff] }
 0x44f   : > { %2865 = vperm.xlu1 %3578, %v2802_v13  }
 0x453   : > { %2870 = vperm.xlu1 %3578, %v2803_v30   ;;  %v2825_v30 = vld [vmem:[#allocation2 + $0x68] sm:$0xff] }
 0x457   : > { %2880 = vperm.xlu1 %3578, %v2805_v37  }
 0x45b   : > { %2890 = vperm.xlu1 %3578, %v2807_v61  }
 0x45f   : > { %2900 = vperm.xlu1 %3578, %v2809_v19  }
 0x497   : > { %v2755_v43 = vpop.xlane.xlu1 %2754  ;;  %v2749_v35 = vpop.xlane.xlu0 %2748 }
 0x498   : > { %v2952_v21 = vmul.f32 %v5161_v40, %v2755_v43  ;;  %v2950_v9 = vmul.f32 %v5161_v40, %v2749_v35 }
 0x49b   : > { %v2758_v60 = vpop.xlane.xlu1 %2757  ;;  %v2752_v36 = vpop.xlane.xlu0 %2751 }
 0x49c   : > { %v2951_v50 = vmul.f32 %v5161_v40, %v2752_v36  ;;  %v2953_v6 = vmul.f32 %v5161_v40, %v2758_v60 }
 0x49f   : > { %v5140_v7 = vpop.xlane.xlu1 %2763  ;;  %v2761_v46 = vpop.xlane.xlu0 %2760 }
 0x4a0   : > { %v2954_v15 = vmul.f32 %v5161_v40, %v2761_v46  ;;  %v2955_v60 = vmul.f32 %v5161_v40, %v5140_v7 }
 0x4a3   : > { %v5142_v54 = vpop.xlane.xlu1 %2769  ;;  %v5144_v16 = vpop.xlane.xlu0 %2766 }
 0x4a7   : > { %v2776_v28 = vpop.xlane.xlu1 %2775  ;;  %v5146_v24 = vpop.xlane.xlu0 %2772 }
 0x4a8   : > { %v2959_v47 = vmul.f32 %v5161_v40, %v2776_v28 }
 0x4ab   : > { %v2782_v49 = vpop.xlane.xlu1 %2781  ;;  %v5148_v59 = vpop.xlane.xlu0 %2778 }
 0x4ac   : > { %v2961_v22 = vmul.f32 %v5161_v40, %v2782_v49  ;;  %v2818_v49 = vld [vmem:[#allocation2 + $0x30] sm:$0xff] }
 0x4af   : > { %v2788_v0 = vpop.xlane.xlu1 %2787  ;;  %v5150_v10 = vpop.xlane.xlu0 %2784 }
 0x4b0   : > { %v2963_v36 = vmul.f32 %v5161_v40, %v2788_v0  ;;  %v2956_v0 = vmul.f32 %v5161_v40, %v5144_v16 }
 0x4b3   : > { %v5152_v38 = vpop.xlane.xlu1 %2793  ;;  %v5157_v8 = vpop.xlane.xlu0 %2790 }
 0x4b7   : > { %v2836_v34 = vpop.permute.xlu1 %2835 }
 0x4b8   : > { %v2913_v11 = vmul.f32 %v5155_v29, %v2836_v34  ;;  %v2827_v34 = vld [vmem:[#allocation2 + $0x78] sm:$0xff] }
 0x4ba   : > { %v2929_v52 = vadd.f32 %v2913_v11, %v2813_v32 }
 0x4bb   : > { %v2841_v33 = vpop.permute.xlu1 %2840  ;;  %v2831_v17 = vpop.permute.xlu0 %2830 }
 0x4bc   : > { %v2967_v27 = vadd.f32 %v2951_v50, %v2929_v52  ;;  %v2914_v26 = vmul.f32 %v5155_v29, %v2841_v33  ;;  %v2912_v23 = vmul.f32 %v5155_v29, %v2831_v17  ;;  %v2965_v33 = vmul.f32 %v5161_v40, %v5152_v38  ;;  %v2820_v38 = vld [vmem:[#allocation2 + $0x40] sm:$0xff] }
 0x4be   : > { %2983 = vst [vmem:[%s3854_s30 + $0x8] sm:$0xff] %v2967_v27  ;;  %v2930_v4 = vadd.f32 %v2914_v26, %v2814_v2  ;;  %v2928_v63 = vadd.f32 %v2912_v23, %v2812_v41  ;;  %v2819_v27 = vld [vmem:[#allocation2 + $0x38] sm:$0xff] }
 0x4bf   : > { %v2846_v45 = vpop.permute.xlu1 %2845  ;;  %v2876_v53 = vpop.permute.xlu0 %2875 }
 0x4c0   : > { %v2968_v55 = vadd.f32 %v2952_v21, %v2930_v4  ;;  %v2966_v56 = vadd.f32 %v2950_v9, %v2928_v63  ;;  %v2915_v44 = vmul.f32 %v5155_v29, %v2846_v45  ;;  %v2921_v5 = vmul.f32 %v5155_v29, %v2876_v53 }
 0x4c1   : > { %v2957_v4 = vmul.f32 %v5161_v40, %v5142_v54 }
 0x4c2   : > { %2984 = vst [vmem:[%s3854_s30 + $0x10] sm:$0xff] %v2968_v55  ;;  %2982 = vst [vmem:[%s3854_s30] sm:$0xff] %v2966_v56  ;;  %v2931_v58 = vadd.f32 %v2915_v44, %v2815_v14  ;;  %v2937_v42 = vadd.f32 %v2921_v5, %v2821_v3  ;;  %v2958_v3 = vmul.f32 %v5161_v40, %v5146_v24  ;;  %v2822_v55 = vld [vmem:[#allocation2 + $0x50] sm:$0xff] }
 0x4c3   : > { %v2851_v12 = vpop.permute.xlu1 %2850  ;;  %v2886_v51 = vpop.permute.xlu0 %2885  ;;  %v2960_v5 = vmul.f32 %v5161_v40, %v5148_v59  ;;  %v2826_v59 = vld [vmem:[#allocation2 + $0x70] sm:$0xff] }
 0x4c4   : > { %v2969_v18 = vadd.f32 %v2953_v6, %v2931_v58  ;;  %v2975_v62 = vadd.f32 %v2959_v47, %v2937_v42  ;;  %v2916_v48 = vmul.f32 %v5155_v29, %v2851_v12  ;;  %v2923_v39 = vmul.f32 %v5155_v29, %v2886_v51  ;;  %v2824_v47 = vld [vmem:[#allocation2 + $0x60] sm:$0xff] }
 0x4c6   : > { %2985 = vst [vmem:[%s3854_s30 + $0x18] sm:$0xff] %v2969_v18  ;;  %2991 = vst [vmem:[%s3854_s30 + $0x48] sm:$0xff] %v2975_v62  ;;  %v2932_v20 = vadd.f32 %v2916_v48, %v2816_v25  ;;  %v2939_v1 = vadd.f32 %v2923_v39, %v2823_v57  ;;  %v2962_v25 = vmul.f32 %v5161_v40, %v5150_v10 }
 0x4c7   : > { %v2856_v13 = vpop.permute.xlu1 %2855  ;;  %v2896_v37 = vpop.permute.xlu0 %2895  ;;  %v2964_v62 = vmul.f32 %v5161_v40, %v5157_v8 }
 0x4c8   : > { %v2970_v61 = vadd.f32 %v2954_v15, %v2932_v20  ;;  %v2977_v19 = vadd.f32 %v2961_v22, %v2939_v1  ;;  %v2917_v43 = vmul.f32 %v5155_v29, %v2856_v13  ;;  %v2925_v35 = vmul.f32 %v5155_v29, %v2896_v37 }
 0x4ca   : > { %2986 = vst [vmem:[%s3854_s30 + $0x20] sm:$0xff] %v2970_v61  ;;  %2993 = vst [vmem:[%s3854_s30 + $0x58] sm:$0xff] %v2977_v19  ;;  %v2933_v46 = vadd.f32 %v2917_v43, %v2817_v31  ;;  %v2941_v28 = vadd.f32 %v2925_v35, %v2825_v30 }
 0x4cb   : > { %v2861_v32 = vpop.permute.xlu1 %2860  ;;  %v2906_v11 = vpop.permute.xlu0 %2905 }
 0x4cc   : > { %v2971_v50 = vadd.f32 %v2955_v60, %v2933_v46  ;;  %v2979_v52 = vadd.f32 %v2963_v36, %v2941_v28  ;;  %v2918_v2 = vmul.f32 %v5155_v29, %v2861_v32  ;;  %v2927_v7 = vmul.f32 %v5155_v29, %v2906_v11 }
 0x4ce   : > { %2987 = vst [vmem:[%s3854_s30 + $0x28] sm:$0xff] %v2971_v50  ;;  %2995 = vst [vmem:[%s3854_s30 + $0x68] sm:$0xff] %v2979_v52  ;;  %v2934_v41 = vadd.f32 %v2918_v2, %v2818_v49  ;;  %v2943_v17 = vadd.f32 %v2927_v7, %v2827_v34 }
 0x4cf   : > { %v2866_v26 = vpop.permute.xlu1 %2865 }
 0x4d0   : > { %v2972_v23 = vadd.f32 %v2956_v0, %v2934_v41  ;;  %v2981_v21 = vadd.f32 %v2965_v33, %v2943_v17  ;;  %v2919_v9 = vmul.f32 %v5155_v29, %v2866_v26 }
 0x4d2   : > { %2988 = vst [vmem:[%s3854_s30 + $0x30] sm:$0xff] %v2972_v23  ;;  %2997 = vst [vmem:[%s3854_s30 + $0x78] sm:$0xff] %v2981_v21  ;;  %v2935_v16 = vadd.f32 %v2919_v9, %v2819_v27 }
 0x4d3   : > { %v2871_v63 = vpop.permute.xlu1 %2870 }
 0x4d4   : > { %v2973_v14 = vadd.f32 %v2957_v4, %v2935_v16  ;;  %v2920_v45 = vmul.f32 %v5155_v29, %v2871_v63 }
 0x4d6   : > { %2989 = vst [vmem:[%s3854_s30 + $0x38] sm:$0xff] %v2973_v14  ;;  %v2936_v53 = vadd.f32 %v2920_v45, %v2820_v38 }
 0x4d7   : > { %v2881_v56 = vpop.permute.xlu1 %2880 }
 0x4d8   : > { %v2974_v54 = vadd.f32 %v2958_v3, %v2936_v53  ;;  %v2922_v44 = vmul.f32 %v5155_v29, %v2881_v56 }
 0x4da   : > { %2990 = vst [vmem:[%s3854_s30 + $0x40] sm:$0xff] %v2974_v54  ;;  %v2938_v6 = vadd.f32 %v2922_v44, %v2822_v55 }
 0x4db   : > { %v2891_v58 = vpop.permute.xlu1 %2890 }
 0x4dc   : > { %v2976_v24 = vadd.f32 %v2960_v5, %v2938_v6  ;;  %v2924_v42 = vmul.f32 %v5155_v29, %v2891_v58 }
 0x4de   : > { %2992 = vst [vmem:[%s3854_s30 + $0x50] sm:$0xff] %v2976_v24  ;;  %v2940_v12 = vadd.f32 %v2924_v42, %v2824_v47 }
 0x4df   : > { %v2901_v57 = vpop.permute.xlu1 %2900 }
 0x4e0   : > { %v2978_v51 = vadd.f32 %v2962_v25, %v2940_v12  ;;  %v2926_v18 = vmul.f32 %v5155_v29, %v2901_v57 }
 0x4e2   : > { %2994 = vst [vmem:[%s3854_s30 + $0x60] sm:$0xff] %v2978_v51  ;;  %v2942_v48 = vadd.f32 %v2926_v18, %v2826_v59 }
 0x4e4   : > { %v2980_v10 = vadd.f32 %v2964_v62, %v2942_v48 }
 0x4e6   : > { %2996 = vst [vmem:[%s3854_s30 + $0x70] sm:$0xff] %v2980_v10 }
 0x4e7   : > { %3592 = shalt.err (!%p3589_p7)
}
 0x4e8   : > { %s3593_s30 = scalar_lea.hbm %s5223_s22, 2048  ;;  %s3597_s26 = scalar_lea.hbm %s5412_s27, 16384 }
 0x4e9   : > { %p3594_p9 = scmp.ne.s32.totalorder %s5223_s22, %s3593_s30  ;;  %p3598_p12 = scmp.lt.u32.totalorder %s5223_s22, %s5412_s27 }
 0x4ea   : > { %p3599_p13 = scmp.lt.u32.totalorder %s3597_s26, %s3593_s30  ;;  %p3601_p1 = scmp.lt.u32.totalorder %s3593_s30, %s5223_s22 }
 0x4eb   : > { %p3595_p10 = pnand %p3594_p9, %p3814_p3 }
 0x4ec   : > { %p3600_p0 = por %p3599_p13, %p3598_p12 }
 0x4ed   : > { %p3596_p11 = pneg %p3595_p10 }
 0x4ee   : > { %p3602_p2 = por %p3601_p1, %p3600_p0 }
 0x4f0   : > { %p3603_p4 = pnand %p3602_p2, %p3596_p11 }
 0x4f2   : > { %3606 = shalt.err (!%p3603_p4)
}
 0x4f3   : > { %s3686_s20 = smov 128   ;;  %s3687_s25 = smov 8  }
 0x4f4   : > { %3436 = dma.vmem_to_hbm [thread:$0]  (%p3814_p3), %s5225_s17, 2048, %s5223_s22, %s5230_s29, %s3686_s20, %s3686_s20, %s3687_s25  }
 0x4f5 PF: > { %s5414_s28 = sld [smem:[#allocation13_spill]]  ;;  %s5415_s19 = sld [smem:[#allocation8_spill]] }
 0x4fb   : > { %p3442_p5 = scmp.ge.s32.totalorder %s5414_s28, 2  ;;  %s3031_s24 = sand.u32 1, %s5415_s19  }
 0x4fc   : > { %s3032_s30 = scalar_lea.sflag [#allocation6], %s3031_s24 }
 0x4fd   : > { %p3439_p6 = pnand %p3442_p5, %p3823_p8 }
 0x4ff   : > { %3640 = dma.done.wait (!%p3439_p6), %s3032_s30, 2048  }
 0x500   : > { %3642 = vsyncadd (!%p3439_p6), %s3032_s30, 4294965248  ;;  %s27_s20 = sadd.s32 1, %s5414_s28   ;;  %s5417_s29 = sld [smem:[#allocation9_spill]] }
 0x501   : > { %p24_p7 = scmp.ge.s32.totalorder %s27_s20, 10   ;;  %s5418_s30 = sld [smem:[#allocation10_spill]] }
 0x502   : > { %s5419_s15 = sld [smem:[#allocation18_spill]]  ;;  %s5420_s16 = sld [smem:[#allocation11_spill]] }
 0x503   : > { %s5421_s17 = sld [smem:[#allocation12_spill]]  ;;  %s5422_s18 = sld [smem:[#allocation14_spill]] }
 0x504   : > { %s5423_s19 = sld [smem:[#allocation16_spill]]  ;;  %26 = sbr.rel (!%p24_p7) target bundleno = 7 (0x7), region = 126 }
 0x50b   :  { %3037 = vsyncpa [#allocation6], 1 }
 0x50c   :  { %3039 = vsyncpa [#allocation6 + $0x1], 1 }

</bundles_post_ra>
